<compile_context>
chip_gen: v5e
topology: v5e:2x2
jax: 0.10.0
libtpu: 0.0.40
codegen_flags: <defaults>
</compile_context>

<pallas_src>
import functools

import jax
import jax.numpy as jnp
from jax import lax
from jax.experimental import pallas as pl
from jax.experimental.pallas import tpu as pltpu


def _svdd_kernel(x_ref, w1_ref, w2_ref, w3_ref, w4_ref, w5_ref, c_ref,
                 out_ref, za_ref, zb_ref, s1_ref, s2_ref,
                 *, b_real, n_valid0, n_valid1, tile_n, sub_n, dims, mxu_dtype):
    h1, h2, h3, h4, h5 = dims
    t = pl.program_id(0)
    eps = jnp.float32(1e-5)
    slope = jnp.float32(0.01)            # F.leaky_relu default negative_slope
    inv_b = jnp.float32(1.0 / b_real)    # BN divides by the REAL batch size

    @pl.when(t == 0)
    def _init():
        s1_ref[...] = jnp.zeros_like(s1_ref)
        s2_ref[...] = jnp.zeros_like(s2_ref)

    # ---- streaming phase: fc1 on this packed batch tile + fused bn1 stats ---
    # The next x tile's DMA overlaps this matmul (BlockSpec pipelining).
    z1 = jnp.dot(x_ref[...], w1_ref[...], preferred_element_type=jnp.float32)
    r0 = pl.multiple_of(t * tile_n, tile_n)
    za_ref[pl.ds(r0, tile_n), :2 * h1] = z1.astype(za_ref.dtype)
    # f32 stats from the pre-downcast matmul result.  Padded x rows are exact
    # zeros -> their z1 rows are exact zeros -> no mask needed here.
    s1_ref[...] += jnp.sum(z1, axis=0, keepdims=True)
    s2_ref[...] += jnp.sum(z1 * z1, axis=0, keepdims=True)

    # ---- epilogue: layers 2..5 + distance, sub-tiled over the batch ---------
    @pl.when(t == pl.num_programs(0) - 1)
    def _epilogue():
        n_pad = za_ref.shape[0]
        n_sub = n_pad // sub_n

        def fold_stats(s1p, s2p, h):
            # The two h-lane blocks hold partial sums of the SAME features
            # (first / second half of the batch).  Fold + re-broadcast to the
            # packed layout with a tiny constant matmul (no lane shuffles):
            # F[k, f] = 1 iff k == f (mod h).
            two_h = 2 * h
            r_i = lax.broadcasted_iota(jnp.int32, (two_h, two_h), 0)
            c_i = lax.broadcasted_iota(jnp.int32, (two_h, two_h), 1)
            fmat = jnp.logical_or(jnp.logical_or(r_i == c_i, r_i == c_i + h),
                                  c_i == r_i + h).astype(jnp.float32)
            s1t = jnp.dot(s1p, fmat, preferred_element_type=jnp.float32)
            s2t = jnp.dot(s2p, fmat, preferred_element_type=jnp.float32)
            mean_p = s1t * inv_b
            # One-pass variance can go slightly negative in f32 -> clamp.
            var_p = jnp.maximum(s2t * inv_b - mean_p * mean_p, 0.0)
            return mean_p, lax.rsqrt(var_p + eps)

        def bn_lrelu_mask(z, mean_p, istd_p, row0, h):
            a = (z - mean_p) * istd_p
            a = jnp.where(a >= 0, a, slope * a)
            # Re-zero padded batch rows so they never pollute later stats.
            nt = z.shape[0]
            row = lax.broadcasted_iota(jnp.int32, (nt, 2 * h), 0) + row0
            col = lax.broadcasted_iota(jnp.int32, (nt, 2 * h), 1)
            limit = jnp.where(col < h, n_valid0, n_valid1)
            return a * (row < limit).astype(jnp.float32)

        def layer_pass(src_ref, w_in2, dst_ref, w_out2, w_ref, mean_p, istd_p):
            # One streamed pass per layer: normalize layer-k, matmul into
            # layer-(k+1), accumulate layer-(k+1) stats in f32, store bf16.
            h_in = w_in2 // 2

            def body(i, carry):
                s1c, s2c = carry
                rr = pl.multiple_of(i * sub_n, sub_n)
                z = src_ref[pl.ds(rr, sub_n), :w_in2].astype(jnp.float32)
                a = bn_lrelu_mask(z, mean_p, istd_p, rr, h_in)
                zn = jnp.dot(a.astype(mxu_dtype), w_ref[...],
                             preferred_element_type=jnp.float32)
                dst_ref[pl.ds(rr, sub_n), :w_out2] = zn.astype(dst_ref.dtype)
                return (s1c + jnp.sum(zn, axis=0, keepdims=True),
                        s2c + jnp.sum(zn * zn, axis=0, keepdims=True))

            zero = jnp.zeros((1, w_out2), jnp.float32)
            s1p, s2p = lax.fori_loop(0, n_sub, body, (zero, zero))
            return fold_stats(s1p, s2p, w_out2 // 2)

        mean1, istd1 = fold_stats(s1_ref[...], s2_ref[...], h1)
        mean2, istd2 = layer_pass(za_ref, 2 * h1, zb_ref, 2 * h2, w2_ref,
                                  mean1, istd1)
        mean3, istd3 = layer_pass(zb_ref, 2 * h2, za_ref, 2 * h3, w3_ref,
                                  mean2, istd2)
        mean4, istd4 = layer_pass(za_ref, 2 * h3, zb_ref, 2 * h4, w4_ref,
                                  mean3, istd3)

        # fc5 + squared distance, fused per sub-tile.  A tiny (2, 2*h5)
        # selector folds the two packed h5-lane blocks into the two output
        # rows -> lane-dense (2, sub_n) unmasked stores, no full-batch temps.
        sel_r = lax.broadcasted_iota(jnp.int32, (2, 2 * h5), 0)
        sel_c = lax.broadcasted_iota(jnp.int32, (2, 2 * h5), 1)
        sel = ((sel_c >= h5).astype(jnp.int32) == sel_r).astype(jnp.float32)
        cvec = c_ref[...]

        def final_body(i, carry):
            rr = pl.multiple_of(i * sub_n, sub_n)
            z = zb_ref[pl.ds(rr, sub_n), :2 * h4].astype(jnp.float32)
            a = bn_lrelu_mask(z, mean4, istd4, rr, h4)
            z5 = jnp.dot(a.astype(mxu_dtype), w5_ref[...],
                         preferred_element_type=jnp.float32)
            d = z5 - cvec
            dd = d * d
            out_ref[i] = lax.dot_general(
                sel, dd, dimension_numbers=(((1,), (1,)), ((), ())),
                preferred_element_type=jnp.float32)
            return carry

        lax.fori_loop(0, n_sub, final_body, 0)


def svdd_forward(x, w1, w2, w3, w4, w5, c, *, tile_b=2048,
                 mxu_dtype=jnp.bfloat16, act_dtype=jnp.bfloat16):
    """x: [B, x_dim] f32; w_i: [in_i, out_i] (PyTorch weight transposed); c: [h5]."""
    B, x_dim = x.shape
    h1, h2, h3, h4, h5 = (w1.shape[1], w2.shape[1], w3.shape[1],
                          w4.shape[1], w5.shape[1])

    # Packed-row grid tile: 2 batch rows per packed row, multiple of 128 rows.
    tile_n = max(128, (int(tile_b) // 2 // 128) * 128)
    tile_n = min(tile_n, -(-((B + 1) // 2) // 128) * 128)   # avoid over-padding
    num_tiles = -(-B // (2 * tile_n))
    n_pad = num_tiles * tile_n
    b_pad = 2 * n_pad

    # Epilogue sub-tile (divides tile_n, multiple of 128, <= 512).
    sub_n = 128
    for cand in (512, 256, 128):
        if tile_n % cand == 0:
            sub_n = cand
            break
    n_sub_total = n_pad // sub_n

    # ---- 2x lane packing: batch rows j and j+n_pad share one lane row -------
    x_p = jnp.pad(x, ((0, b_pad - B), (0, 0))) if b_pad != B else x
    x_packed = jnp.concatenate([x_p[:n_pad], x_p[n_pad:]], axis=1)
    x_packed = x_packed.astype(mxu_dtype)

    def _bd(w):   # block-diagonal 2x duplication (weights are only a few KB)
        i, o = w.shape
        z = jnp.zeros((i, o), w.dtype)
        return jnp.concatenate(
            [jnp.concatenate([w, z], axis=1),
             jnp.concatenate([z, w], axis=1)], axis=0).astype(mxu_dtype)

    w1b, w2b, w3b, w4b, w5b = _bd(w1), _bd(w2), _bd(w3), _bd(w4), _bd(w5)
    c2 = jnp.concatenate([c, c]).reshape(1, 2 * h5).astype(jnp.float32)

    # Ping-pong activation scratches: z1/z3 live in A, z2/z4 in B.
    wA = 2 * max(h1, h3)
    wB = 2 * max(h2, h4)

    kernel = functools.partial(
        _svdd_kernel, b_real=B, n_valid0=min(B, n_pad),
        n_valid1=max(B - n_pad, 0), tile_n=tile_n, sub_n=sub_n,
        dims=(h1, h2, h3, h4, h5), mxu_dtype=mxu_dtype)

    # ---- VMEM budget (clamped to 3/4 of this device's VMEM) -----------------
    def lane_pad(w):
        return -(-w // 128) * 128

    act_bytes = jnp.dtype(act_dtype).itemsize
    mxu_bytes = jnp.dtype(mxu_dtype).itemsize
    w_elems = sum(int(w.size) for w in (w1b, w2b, w3b, w4b, w5b))
    est = (n_pad * (lane_pad(wA) + lane_pad(wB)) * act_bytes      # activations
           + 2 * lane_pad(2 * h1) * 4                             # bn1 stats
           + 2 * tile_n * lane_pad(2 * x_dim) * mxu_bytes         # x dbl-buffer
           + 2 * w_elems * mxu_bytes                              # resident weights
           + 2 * n_sub_total * 8 * sub_n * 4                      # output blocks
           + 12 * sub_n * lane_pad(2 * h1) * 4                    # epilogue temps
           + (4 << 20))
    try:
        vmem_cap = int(pltpu.get_tpu_info().vmem_capacity_bytes)
    except Exception:
        vmem_cap = 64 << 20   # conservative: v7x per-TC VMEM
    vmem_limit = int(min(max(est, 16 << 20), (3 * vmem_cap) // 4))

    cost = pl.CostEstimate(
        flops=2 * B * (x_dim * h1 + h1 * h2 + h2 * h3 + h3 * h4 + h4 * h5),
        transcendentals=4 * (h1 + h2 + h3 + h4),
        bytes_accessed=int(B * x_dim * mxu_bytes + B * 4 + w_elems * mxu_bytes))

    out = pl.pallas_call(
        kernel,
        out_shape=jax.ShapeDtypeStruct((n_sub_total, 2, sub_n), jnp.float32),
        grid_spec=pltpu.PrefetchScalarGridSpec(
            num_scalar_prefetch=0,
            grid=(num_tiles,),
            in_specs=[
                pl.BlockSpec((tile_n, 2 * x_dim), lambda t: (t, 0)),  # x: pipelined
                # Weights / center: constant index_maps -> VMEM resident.
                # (Single-buffering them via pipeline_mode would save ~50 KB
                # more; left out for compile-safety.)
                pl.BlockSpec(w1b.shape, lambda t: (0, 0)),
                pl.BlockSpec(w2b.shape, lambda t: (0, 0)),
                pl.BlockSpec(w3b.shape, lambda t: (0, 0)),
                pl.BlockSpec(w4b.shape, lambda t: (0, 0)),
                pl.BlockSpec(w5b.shape, lambda t: (0, 0)),
                pl.BlockSpec((1, 2 * h5), lambda t: (0, 0)),
            ],
            out_specs=pl.BlockSpec((n_sub_total, 2, sub_n), lambda t: (0, 0, 0)),
            scratch_shapes=[
                pltpu.VMEM((n_pad, wA), act_dtype),     # packed z1 / z3
                pltpu.VMEM((n_pad, wB), act_dtype),     # packed z2 / z4
                pltpu.VMEM((1, 2 * h1), jnp.float32),   # bn1 sum (full lanes)
                pltpu.VMEM((1, 2 * h1), jnp.float32),   # bn1 sum of squares
            ],
        ),
        compiler_params=pltpu.CompilerParams(
            # BN couples every row -> the batch axis is a sequential reduction.
            dimension_semantics=("arbitrary",),
            vmem_limit_bytes=vmem_limit,
        ),
        cost_estimate=cost,
    )(x_packed, w1b, w2b, w3b, w4b, w5b, c2)

    # out[s, 0, l] -> batch row s*sub_n + l ; out[s, 1, l] -> row n_pad + s*sub_n + l
    return out.transpose(1, 0, 2).reshape(b_pad)[:B]


def _init_linear_weight(key, in_dim, out_dim):
    # PyTorch nn.Linear default init U(-1/sqrt(in), 1/sqrt(in)), stored in
    # [in, out] layout (PyTorch weight transposed) so each layer is x @ W.
    bound = 1.0 / (in_dim ** 0.5)
    return jax.random.uniform(key, (in_dim, out_dim), jnp.float32, -bound, bound)


def svdd_reference_mirrored(x, w1, w2, w3, w4, w5, c, *,
                            mxu_dtype=jnp.bfloat16, act_dtype=jnp.bfloat16):
    """Pure-JAX reference mirroring the kernel's numerics (bf16 MXU operands,
    bf16 activation storage, f32 one-pass clamped BN stats)."""
    eps = jnp.float32(1e-5)
    inv_b = jnp.float32(1.0 / x.shape[0])

    def mm(a, w):
        return jnp.dot(a.astype(mxu_dtype), w.astype(mxu_dtype),
                       preferred_element_type=jnp.float32)

    def bn_lrelu(z):
        s1 = jnp.sum(z, axis=0, keepdims=True)
        s2 = jnp.sum(z * z, axis=0, keepdims=True)
        mean = s1 * inv_b
        var = jnp.maximum(s2 * inv_b - mean * mean, 0.0)
        istd = lax.rsqrt(var + eps)
        zq = z.astype(act_dtype).astype(jnp.float32)   # kernel's VMEM storage
        a = (zq - mean) * istd
        return jnp.where(a >= 0, a, 0.01 * a)

    h = bn_lrelu(mm(x, w1))
    h = bn_lrelu(mm(h, w2))
    h = bn_lrelu(mm(h, w3))
    h = bn_lrelu(mm(h, w4))
    z5 = mm(h, w5)
    return jnp.sum((z5 - c[None, :]) ** 2, axis=1)


def svdd_reference_f32(x, w1, w2, w3, w4, w5, c):
    """Full-f32 PyTorch-equivalent forward (training-mode BatchNorm1d with
    biased centered variance, affine=False, leaky_relu slope 0.01)."""
    eps = 1e-5

    def mm(a, w):
        return jnp.dot(a, w, precision=lax.Precision.HIGHEST)

    def bn_lrelu(z):
        mean = jnp.mean(z, axis=0, keepdims=True)
        var = jnp.mean((z - mean) ** 2, axis=0, keepdims=True)
        a = (z - mean) / jnp.sqrt(var + eps)
        return jnp.where(a >= 0, a, 0.01 * a)

    h = bn_lrelu(mm(x, w1))
    h = bn_lrelu(mm(h, w2))
    h = bn_lrelu(mm(h, w3))
    h = bn_lrelu(mm(h, w4))
    z5 = mm(h, w5)
    return jnp.sum((z5 - c[None, :]) ** 2, axis=1)


if __name__ == "__main__":
    # Module config (fc1..fc5 branch: h_dim5 > 0, h_dim6 == 0):
    #   x_dim=32, h1=64, h2=32, h3=32, h4=16, h5=16.
    # B=300 with tile_b=256 (-> 128 packed rows per grid step) exercises the
    # multi-tile grid, the sub-tiled epilogue loop, and the padded-row mask
    # path (b_pad = 512, rows 300..511 are padding).
    B, x_dim, h1, h2, h3, h4, h5 = 300, 32, 64, 32, 32, 16, 16

    key = jax.random.PRNGKey(0)
    kx, k1, k2, k3, k4, k5, kc = jax.random.split(key, 7)

    x = jax.random.normal(kx, (B, x_dim), jnp.float32)
    w1 = _init_linear_weight(k1, x_dim, h1)
    w2 = _init_linear_weight(k2, h1, h2)
    w3 = _init_linear_weight(k3, h2, h3)
    w4 = _init_linear_weight(k4, h3, h4)
    w5 = _init_linear_weight(k5, h4, h5)
    c = jax.random.normal(kc, (h5,), jnp.float32)   # SVDD center (non-trainable)
    R = jnp.float32(0.5)                            # radius param; unused in forward()

    dist = svdd_forward(x, w1, w2, w3, w4, w5, c, tile_b=256)
    dist = jax.block_until_ready(dist)
    assert dist.shape == (B,)

    # Tight check vs. a reference mirroring the kernel's own numerics.
    ref_mirror = svdd_reference_mirrored(x, w1, w2, w3, w4, w5, c)
    assert jnp.allclose(dist, ref_mirror, rtol=1e-2, atol=1e-2), (
        float(jnp.max(jnp.abs(dist - ref_mirror))), dist[:4], ref_mirror[:4])

    # Loose check vs. the true f32 PyTorch-equivalent forward pass (bounds the
    # compounded bf16 / one-pass-statistics error).
    ref_f32 = svdd_reference_f32(x, w1, w2, w3, w4, w5, c)
    assert jnp.allclose(dist, ref_f32, rtol=2e-1, atol=1.0), (
        float(jnp.max(jnp.abs(dist - ref_f32))), dist[:4], ref_f32[:4])

    print("KERNEL_OK")
</pallas_src>

<mosaic_0001>
module attributes {stable_mosaic.version = 11 : i64} {
  func.func @_svdd_kernel(%arg0: i32, %arg1: memref<128x64xbf16, #tpu.memory_space<vmem>>, %arg2: memref<64x128xbf16, #tpu.memory_space<vmem>>, %arg3: memref<128x64xbf16, #tpu.memory_space<vmem>>, %arg4: memref<64x64xbf16, #tpu.memory_space<vmem>>, %arg5: memref<64x32xbf16, #tpu.memory_space<vmem>>, %arg6: memref<32x32xbf16, #tpu.memory_space<vmem>>, %arg7: memref<1x32xf32, #tpu.memory_space<vmem>>, %arg8: memref<2x2x128xf32, #tpu.memory_space<vmem>>, %arg9: memref<256x128xbf16, #tpu.memory_space<vmem>>, %arg10: memref<256x64xbf16, #tpu.memory_space<vmem>>, %arg11: memref<1x128xf32, #tpu.memory_space<vmem>>, %arg12: memref<1x128xf32, #tpu.memory_space<vmem>>) attributes {dimension_semantics = [#tpu.dimension_semantics<arbitrary>], iteration_bounds = array<i64: 2>, scalar_prefetch = 0 : i64, scratch_operands = 4 : i64, tpu.core_type = #tpu.core_type<tc>, window_params = [{transform_indices = @transform_0, window_bounds = array<i64: 128, 64>}, {pipeline_mode = #tpu.pipeline_mode<synchronous>, transform_indices = @transform_1, window_bounds = array<i64: 64, 128>}, {pipeline_mode = #tpu.pipeline_mode<synchronous>, transform_indices = @transform_2, window_bounds = array<i64: 128, 64>}, {pipeline_mode = #tpu.pipeline_mode<synchronous>, transform_indices = @transform_3, window_bounds = array<i64: 64, 64>}, {pipeline_mode = #tpu.pipeline_mode<synchronous>, transform_indices = @transform_4, window_bounds = array<i64: 64, 32>}, {pipeline_mode = #tpu.pipeline_mode<synchronous>, transform_indices = @transform_5, window_bounds = array<i64: 32, 32>}, {pipeline_mode = #tpu.pipeline_mode<synchronous>, transform_indices = @transform_6, window_bounds = array<i64: 1, 32>}, {pipeline_mode = #tpu.pipeline_mode<synchronous>, transform_indices = @transform_7, window_bounds = array<i64: 2, 2, 128>}]} {
    %c0_i32 = arith.constant 0 : i32
    %0 = arith.cmpi eq, %arg0, %c0_i32 : i32
    %1 = arith.extui %0 : i1 to i32
    %c0_i32_0 = arith.constant 0 : i32
    %2 = arith.cmpi ne, %1, %c0_i32_0 : i32
    scf.if %2 {
      %cst_19 = arith.constant 0.000000e+00 : f32
      %25 = vector.broadcast %cst_19 : f32 to vector<1x128xf32>
      %c0_20 = arith.constant 0 : index
      %c0_21 = arith.constant 0 : index
      %26 = vector.load %arg11[%c0_20, %c0_21] : memref<1x128xf32, #tpu.memory_space<vmem>>, vector<1x128xf32>
      tpu.vector_store %arg11[%c0_20, %c0_21], %25 {strides = array<i32>} : memref<1x128xf32, #tpu.memory_space<vmem>>, vector<1x128xf32>,
      %cst_22 = arith.constant 0.000000e+00 : f32
      %27 = vector.broadcast %cst_22 : f32 to vector<1x128xf32>
      %c0_23 = arith.constant 0 : index
      %c0_24 = arith.constant 0 : index
      %28 = vector.load %arg12[%c0_23, %c0_24] : memref<1x128xf32, #tpu.memory_space<vmem>>, vector<1x128xf32>
      tpu.vector_store %arg12[%c0_23, %c0_24], %27 {strides = array<i32>} : memref<1x128xf32, #tpu.memory_space<vmem>>, vector<1x128xf32>,
    } else {
    }
    %c0 = arith.constant 0 : index
    %c0_1 = arith.constant 0 : index
    %3 = vector.load %arg1[%c0, %c0_1] : memref<128x64xbf16, #tpu.memory_space<vmem>>, vector<128x64xbf16>
    %c0_2 = arith.constant 0 : index
    %c0_3 = arith.constant 0 : index
    %4 = vector.load %arg2[%c0_2, %c0_3] : memref<64x128xbf16, #tpu.memory_space<vmem>>, vector<64x128xbf16>
    %cst = arith.constant dense<0.000000e+00> : vector<128x128xf32>
    %5 = tpu.matmul %3, %4, %cst {dimension_numbers = #tpu.dot_dimension_numbers<[1], [0], [0], [1], [0, 0, 1, 1], [], []>} : vector<128x64xbf16>, vector<64x128xbf16>, vector<128x128xf32> -> vector<128x128xf32>
    %c128_i32 = arith.constant 128 : i32
    %6 = arith.muli %arg0, %c128_i32 : i32
    %7 = tpu.assume_multiple %6, 128 : i32
    %8 = arith.truncf %5 : vector<128x128xf32> to vector<128x128xbf16>
    %9 = arith.index_cast %7 : i32 to index
    %c0_4 = arith.constant 0 : index
    %10 = vector.load %arg9[%9, %c0_4] : memref<256x128xbf16, #tpu.memory_space<vmem>>, vector<128x128xbf16>
    tpu.vector_store %arg9[%9, %c0_4], %8 {strides = array<i32>} : memref<256x128xbf16, #tpu.memory_space<vmem>>, vector<128x128xbf16>,
    %c0_5 = arith.constant 0 : index
    %c0_6 = arith.constant 0 : index
    %11 = vector.load %arg11[%c0_5, %c0_6] : memref<1x128xf32, #tpu.memory_space<vmem>>, vector<1x128xf32>
    %cst_7 = arith.constant dense<0.000000e+00> : vector<128xf32>
    %12 = vector.multi_reduction <add>, %5, %cst_7 [0] : vector<128x128xf32> to vector<128xf32>
    %13 = vector.shape_cast %12 : vector<128xf32> to vector<1x128xf32>
    %14 = arith.addf %11, %13 : vector<1x128xf32>
    %c0_8 = arith.constant 0 : index
    %c0_9 = arith.constant 0 : index
    %15 = vector.load %arg11[%c0_8, %c0_9] : memref<1x128xf32, #tpu.memory_space<vmem>>, vector<1x128xf32>
    tpu.vector_store %arg11[%c0_8, %c0_9], %14 {strides = array<i32>} : memref<1x128xf32, #tpu.memory_space<vmem>>, vector<1x128xf32>,
    %c0_10 = arith.constant 0 : index
    %c0_11 = arith.constant 0 : index
    %16 = vector.load %arg12[%c0_10, %c0_11] : memref<1x128xf32, #tpu.memory_space<vmem>>, vector<1x128xf32>
    %17 = arith.mulf %5, %5 : vector<128x128xf32>
    %cst_12 = arith.constant dense<0.000000e+00> : vector<128xf32>
    %18 = vector.multi_reduction <add>, %17, %cst_12 [0] : vector<128x128xf32> to vector<128xf32>
    %19 = vector.shape_cast %18 : vector<128xf32> to vector<1x128xf32>
    %20 = arith.addf %16, %19 : vector<1x128xf32>
    %c0_13 = arith.constant 0 : index
    %c0_14 = arith.constant 0 : index
    %21 = vector.load %arg12[%c0_13, %c0_14] : memref<1x128xf32, #tpu.memory_space<vmem>>, vector<1x128xf32>
    tpu.vector_store %arg12[%c0_13, %c0_14], %20 {strides = array<i32>} : memref<1x128xf32, #tpu.memory_space<vmem>>, vector<1x128xf32>,
    %c1_i32 = arith.constant 1 : i32
    %22 = arith.cmpi eq, %arg0, %c1_i32 : i32
    %23 = arith.extui %22 : i1 to i32
    %cst_15 = arith.constant 0.00333333341 : f32
    %cst_16 = arith.constant 9.99999974E-6 : f32
    %cst_17 = arith.constant 0.00999999977 : f32
    %c0_i32_18 = arith.constant 0 : i32
    %24 = arith.cmpi ne, %23, %c0_i32_18 : i32
    scf.if %24 {
      %c0_19 = arith.constant 0 : index
      %c0_20 = arith.constant 0 : index
      %25 = vector.load %arg11[%c0_19, %c0_20] : memref<1x128xf32, #tpu.memory_space<vmem>>, vector<1x128xf32>
      %c0_21 = arith.constant 0 : index
      %c0_22 = arith.constant 0 : index
      %26 = vector.load %arg12[%c0_21, %c0_22] : memref<1x128xf32, #tpu.memory_space<vmem>>, vector<1x128xf32>
      %27 = tpu.iota {dimensions = array<i32: 0>} : vector<128x128xi32>
      %28 = tpu.iota {dimensions = array<i32: 1>} : vector<128x128xi32>
      %29 = arith.cmpi eq, %27, %28 : vector<128x128xi32>
      %c64_i32 = arith.constant 64 : i32
      %30 = vector.broadcast %c64_i32 : i32 to vector<128x128xi32>
      %31 = arith.addi %28, %30 : vector<128x128xi32>
      %32 = arith.cmpi eq, %27, %31 : vector<128x128xi32>
      %33 = arith.ori %29, %32 : vector<128x128xi1>
      %c64_i32_23 = arith.constant 64 : i32
      %34 = vector.broadcast %c64_i32_23 : i32 to vector<128x128xi32>
      %35 = arith.addi %27, %34 : vector<128x128xi32>
      %36 = arith.cmpi eq, %28, %35 : vector<128x128xi32>
      %37 = arith.ori %33, %36 : vector<128x128xi1>
      %38 = arith.extui %37 : vector<128x128xi1> to vector<128x128xi32>
      %39 = arith.sitofp %38 : vector<128x128xi32> to vector<128x128xf32>
      %cst_24 = arith.constant dense<0.000000e+00> : vector<1x128xf32>
      %40 = tpu.matmul %25, %39, %cst_24 {dimension_numbers = #tpu.dot_dimension_numbers<[1], [0], [0], [1], [0, 0, 1, 1], [], []>} : vector<1x128xf32>, vector<128x128xf32>, vector<1x128xf32> -> vector<1x128xf32>
      %cst_25 = arith.constant dense<0.000000e+00> : vector<1x128xf32>
      %41 = tpu.matmul %26, %39, %cst_25 {dimension_numbers = #tpu.dot_dimension_numbers<[1], [0], [0], [1], [0, 0, 1, 1], [], []>} : vector<1x128xf32>, vector<128x128xf32>, vector<1x128xf32> -> vector<1x128xf32>
      %42 = vector.broadcast %cst_15 : f32 to vector<1x128xf32>
      %43 = arith.mulf %40, %42 : vector<1x128xf32>
      %44 = vector.broadcast %cst_15 : f32 to vector<1x128xf32>
      %45 = arith.mulf %41, %44 : vector<1x128xf32>
      %46 = arith.mulf %43, %43 : vector<1x128xf32>
      %47 = arith.subf %45, %46 : vector<1x128xf32>
      %cst_26 = arith.constant 0.000000e+00 : f32
      %48 = vector.broadcast %cst_26 : f32 to vector<1x128xf32>
      %49 = arith.maximumf %47, %48 : vector<1x128xf32>
      %50 = vector.broadcast %cst_16 : f32 to vector<1x128xf32>
      %51 = arith.addf %49, %50 : vector<1x128xf32>
      %52 = math.rsqrt %51 : vector<1x128xf32>
      %cst_27 = arith.constant 0.000000e+00 : f32
      %53 = vector.broadcast %cst_27 : f32 to vector<1x64xf32>
      %c0_i32_28 = arith.constant 0 : i32
      %c2_i32 = arith.constant 2 : i32
      %54 = arith.addi %c0_i32_28, %c2_i32 : i32
      %c1_i32_29 = arith.constant 1 : i32
      %55:2 = scf.for %arg13 = %c0_i32_28 to %54 step %c1_i32_29 iter_args(%arg14 = %53, %arg15 = %53) -> (vector<1x64xf32>, vector<1x64xf32>)  : i32 {
        %c128_i32_61 = arith.constant 128 : i32
        %150 = arith.muli %arg13, %c128_i32_61 : i32
        %151 = tpu.assume_multiple %150, 128 : i32
        %152 = arith.index_cast %151 : i32 to index
        %c0_62 = arith.constant 0 : index
        %153 = vector.load %arg9[%152, %c0_62] : memref<256x128xbf16, #tpu.memory_space<vmem>>, vector<128x128xbf16>
        %154 = arith.extf %153 : vector<128x128xbf16> to vector<128x128xf32>
        %155 = vector.broadcast %43 : vector<1x128xf32> to vector<128x128xf32>
        %156 = arith.subf %154, %155 : vector<128x128xf32>
        %157 = vector.broadcast %52 : vector<1x128xf32> to vector<128x128xf32>
        %158 = arith.mulf %156, %157 : vector<128x128xf32>
        %cst_63 = arith.constant 0.000000e+00 : f32
        %159 = vector.broadcast %cst_63 : f32 to vector<128x128xf32>
        %160 = arith.cmpf oge, %158, %159 : vector<128x128xf32>
        %161 = vector.broadcast %cst_17 : f32 to vector<128x128xf32>
        %162 = arith.mulf %161, %158 : vector<128x128xf32>
        %163 = arith.select %160, %158, %162 : vector<128x128xi1>, vector<128x128xf32>
        %164 = tpu.iota {dimensions = array<i32: 0>} : vector<128x128xi32>
        %165 = vector.broadcast %151 : i32 to vector<128x128xi32>
        %166 = arith.addi %164, %165 : vector<128x128xi32>
        %167 = tpu.iota {dimensions = array<i32: 1>} : vector<128x128xi32>
        %c64_i32_64 = arith.constant 64 : i32
        %168 = vector.broadcast %c64_i32_64 : i32 to vector<128x128xi32>
        %169 = arith.cmpi slt, %167, %168 : vector<128x128xi32>
        %c256_i32 = arith.constant 256 : i32
        %c44_i32 = arith.constant 44 : i32
        %170 = vector.broadcast %c256_i32 : i32 to vector<128x128xi32>
        %171 = vector.broadcast %c44_i32 : i32 to vector<128x128xi32>
        %172 = arith.select %169, %170, %171 : vector<128x128xi1>, vector<128x128xi32>
        %173 = arith.cmpi slt, %166, %172 : vector<128x128xi32>
        %174 = arith.extui %173 : vector<128x128xi1> to vector<128x128xi32>
        %175 = arith.sitofp %174 : vector<128x128xi32> to vector<128x128xf32>
        %176 = arith.mulf %163, %175 : vector<128x128xf32>
        %177 = arith.truncf %176 : vector<128x128xf32> to vector<128x128xbf16>
        %c0_65 = arith.constant 0 : index
        %c0_66 = arith.constant 0 : index
        %178 = vector.load %arg3[%c0_65, %c0_66] : memref<128x64xbf16, #tpu.memory_space<vmem>>, vector<128x64xbf16>
        %cst_67 = arith.constant dense<0.000000e+00> : vector<128x64xf32>
        %179 = tpu.matmul %177, %178, %cst_67 {dimension_numbers = #tpu.dot_dimension_numbers<[1], [0], [0], [1], [0, 0, 1, 1], [], []>} : vector<128x128xbf16>, vector<128x64xbf16>, vector<128x64xf32> -> vector<128x64xf32>
        %180 = arith.truncf %179 : vector<128x64xf32> to vector<128x64xbf16>
        %181 = arith.index_cast %151 : i32 to index
        %c0_68 = arith.constant 0 : index
        %182 = vector.load %arg10[%181, %c0_68] : memref<256x64xbf16, #tpu.memory_space<vmem>>, vector<128x64xbf16>
        tpu.vector_store %arg10[%181, %c0_68], %180 {strides = array<i32>} : memref<256x64xbf16, #tpu.memory_space<vmem>>, vector<128x64xbf16>,
        %cst_69 = arith.constant dense<0.000000e+00> : vector<64xf32>
        %183 = vector.multi_reduction <add>, %179, %cst_69 [0] : vector<128x64xf32> to vector<64xf32>
        %184 = vector.shape_cast %183 : vector<64xf32> to vector<1x64xf32>
        %185 = arith.addf %arg14, %184 : vector<1x64xf32>
        %186 = arith.mulf %179, %179 : vector<128x64xf32>
        %cst_70 = arith.constant dense<0.000000e+00> : vector<64xf32>
        %187 = vector.multi_reduction <add>, %186, %cst_70 [0] : vector<128x64xf32> to vector<64xf32>
        %188 = vector.shape_cast %187 : vector<64xf32> to vector<1x64xf32>
        %189 = arith.addf %arg15, %188 : vector<1x64xf32>
        scf.yield %185, %189 : vector<1x64xf32>, vector<1x64xf32>
      }
      %c2_i32_30 = arith.constant 2 : i32
      %56 = tpu.iota {dimensions = array<i32: 0>} : vector<64x64xi32>
      %57 = tpu.iota {dimensions = array<i32: 1>} : vector<64x64xi32>
      %58 = arith.cmpi eq, %56, %57 : vector<64x64xi32>
      %c32_i32 = arith.constant 32 : i32
      %59 = vector.broadcast %c32_i32 : i32 to vector<64x64xi32>
      %60 = arith.addi %57, %59 : vector<64x64xi32>
      %61 = arith.cmpi eq, %56, %60 : vector<64x64xi32>
      %62 = arith.ori %58, %61 : vector<64x64xi1>
      %c32_i32_31 = arith.constant 32 : i32
      %63 = vector.broadcast %c32_i32_31 : i32 to vector<64x64xi32>
      %64 = arith.addi %56, %63 : vector<64x64xi32>
      %65 = arith.cmpi eq, %57, %64 : vector<64x64xi32>
      %66 = arith.ori %62, %65 : vector<64x64xi1>
      %67 = arith.extui %66 : vector<64x64xi1> to vector<64x64xi32>
      %68 = arith.sitofp %67 : vector<64x64xi32> to vector<64x64xf32>
      %cst_32 = arith.constant dense<0.000000e+00> : vector<1x64xf32>
      %69 = tpu.matmul %55#0, %68, %cst_32 {dimension_numbers = #tpu.dot_dimension_numbers<[1], [0], [0], [1], [0, 0, 1, 1], [], []>} : vector<1x64xf32>, vector<64x64xf32>, vector<1x64xf32> -> vector<1x64xf32>
      %cst_33 = arith.constant dense<0.000000e+00> : vector<1x64xf32>
      %70 = tpu.matmul %55#1, %68, %cst_33 {dimension_numbers = #tpu.dot_dimension_numbers<[1], [0], [0], [1], [0, 0, 1, 1], [], []>} : vector<1x64xf32>, vector<64x64xf32>, vector<1x64xf32> -> vector<1x64xf32>
      %71 = vector.broadcast %cst_15 : f32 to vector<1x64xf32>
      %72 = arith.mulf %69, %71 : vector<1x64xf32>
      %73 = vector.broadcast %cst_15 : f32 to vector<1x64xf32>
      %74 = arith.mulf %70, %73 : vector<1x64xf32>
      %75 = arith.mulf %72, %72 : vector<1x64xf32>
      %76 = arith.subf %74, %75 : vector<1x64xf32>
      %cst_34 = arith.constant 0.000000e+00 : f32
      %77 = vector.broadcast %cst_34 : f32 to vector<1x64xf32>
      %78 = arith.maximumf %76, %77 : vector<1x64xf32>
      %79 = vector.broadcast %cst_16 : f32 to vector<1x64xf32>
      %80 = arith.addf %78, %79 : vector<1x64xf32>
      %81 = math.rsqrt %80 : vector<1x64xf32>
      %cst_35 = arith.constant 0.000000e+00 : f32
      %82 = vector.broadcast %cst_35 : f32 to vector<1x64xf32>
      %c0_i32_36 = arith.constant 0 : i32
      %c2_i32_37 = arith.constant 2 : i32
      %83 = arith.addi %c0_i32_36, %c2_i32_37 : i32
      %c1_i32_38 = arith.constant 1 : i32
      %84:2 = scf.for %arg13 = %c0_i32_36 to %83 step %c1_i32_38 iter_args(%arg14 = %82, %arg15 = %82) -> (vector<1x64xf32>, vector<1x64xf32>)  : i32 {
        %c128_i32_61 = arith.constant 128 : i32
        %150 = arith.muli %arg13, %c128_i32_61 : i32
        %151 = tpu.assume_multiple %150, 128 : i32
        %152 = arith.index_cast %151 : i32 to index
        %c0_62 = arith.constant 0 : index
        %153 = vector.load %arg10[%152, %c0_62] : memref<256x64xbf16, #tpu.memory_space<vmem>>, vector<128x64xbf16>
        %154 = arith.extf %153 : vector<128x64xbf16> to vector<128x64xf32>
        %155 = vector.broadcast %72 : vector<1x64xf32> to vector<128x64xf32>
        %156 = arith.subf %154, %155 : vector<128x64xf32>
        %157 = vector.broadcast %81 : vector<1x64xf32> to vector<128x64xf32>
        %158 = arith.mulf %156, %157 : vector<128x64xf32>
        %cst_63 = arith.constant 0.000000e+00 : f32
        %159 = vector.broadcast %cst_63 : f32 to vector<128x64xf32>
        %160 = arith.cmpf oge, %158, %159 : vector<128x64xf32>
        %161 = vector.broadcast %cst_17 : f32 to vector<128x64xf32>
        %162 = arith.mulf %161, %158 : vector<128x64xf32>
        %163 = arith.select %160, %158, %162 : vector<128x64xi1>, vector<128x64xf32>
        %164 = tpu.iota {dimensions = array<i32: 0>} : vector<128x64xi32>
        %165 = vector.broadcast %151 : i32 to vector<128x64xi32>
        %166 = arith.addi %164, %165 : vector<128x64xi32>
        %167 = tpu.iota {dimensions = array<i32: 1>} : vector<128x64xi32>
        %c32_i32_64 = arith.constant 32 : i32
        %168 = vector.broadcast %c32_i32_64 : i32 to vector<128x64xi32>
        %169 = arith.cmpi slt, %167, %168 : vector<128x64xi32>
        %c256_i32 = arith.constant 256 : i32
        %c44_i32 = arith.constant 44 : i32
        %170 = vector.broadcast %c256_i32 : i32 to vector<128x64xi32>
        %171 = vector.broadcast %c44_i32 : i32 to vector<128x64xi32>
        %172 = arith.select %169, %170, %171 : vector<128x64xi1>, vector<128x64xi32>
        %173 = arith.cmpi slt, %166, %172 : vector<128x64xi32>
        %174 = arith.extui %173 : vector<128x64xi1> to vector<128x64xi32>
        %175 = arith.sitofp %174 : vector<128x64xi32> to vector<128x64xf32>
        %176 = arith.mulf %163, %175 : vector<128x64xf32>
        %177 = arith.truncf %176 : vector<128x64xf32> to vector<128x64xbf16>
        %c0_65 = arith.constant 0 : index
        %c0_66 = arith.constant 0 : index
        %178 = vector.load %arg4[%c0_65, %c0_66] : memref<64x64xbf16, #tpu.memory_space<vmem>>, vector<64x64xbf16>
        %cst_67 = arith.constant dense<0.000000e+00> : vector<128x64xf32>
        %179 = tpu.matmul %177, %178, %cst_67 {dimension_numbers = #tpu.dot_dimension_numbers<[1], [0], [0], [1], [0, 0, 1, 1], [], []>} : vector<128x64xbf16>, vector<64x64xbf16>, vector<128x64xf32> -> vector<128x64xf32>
        %180 = arith.truncf %179 : vector<128x64xf32> to vector<128x64xbf16>
        %181 = arith.index_cast %151 : i32 to index
        %c0_68 = arith.constant 0 : index
        %182 = vector.load %arg9[%181, %c0_68] : memref<256x128xbf16, #tpu.memory_space<vmem>>, vector<128x64xbf16>
        tpu.vector_store %arg9[%181, %c0_68], %180 {strides = array<i32>} : memref<256x128xbf16, #tpu.memory_space<vmem>>, vector<128x64xbf16>,
        %cst_69 = arith.constant dense<0.000000e+00> : vector<64xf32>
        %183 = vector.multi_reduction <add>, %179, %cst_69 [0] : vector<128x64xf32> to vector<64xf32>
        %184 = vector.shape_cast %183 : vector<64xf32> to vector<1x64xf32>
        %185 = arith.addf %arg14, %184 : vector<1x64xf32>
        %186 = arith.mulf %179, %179 : vector<128x64xf32>
        %cst_70 = arith.constant dense<0.000000e+00> : vector<64xf32>
        %187 = vector.multi_reduction <add>, %186, %cst_70 [0] : vector<128x64xf32> to vector<64xf32>
        %188 = vector.shape_cast %187 : vector<64xf32> to vector<1x64xf32>
        %189 = arith.addf %arg15, %188 : vector<1x64xf32>
        scf.yield %185, %189 : vector<1x64xf32>, vector<1x64xf32>
      }
      %c2_i32_39 = arith.constant 2 : i32
      %85 = tpu.iota {dimensions = array<i32: 0>} : vector<64x64xi32>
      %86 = tpu.iota {dimensions = array<i32: 1>} : vector<64x64xi32>
      %87 = arith.cmpi eq, %85, %86 : vector<64x64xi32>
      %c32_i32_40 = arith.constant 32 : i32
      %88 = vector.broadcast %c32_i32_40 : i32 to vector<64x64xi32>
      %89 = arith.addi %86, %88 : vector<64x64xi32>
      %90 = arith.cmpi eq, %85, %89 : vector<64x64xi32>
      %91 = arith.ori %87, %90 : vector<64x64xi1>
      %c32_i32_41 = arith.constant 32 : i32
      %92 = vector.broadcast %c32_i32_41 : i32 to vector<64x64xi32>
      %93 = arith.addi %85, %92 : vector<64x64xi32>
      %94 = arith.cmpi eq, %86, %93 : vector<64x64xi32>
      %95 = arith.ori %91, %94 : vector<64x64xi1>
      %96 = arith.extui %95 : vector<64x64xi1> to vector<64x64xi32>
      %97 = arith.sitofp %96 : vector<64x64xi32> to vector<64x64xf32>
      %cst_42 = arith.constant dense<0.000000e+00> : vector<1x64xf32>
      %98 = tpu.matmul %84#0, %97, %cst_42 {dimension_numbers = #tpu.dot_dimension_numbers<[1], [0], [0], [1], [0, 0, 1, 1], [], []>} : vector<1x64xf32>, vector<64x64xf32>, vector<1x64xf32> -> vector<1x64xf32>
      %cst_43 = arith.constant dense<0.000000e+00> : vector<1x64xf32>
      %99 = tpu.matmul %84#1, %97, %cst_43 {dimension_numbers = #tpu.dot_dimension_numbers<[1], [0], [0], [1], [0, 0, 1, 1], [], []>} : vector<1x64xf32>, vector<64x64xf32>, vector<1x64xf32> -> vector<1x64xf32>
      %100 = vector.broadcast %cst_15 : f32 to vector<1x64xf32>
      %101 = arith.mulf %98, %100 : vector<1x64xf32>
      %102 = vector.broadcast %cst_15 : f32 to vector<1x64xf32>
      %103 = arith.mulf %99, %102 : vector<1x64xf32>
      %104 = arith.mulf %101, %101 : vector<1x64xf32>
      %105 = arith.subf %103, %104 : vector<1x64xf32>
      %cst_44 = arith.constant 0.000000e+00 : f32
      %106 = vector.broadcast %cst_44 : f32 to vector<1x64xf32>
      %107 = arith.maximumf %105, %106 : vector<1x64xf32>
      %108 = vector.broadcast %cst_16 : f32 to vector<1x64xf32>
      %109 = arith.addf %107, %108 : vector<1x64xf32>
      %110 = math.rsqrt %109 : vector<1x64xf32>
      %cst_45 = arith.constant 0.000000e+00 : f32
      %111 = vector.broadcast %cst_45 : f32 to vector<1x32xf32>
      %c0_i32_46 = arith.constant 0 : i32
      %c2_i32_47 = arith.constant 2 : i32
      %112 = arith.addi %c0_i32_46, %c2_i32_47 : i32
      %c1_i32_48 = arith.constant 1 : i32
      %113:2 = scf.for %arg13 = %c0_i32_46 to %112 step %c1_i32_48 iter_args(%arg14 = %111, %arg15 = %111) -> (vector<1x32xf32>, vector<1x32xf32>)  : i32 {
        %c128_i32_61 = arith.constant 128 : i32
        %150 = arith.muli %arg13, %c128_i32_61 : i32
        %151 = tpu.assume_multiple %150, 128 : i32
        %152 = arith.index_cast %151 : i32 to index
        %c0_62 = arith.constant 0 : index
        %153 = vector.load %arg9[%152, %c0_62] : memref<256x128xbf16, #tpu.memory_space<vmem>>, vector<128x64xbf16>
        %154 = arith.extf %153 : vector<128x64xbf16> to vector<128x64xf32>
        %155 = vector.broadcast %101 : vector<1x64xf32> to vector<128x64xf32>
        %156 = arith.subf %154, %155 : vector<128x64xf32>
        %157 = vector.broadcast %110 : vector<1x64xf32> to vector<128x64xf32>
        %158 = arith.mulf %156, %157 : vector<128x64xf32>
        %cst_63 = arith.constant 0.000000e+00 : f32
        %159 = vector.broadcast %cst_63 : f32 to vector<128x64xf32>
        %160 = arith.cmpf oge, %158, %159 : vector<128x64xf32>
        %161 = vector.broadcast %cst_17 : f32 to vector<128x64xf32>
        %162 = arith.mulf %161, %158 : vector<128x64xf32>
        %163 = arith.select %160, %158, %162 : vector<128x64xi1>, vector<128x64xf32>
        %164 = tpu.iota {dimensions = array<i32: 0>} : vector<128x64xi32>
        %165 = vector.broadcast %151 : i32 to vector<128x64xi32>
        %166 = arith.addi %164, %165 : vector<128x64xi32>
        %167 = tpu.iota {dimensions = array<i32: 1>} : vector<128x64xi32>
        %c32_i32_64 = arith.constant 32 : i32
        %168 = vector.broadcast %c32_i32_64 : i32 to vector<128x64xi32>
        %169 = arith.cmpi slt, %167, %168 : vector<128x64xi32>
        %c256_i32 = arith.constant 256 : i32
        %c44_i32 = arith.constant 44 : i32
        %170 = vector.broadcast %c256_i32 : i32 to vector<128x64xi32>
        %171 = vector.broadcast %c44_i32 : i32 to vector<128x64xi32>
        %172 = arith.select %169, %170, %171 : vector<128x64xi1>, vector<128x64xi32>
        %173 = arith.cmpi slt, %166, %172 : vector<128x64xi32>
        %174 = arith.extui %173 : vector<128x64xi1> to vector<128x64xi32>
        %175 = arith.sitofp %174 : vector<128x64xi32> to vector<128x64xf32>
        %176 = arith.mulf %163, %175 : vector<128x64xf32>
        %177 = arith.truncf %176 : vector<128x64xf32> to vector<128x64xbf16>
        %c0_65 = arith.constant 0 : index
        %c0_66 = arith.constant 0 : index
        %178 = vector.load %arg5[%c0_65, %c0_66] : memref<64x32xbf16, #tpu.memory_space<vmem>>, vector<64x32xbf16>
        %cst_67 = arith.constant dense<0.000000e+00> : vector<128x32xf32>
        %179 = tpu.matmul %177, %178, %cst_67 {dimension_numbers = #tpu.dot_dimension_numbers<[1], [0], [0], [1], [0, 0, 1, 1], [], []>} : vector<128x64xbf16>, vector<64x32xbf16>, vector<128x32xf32> -> vector<128x32xf32>
        %180 = arith.truncf %179 : vector<128x32xf32> to vector<128x32xbf16>
        %181 = arith.index_cast %151 : i32 to index
        %c0_68 = arith.constant 0 : index
        %182 = vector.load %arg10[%181, %c0_68] : memref<256x64xbf16, #tpu.memory_space<vmem>>, vector<128x32xbf16>
        tpu.vector_store %arg10[%181, %c0_68], %180 {strides = array<i32>} : memref<256x64xbf16, #tpu.memory_space<vmem>>, vector<128x32xbf16>,
        %cst_69 = arith.constant dense<0.000000e+00> : vector<32xf32>
        %183 = vector.multi_reduction <add>, %179, %cst_69 [0] : vector<128x32xf32> to vector<32xf32>
        %184 = vector.shape_cast %183 : vector<32xf32> to vector<1x32xf32>
        %185 = arith.addf %arg14, %184 : vector<1x32xf32>
        %186 = arith.mulf %179, %179 : vector<128x32xf32>
        %cst_70 = arith.constant dense<0.000000e+00> : vector<32xf32>
        %187 = vector.multi_reduction <add>, %186, %cst_70 [0] : vector<128x32xf32> to vector<32xf32>
        %188 = vector.shape_cast %187 : vector<32xf32> to vector<1x32xf32>
        %189 = arith.addf %arg15, %188 : vector<1x32xf32>
        scf.yield %185, %189 : vector<1x32xf32>, vector<1x32xf32>
      }
      %c2_i32_49 = arith.constant 2 : i32
      %114 = tpu.iota {dimensions = array<i32: 0>} : vector<32x32xi32>
      %115 = tpu.iota {dimensions = array<i32: 1>} : vector<32x32xi32>
      %116 = arith.cmpi eq, %114, %115 : vector<32x32xi32>
      %c16_i32 = arith.constant 16 : i32
      %117 = vector.broadcast %c16_i32 : i32 to vector<32x32xi32>
      %118 = arith.addi %115, %117 : vector<32x32xi32>
      %119 = arith.cmpi eq, %114, %118 : vector<32x32xi32>
      %120 = arith.ori %116, %119 : vector<32x32xi1>
      %c16_i32_50 = arith.constant 16 : i32
      %121 = vector.broadcast %c16_i32_50 : i32 to vector<32x32xi32>
      %122 = arith.addi %114, %121 : vector<32x32xi32>
      %123 = arith.cmpi eq, %115, %122 : vector<32x32xi32>
      %124 = arith.ori %120, %123 : vector<32x32xi1>
      %125 = arith.extui %124 : vector<32x32xi1> to vector<32x32xi32>
      %126 = arith.sitofp %125 : vector<32x32xi32> to vector<32x32xf32>
      %cst_51 = arith.constant dense<0.000000e+00> : vector<1x32xf32>
      %127 = tpu.matmul %113#0, %126, %cst_51 {dimension_numbers = #tpu.dot_dimension_numbers<[1], [0], [0], [1], [0, 0, 1, 1], [], []>} : vector<1x32xf32>, vector<32x32xf32>, vector<1x32xf32> -> vector<1x32xf32>
      %cst_52 = arith.constant dense<0.000000e+00> : vector<1x32xf32>
      %128 = tpu.matmul %113#1, %126, %cst_52 {dimension_numbers = #tpu.dot_dimension_numbers<[1], [0], [0], [1], [0, 0, 1, 1], [], []>} : vector<1x32xf32>, vector<32x32xf32>, vector<1x32xf32> -> vector<1x32xf32>
      %129 = vector.broadcast %cst_15 : f32 to vector<1x32xf32>
      %130 = arith.mulf %127, %129 : vector<1x32xf32>
      %131 = vector.broadcast %cst_15 : f32 to vector<1x32xf32>
      %132 = arith.mulf %128, %131 : vector<1x32xf32>
      %133 = arith.mulf %130, %130 : vector<1x32xf32>
      %134 = arith.subf %132, %133 : vector<1x32xf32>
      %cst_53 = arith.constant 0.000000e+00 : f32
      %135 = vector.broadcast %cst_53 : f32 to vector<1x32xf32>
      %136 = arith.maximumf %134, %135 : vector<1x32xf32>
      %137 = vector.broadcast %cst_16 : f32 to vector<1x32xf32>
      %138 = arith.addf %136, %137 : vector<1x32xf32>
      %139 = math.rsqrt %138 : vector<1x32xf32>
      %140 = tpu.iota {dimensions = array<i32: 0>} : vector<2x32xi32>
      %141 = tpu.iota {dimensions = array<i32: 1>} : vector<2x32xi32>
      %c16_i32_54 = arith.constant 16 : i32
      %142 = vector.broadcast %c16_i32_54 : i32 to vector<2x32xi32>
      %143 = arith.cmpi sge, %141, %142 : vector<2x32xi32>
      %144 = arith.extui %143 : vector<2x32xi1> to vector<2x32xi32>
      %145 = arith.cmpi eq, %144, %140 : vector<2x32xi32>
      %146 = arith.extui %145 : vector<2x32xi1> to vector<2x32xi32>
      %147 = arith.sitofp %146 : vector<2x32xi32> to vector<2x32xf32>
      %c0_55 = arith.constant 0 : index
      %c0_56 = arith.constant 0 : index
      %148 = vector.load %arg7[%c0_55, %c0_56] : memref<1x32xf32, #tpu.memory_space<vmem>>, vector<1x32xf32>
      %c0_i32_57 = arith.constant 0 : i32
      %c2_i32_58 = arith.constant 2 : i32
      %149 = arith.addi %c0_i32_57, %c2_i32_58 : i32
      %c1_i32_59 = arith.constant 1 : i32
      scf.for %arg13 = %c0_i32_57 to %149 step %c1_i32_59  : i32 {
        %c128_i32_61 = arith.constant 128 : i32
        %150 = arith.muli %arg13, %c128_i32_61 : i32
        %151 = tpu.assume_multiple %150, 128 : i32
        %152 = arith.index_cast %151 : i32 to index
        %c0_62 = arith.constant 0 : index
        %153 = vector.load %arg10[%152, %c0_62] : memref<256x64xbf16, #tpu.memory_space<vmem>>, vector<128x32xbf16>
        %154 = arith.extf %153 : vector<128x32xbf16> to vector<128x32xf32>
        %155 = vector.broadcast %130 : vector<1x32xf32> to vector<128x32xf32>
        %156 = arith.subf %154, %155 : vector<128x32xf32>
        %157 = vector.broadcast %139 : vector<1x32xf32> to vector<128x32xf32>
        %158 = arith.mulf %156, %157 : vector<128x32xf32>
        %cst_63 = arith.constant 0.000000e+00 : f32
        %159 = vector.broadcast %cst_63 : f32 to vector<128x32xf32>
        %160 = arith.cmpf oge, %158, %159 : vector<128x32xf32>
        %161 = vector.broadcast %cst_17 : f32 to vector<128x32xf32>
        %162 = arith.mulf %161, %158 : vector<128x32xf32>
        %163 = arith.select %160, %158, %162 : vector<128x32xi1>, vector<128x32xf32>
        %164 = tpu.iota {dimensions = array<i32: 0>} : vector<128x32xi32>
        %165 = vector.broadcast %151 : i32 to vector<128x32xi32>
        %166 = arith.addi %164, %165 : vector<128x32xi32>
        %167 = tpu.iota {dimensions = array<i32: 1>} : vector<128x32xi32>
        %c16_i32_64 = arith.constant 16 : i32
        %168 = vector.broadcast %c16_i32_64 : i32 to vector<128x32xi32>
        %169 = arith.cmpi slt, %167, %168 : vector<128x32xi32>
        %c256_i32 = arith.constant 256 : i32
        %c44_i32 = arith.constant 44 : i32
        %170 = vector.broadcast %c256_i32 : i32 to vector<128x32xi32>
        %171 = vector.broadcast %c44_i32 : i32 to vector<128x32xi32>
        %172 = arith.select %169, %170, %171 : vector<128x32xi1>, vector<128x32xi32>
        %173 = arith.cmpi slt, %166, %172 : vector<128x32xi32>
        %174 = arith.extui %173 : vector<128x32xi1> to vector<128x32xi32>
        %175 = arith.sitofp %174 : vector<128x32xi32> to vector<128x32xf32>
        %176 = arith.mulf %163, %175 : vector<128x32xf32>
        %177 = arith.truncf %176 : vector<128x32xf32> to vector<128x32xbf16>
        %c0_65 = arith.constant 0 : index
        %c0_66 = arith.constant 0 : index
        %178 = vector.load %arg6[%c0_65, %c0_66] : memref<32x32xbf16, #tpu.memory_space<vmem>>, vector<32x32xbf16>
        %cst_67 = arith.constant dense<0.000000e+00> : vector<128x32xf32>
        %179 = tpu.matmul %177, %178, %cst_67 {dimension_numbers = #tpu.dot_dimension_numbers<[1], [0], [0], [1], [0, 0, 1, 1], [], []>} : vector<128x32xbf16>, vector<32x32xbf16>, vector<128x32xf32> -> vector<128x32xf32>
        %180 = vector.broadcast %148 : vector<1x32xf32> to vector<128x32xf32>
        %181 = arith.subf %179, %180 : vector<128x32xf32>
        %182 = arith.mulf %181, %181 : vector<128x32xf32>
        %cst_68 = arith.constant dense<0.000000e+00> : vector<2x128xf32>
        %183 = tpu.matmul %147, %182, %cst_68 {dimension_numbers = #tpu.dot_dimension_numbers<[1], [1], [0], [0], [0, 0, 1, 0], [], []>} : vector<2x32xf32>, vector<128x32xf32>, vector<2x128xf32> -> vector<2x128xf32>
        %184 = arith.index_cast %arg13 : i32 to index
        %c0_69 = arith.constant 0 : index
        %c0_70 = arith.constant 0 : index
        %185 = vector.load %arg8[%184, %c0_69, %c0_70] : memref<2x2x128xf32, #tpu.memory_space<vmem>>, vector<1x2x128xf32>
        %186 = vector.shape_cast %185 : vector<1x2x128xf32> to vector<2x128xf32>
        %187 = vector.shape_cast %183 : vector<2x128xf32> to vector<1x2x128xf32>
        tpu.vector_store %arg8[%184, %c0_69, %c0_70], %187 {strides = array<i32>} : memref<2x2x128xf32, #tpu.memory_space<vmem>>, vector<1x2x128xf32>,
      }
      %c2_i32_60 = arith.constant 2 : i32
    } else {
    }
    return
  }
  func.func @transform_0(%arg0: i32) -> (i32, i32) {
    %c0_i32 = arith.constant 0 : i32
    %c0_i32_0 = arith.constant 0 : i32
    return %arg0, %c0_i32 : i32, i32
  }
  func.func @transform_1(%arg0: i32) -> (i32, i32) {
    %c0_i32 = arith.constant 0 : i32
    %c0_i32_0 = arith.constant 0 : i32
    %c0_i32_1 = arith.constant 0 : i32
    return %c0_i32, %c0_i32_0 : i32, i32
  }
  func.func @transform_2(%arg0: i32) -> (i32, i32) {
    %c0_i32 = arith.constant 0 : i32
    %c0_i32_0 = arith.constant 0 : i32
    %c0_i32_1 = arith.constant 0 : i32
    return %c0_i32, %c0_i32_0 : i32, i32
  }
  func.func @transform_3(%arg0: i32) -> (i32, i32) {
    %c0_i32 = arith.constant 0 : i32
    %c0_i32_0 = arith.constant 0 : i32
    %c0_i32_1 = arith.constant 0 : i32
    return %c0_i32, %c0_i32_0 : i32, i32
  }
  func.func @transform_4(%arg0: i32) -> (i32, i32) {
    %c0_i32 = arith.constant 0 : i32
    %c0_i32_0 = arith.constant 0 : i32
    %c0_i32_1 = arith.constant 0 : i32
    return %c0_i32, %c0_i32_0 : i32, i32
  }
  func.func @transform_5(%arg0: i32) -> (i32, i32) {
    %c0_i32 = arith.constant 0 : i32
    %c0_i32_0 = arith.constant 0 : i32
    %c0_i32_1 = arith.constant 0 : i32
    return %c0_i32, %c0_i32_0 : i32, i32
  }
  func.func @transform_6(%arg0: i32) -> (i32, i32) {
    %c0_i32 = arith.constant 0 : i32
    %c0_i32_0 = arith.constant 0 : i32
    %c0_i32_1 = arith.constant 0 : i32
    return %c0_i32, %c0_i32_0 : i32, i32
  }
  func.func @transform_7(%arg0: i32) -> (i32, i32, i32) {
    %c0_i32 = arith.constant 0 : i32
    %c0_i32_0 = arith.constant 0 : i32
    %c0_i32_1 = arith.constant 0 : i32
    %c0_i32_2 = arith.constant 0 : i32
    return %c0_i32, %c0_i32_0, %c0_i32_1 : i32, i32, i32
  }
}

</mosaic_0001>

<bundles_post_ra>
// kernel: tpu_custom_call.1
= control target key start
LH: loop header
LB: loop body
LE: loop exit
PB: predicated region body
PF: predicated region fallthrough
CT: control target
= control target key end

     0   :  { %12 = vsyncpa [#allocation7], 0  ;;  %s3855_s24 = smov 0   ;;  %s5423_s0 = inlined_call_operand.vmem [shape: bf16[256,64], index: 0, kind: input, shape index: {}]   ;;  %s5424_s1 = inlined_call_operand.vmem [shape: bf16[64,128], index: 1, kind: input, shape index: {}]   ;;  %s5425_s2 = inlined_call_operand.vmem [shape: bf16[128,64], index: 2, kind: input, shape index: {}]   ;;  %s5426_s3 = inlined_call_operand.vmem [shape: bf16[64,64], index: 3, kind: input, shape index: {}]   ;;  %s5427_s4 = inlined_call_operand.vmem [shape: bf16[64,32], index: 4, kind: input, shape index: {}]   ;;  %s5428_s5 = inlined_call_operand.vmem [shape: bf16[32,32], index: 5, kind: input, shape index: {}]   ;;  %s5429_s6 = inlined_call_operand.vmem [shape: f32[1,32], index: 6, kind: input, shape index: {}]   ;;  %s5430_s7 = inlined_call_operand.hbm [shape: f32[2,2,128], index: 7, kind: output, shape index: {}]  }
   0x1 LB: > { %s3861_s25 = sadd.s32 4294967295, %s3759_s24   ;;  %p2905_p0 = scmp.ge.s32.totalorder %s3759_s24, 1  ;;  %s3759_s24 = sphi %s3855_s24, %s18_s24  }
   0x2   : > { %p234_p1 = scmp.lt.s32.totalorder %s3759_s24, 3 }
   0x4   : > { %p235_p2 = pnand %p2905_p0, %p234_p1 }
   0x5   : > { %s2906_s26 = sshll.u32 (!%p235_p2), %s3861_s25, 4  ;;  %p2908_p4 = scmp.ne.s32.totalorder (!%p235_p2), %s3861_s25, 0 }
   0x6   : > { %238 = sbr.rel (%p235_p2) target bundleno = 1927 (0x787), region = 48  ;;  %p262_p3 = scmp.lt.s32.totalorder (!%p235_p2), %s2906_s26, 31 }
   0xb   : > { %s5556_s26 = smov (!%p262_p3, %s2906_s26), 31  ;;  %271 = sbr.rel (%p2908_p4) target bundleno = 19 (0x13), region = 52 }
   0xc   : > { %s2907_s27 = sshll.u32 %s5556_s26, 2 }
   0xd   : > { %s3869_s30 = scalar_lea.vmem %s5423_s0, %s2907_s27 }
  0x10   : > { %v3801_v0 = vmov 0.0  }
  0x11   : > { %272 = vst [vmem:[#allocation4] sm:$0x1] %v3801_v0 }
  0x12   : > { %273 = vst [vmem:[#allocation5] sm:$0x1] %v3801_v0 }
  0x13 PF: > { %v3279_v1 = vld [vmem:[%s5424_s1 + $0x18] sm:$0xff]  ;;  %v3278_v2 = vld [vmem:[%s5424_s1 + $0x10] sm:$0xff]  ;;  %v3277_v3 = vld [vmem:[%s5424_s1 + $0x8] sm:$0xff]  ;;  %vm5442_vm0 = vcmask 523264   ;;  %s2965_s16 = sshll.u32 %s3861_s25, 7  ;;  %p2967_p5 = scmp.ne.s32.totalorder %s3861_s25, 1 }
  0x14   : > { %391 = vmatpush.bf16.msra.mxu0 %v3279_v1  ;;  %3501 = vmatpush.bf16.msra.mxu1 %v3279_v1  ;;  %v3276_v4 = vld [vmem:[%s5424_s1] sm:$0xff]  ;;  %v3270_v6 = vld [vmem:[%s3869_s30 + $0x10] sm:$0xff]  ;;  %v3269_v9 = vld [vmem:[%s3869_s30 + $0x8] sm:$0xff]  ;;  %s453_s17 = sshra.s32 %s2965_s16, 3 }
  0x15   : > { %3502 = vmatpush.bf16.msra.mxu2 %v3279_v1  ;;  %3503 = vmatpush.bf16.msra.mxu3 %v3279_v1  ;;  %v3268_v5 = vld [vmem:[%s3869_s30] sm:$0xff]  ;;  %v3274_v8 = vld [vmem:[%s3869_s30 + $0x30] sm:$0xff]  ;;  %v3271_v10 = vld [vmem:[%s3869_s30 + $0x18] sm:$0xff]  ;;  %s2966_s18 = sshll.u32 %s453_s17, 2 }
  0x16   : > { %v3272_v7 = vld [vmem:[%s3869_s30 + $0x20] sm:$0xff]  ;;  %v3273_v11 = vld [vmem:[%s3869_s30 + $0x28] sm:$0xff]  ;;  %v3275_v12 = vld [vmem:[%s3869_s30 + $0x38] sm:$0xff]  ;;  %s3903_s19 = scalar_lea.vmem [#allocation2], %s2966_s18 }
  0x18   : > { %392 = vmatpush.bf16.msra.mxu0 %v3278_v2  ;;  %3504 = vmatpush.bf16.msra.mxu1 %v3278_v2 }
  0x19   : > { %3505 = vmatpush.bf16.msra.mxu2 %v3278_v2  ;;  %3506 = vmatpush.bf16.msra.mxu3 %v3278_v2 }
  0x1c   : > { %393 = vmatpush.bf16.msra.mxu0 %v3277_v3  ;;  %3507 = vmatpush.bf16.msra.mxu1 %v3277_v3 }
  0x1d   : > { %3508 = vmatpush.bf16.msra.mxu2 %v3277_v3  ;;  %3509 = vmatpush.bf16.msra.mxu3 %v3277_v3 }
  0x20   : > { %394 = vmatpush.bf16.msra.mxu0 %v3276_v4  ;;  %3510 = vmatpush.bf16.msra.mxu1 %v3276_v4 }
  0x21   : > { %3511 = vmatpush.bf16.msra.mxu2 %v3276_v4  ;;  %3512 = vmatpush.bf16.msra.mxu3 %v3276_v4 }
  0x23   : > { %2957 = vmatmul.msk.bf16.vlgmr.msra.gmra.mxu0 %vm5442_vm0, %v3268_v5  ;;  %2959 = vmatmul.msk.bf16.vlgmr.msra.gmra.mxu1 %vm5442_vm0, %v3270_v6 }
  0x24   : > { %2961 = vmatmul.msk.bf16.vlgmr.msra.gmra.mxu2 %vm5442_vm0, %v3272_v7  ;;  %2963 = vmatmul.msk.bf16.vlgmr.msra.gmra.mxu3 %vm5442_vm0, %v3274_v8 }
  0x33   : > { %2958 = vmatmul.msk.bf16.gmra.mxu0 %vm5442_vm0, %v3269_v9  ;;  %2960 = vmatmul.msk.bf16.gmra.mxu1 %vm5442_vm0, %v3271_v10 }
  0x34   : > { %2962 = vmatmul.msk.bf16.gmra.mxu2 %vm5442_vm0, %v3273_v11  ;;  %2964 = vmatmul.msk.bf16.gmra.mxu3 %vm5442_vm0, %v3275_v12 }
  0xa0   : > { %v396_v13 = vpop.f32.mrf.mxu0  ;;  %v406_v14 = vpop.f32.mrf.mxu1 }
  0xa1   : > { %v498_v28 = vmul.f32 %v396_v13, %v396_v13  ;;  %v502_v42 = vmul.f32 %v406_v14, %v406_v14 }
  0xa7   : > { %v416_v15 = vpop.f32.mrf.mxu2  ;;  %v3901_v16 = vpop.f32.mrf.mxu3 }
  0xa8   : > { %v398_v17 = vpop.f32.mrf.mxu0  ;;  %v408_v18 = vpop.f32.mrf.mxu1  ;;  %v506_v58 = vmul.f32 %v416_v15, %v416_v15  ;;  %v510_v6 = vmul.f32 %v3901_v16, %v3901_v16 }
  0xa9   : > { %v3301_v19 = vpack.c.bf16 %v398_v17, %v396_v13  ;;  %v3311_v20 = vpack.c.bf16 %v408_v18, %v406_v14  ;;  %v499_v27 = vmul.f32 %v398_v17, %v398_v17  ;;  %v474_v30 = vadd.f32 %v398_v17, %v396_v13 }
  0xaa   : > { %v503_v45 = vmul.f32 %v408_v18, %v408_v18 }
  0xab   : > { %3302 = vst [vmem:[%s3903_s19] sm:$0xff] %v3301_v19   ;;  %v514_v31 = vadd.f32 %v499_v27, %v498_v28 }
  0xac   : > { %3467 = vst [vmem:[%s3903_s19 + $0x10] sm:$0xff] %v3311_v20  }
  0xaf   : > { %v418_v21 = vpop.f32.mrf.mxu2  ;;  %v428_v22 = vpop.f32.mrf.mxu3 }
  0xb0   : > { %v401_v23 = vpop.f32.mrf.mxu0  ;;  %v411_v24 = vpop.f32.mrf.mxu1  ;;  %v3321_v25 = vpack.c.bf16 %v418_v21, %v416_v15  ;;  %v3331_v26 = vpack.c.bf16 %v428_v22, %v3901_v16  ;;  %v507_v61 = vmul.f32 %v418_v21, %v418_v21  ;;  %v511_v9 = vmul.f32 %v428_v22, %v428_v22 }
  0xb1   : > { %v500_v29 = vmul.f32 %v401_v23, %v401_v23  ;;  %v475_v32 = vadd.f32 %v474_v30, %v401_v23  ;;  %v504_v48 = vmul.f32 %v411_v24, %v411_v24 }
  0xb2   : > { %3469 = vst [vmem:[%s3903_s19 + $0x20] sm:$0xff] %v3321_v25  }
  0xb3   : > { %3471 = vst [vmem:[%s3903_s19 + $0x30] sm:$0xff] %v3331_v26   ;;  %v515_v35 = vadd.f32 %v514_v31, %v500_v29  ;;  %v473_v29 = vld [vmem:[#allocation4] sm:$0x1] }
  0xb7   : > { %v421_v33 = vpop.f32.mrf.mxu2  ;;  %v431_v34 = vpop.f32.mrf.mxu3 }
  0xb8   : > { %v403_v36 = vpop.f32.mrf.mxu0  ;;  %v413_v37 = vpop.f32.mrf.mxu1  ;;  %v508_v1 = vmul.f32 %v421_v33, %v421_v33  ;;  %v512_v13 = vmul.f32 %v431_v34, %v431_v34 }
  0xb9   : > { %v3306_v38 = vpack.c.bf16 %v403_v36, %v401_v23  ;;  %v476_v39 = vadd.f32 %v475_v32, %v403_v36  ;;  %v501_v40 = vmul.f32 %v403_v36, %v403_v36  ;;  %v3316_v41 = vpack.c.bf16 %v413_v37, %v411_v24 }
  0xba   : > { %v505_v56 = vmul.f32 %v413_v37, %v413_v37 }
  0xbb   : > { %3466 = vst [vmem:[%s3903_s19 + $0x8] sm:$0xff] %v3306_v38   ;;  %v477_v43 = vadd.f32 %v476_v39, %v406_v14  ;;  %v516_v44 = vadd.f32 %v515_v35, %v501_v40 }
  0xbc   : > { %3468 = vst [vmem:[%s3903_s19 + $0x18] sm:$0xff] %v3316_v41  }
  0xbd   : > { %v517_v46 = vadd.f32 %v516_v44, %v502_v42  ;;  %v478_v47 = vadd.f32 %v477_v43, %v408_v18 }
  0xbf   : > { %v479_v49 = vadd.f32 %v478_v47, %v411_v24  ;;  %v518_v50 = vadd.f32 %v517_v46, %v503_v45  ;;  %v423_v51 = vpop.f32.mrf.mxu2  ;;  %v433_v52 = vpop.f32.mrf.mxu3 }
  0xc0   : > { %v3326_v53 = vpack.c.bf16 %v423_v51, %v421_v33  ;;  %v3336_v54 = vpack.c.bf16 %v433_v52, %v431_v34  ;;  %v509_v5 = vmul.f32 %v423_v51, %v423_v51  ;;  %v513_v18 = vmul.f32 %v433_v52, %v433_v52 }
  0xc1   : > { %v480_v55 = vadd.f32 %v479_v49, %v413_v37  ;;  %v519_v57 = vadd.f32 %v518_v50, %v504_v48 }
  0xc2   : > { %3470 = vst [vmem:[%s3903_s19 + $0x28] sm:$0xff] %v3326_v53  }
  0xc3   : > { %v481_v59 = vadd.f32 %v480_v55, %v416_v15  ;;  %v520_v60 = vadd.f32 %v519_v57, %v505_v56  ;;  %3472 = vst [vmem:[%s3903_s19 + $0x38] sm:$0xff] %v3336_v54  }
  0xc5   : > { %v521_v62 = vadd.f32 %v520_v60, %v506_v58  ;;  %v482_v63 = vadd.f32 %v481_v59, %v418_v21 }
  0xc7   : > { %v483_v0 = vadd.f32 %v482_v63, %v421_v33  ;;  %v522_v2 = vadd.f32 %v521_v62, %v507_v61 }
  0xc9   : > { %v523_v3 = vadd.f32 %v522_v2, %v508_v1  ;;  %v484_v4 = vadd.f32 %v483_v0, %v423_v51 }
  0xcb   : > { %v485_v7 = vadd.f32 %v484_v4, %v3901_v16  ;;  %v524_v8 = vadd.f32 %v523_v3, %v509_v5 }
  0xcd   : > { %v525_v10 = vadd.f32 %v524_v8, %v510_v6  ;;  %v486_v11 = vadd.f32 %v485_v7, %v428_v22  ;;  %v497_v22 = vld [vmem:[#allocation5] sm:$0x1] }
  0xcf   : > { %v487_v12 = vadd.f32 %v486_v11, %v431_v34  ;;  %v526_v14 = vadd.f32 %v525_v10, %v511_v9 }
  0xd1   : > { %v527_v15 = vadd.f32 %v526_v14, %v512_v13  ;;  %v488_v17 = vadd.f32 %v487_v12, %v433_v52 }
  0xd3   : > { %v489_v19 = vrot.slane %v488_v17, 4  ;;  %v528_v20 = vadd.f32 %v527_v15, %v513_v18 }
  0xd5   : > { %v490_v21 = vadd.f32 %v489_v19, %v488_v17  ;;  %v529_v23 = vrot.slane %v528_v20, 4 }
  0xd7   : > { %v491_v24 = vrot.slane %v490_v21, 2  ;;  %v530_v25 = vadd.f32 %v529_v23, %v528_v20 }
  0xd9   : > { %v492_v26 = vadd.f32 %v491_v24, %v490_v21  ;;  %v531_v27 = vrot.slane %v530_v25, 2 }
  0xdb   : > { %v493_v28 = vrot.slane %v492_v26, 1  ;;  %v532_v16 = vadd.f32 %v531_v27, %v530_v25 }
  0xdd   : > { %v494_v30 = vadd.f32 %v493_v28, %v492_v26  ;;  %v533_v31 = vrot.slane %v532_v16, 1 }
  0xdf   : > { %v495_v32 = vadd.f32 %v494_v30, %v473_v29  ;;  %v534_v33 = vadd.f32 %v533_v31, %v532_v16  ;;  %540 = sbr.rel (%p2967_p5) target bundleno = 1921 (0x781), region = 56 }
  0xe1   : > { %496 = vst [vmem:[#allocation4] sm:$0x1] %v495_v32  ;;  %v535_v34 = vadd.f32 %v534_v33, %v497_v22 }
  0xe3   : > { %536 = vst [vmem:[#allocation5] sm:$0x1] %v535_v34 }
  0xe4   : > { %v543_v35 = vlaneseq  ;;  %v5436_v44 = vmov 1.0   ;;  %v4100_v17 = vmov 0.0   ;;  %v4102_v18 = vmov 0.0   ;;  %s4104_s20 = smov 0  }
  0xe6   : > { %v3918_v36 = vshrl.u32 %v543_v35, 7  ;;  %v3920_v37 = vand.u32 127, %v543_v35 }
  0xe8   : > { %v3923_v38 = vadd.s32 120, %v3918_v36  ;;  %v578_v39 = vadd.s32 64, %v3920_v37  ;;  %v3927_v40 = vadd.s32 112, %v3918_v36  ;;  %v3930_v41 = vadd.s32 104, %v3918_v36  ;;  %v541_v62 = vld [vmem:[#allocation4] sm:$0x1] }
  0xe9   : > { %v3933_v42 = vadd.s32 96, %v3918_v36  ;;  %v3936_v43 = vadd.s32 88, %v3918_v36  ;;  %v3953_v45 = vadd.s32 80, %v3918_v36  ;;  %v3961_v46 = vadd.s32 72, %v3918_v36 }
  0xea   : > { %vm577_vm1 = vcmp.eq.s32.totalorder %v3923_v38, %v3920_v37  ;;  %vm594_vm2 = vcmp.eq.s32.totalorder %v3923_v38, %v578_v39  ;;  %vm576_vm3 = vcmp.eq.s32.totalorder %v3927_v40, %v3920_v37  ;;  %vm593_vm4 = vcmp.eq.s32.totalorder %v3927_v40, %v578_v39  ;;  %v542_v63 = vld [vmem:[#allocation5] sm:$0x1] }
  0xeb   : > { %vm610_vm5 = vmor %vm577_vm1, %vm594_vm2  ;;  %vm575_vm6 = vcmp.eq.s32.totalorder %v3930_v41, %v3920_v37  ;;  %vm592_vm7 = vcmp.eq.s32.totalorder %v3930_v41, %v578_v39  ;;  %vm574_vm9 = vcmp.eq.s32.totalorder %v3933_v42, %v3920_v37  ;;  %vm591_vm10 = vcmp.eq.s32.totalorder %v3933_v42, %v578_v39 }
  0xec   : > { %2984 = vmatpush.msk.msra.mxu0 %vm610_vm5, %v5436_v44  ;;  %vm609_vm8 = vmor %vm576_vm3, %vm593_vm4  ;;  %3000 = vmatpush.msk.msra.mxu1 %vm610_vm5, %v5436_v44  ;;  %vm573_vm12 = vcmp.eq.s32.totalorder %v3936_v43, %v3920_v37  ;;  %vm590_vm13 = vcmp.eq.s32.totalorder %v3936_v43, %v578_v39  ;;  %v3964_v47 = vadd.s32 56, %v3918_v36  ;;  %vm572_vm15 = vcmp.eq.s32.totalorder %v3953_v45, %v3920_v37 }
  0xed   : > { %vm608_vm11 = vmor %vm575_vm6, %vm592_vm7  ;;  %vm589_vm1 = vcmp.eq.s32.totalorder %v3953_v45, %v578_v39  ;;  %v3972_v48 = vadd.s32 64, %v3918_v36  ;;  %v3975_v49 = vadd.s32 48, %v3918_v36  ;;  %vm571_vm3 = vcmp.eq.s32.totalorder %v3961_v46, %v3920_v37 }
  0xee   : > { %2985 = vmatpush.msk.msra.mxu0 %vm609_vm8, %v5436_v44  ;;  %3001 = vmatpush.msk.msra.mxu1 %vm609_vm8, %v5436_v44  ;;  %vm607_vm14 = vmor %vm574_vm9, %vm591_vm10  ;;  %vm588_vm4 = vcmp.eq.s32.totalorder %v3961_v46, %v578_v39  ;;  %v617_v50 = vadd.s32 64, %v3964_v47  ;;  %v3984_v51 = vadd.s32 40, %v3918_v36  ;;  %v3993_v53 = vadd.s32 32, %v3918_v36 }
  0xef   : > { %vm606_vm2 = vmor %vm573_vm12, %vm590_vm13  ;;  %vm570_vm6 = vcmp.eq.s32.totalorder %v3972_v48, %v3920_v37  ;;  %vm587_vm7 = vcmp.eq.s32.totalorder %v3972_v48, %v578_v39  ;;  %v616_v52 = vadd.s32 64, %v3975_v49  ;;  %vm569_vm9 = vcmp.eq.s32.totalorder %v3964_v47, %v3920_v37 }
  0xf0   : > { %2986 = vmatpush.msk.msra.mxu0 %vm608_vm11, %v5436_v44  ;;  %3002 = vmatpush.msk.msra.mxu1 %vm608_vm11, %v5436_v44  ;;  %vm605_vm5 = vmor %vm572_vm15, %vm589_vm1  ;;  %vm633_vm10 = vcmp.eq.s32.totalorder %v3920_v37, %v617_v50  ;;  %v615_v54 = vadd.s32 64, %v3984_v51  ;;  %v4002_v55 = vadd.s32 24, %v3918_v36  ;;  %vm568_vm12 = vcmp.eq.s32.totalorder %v3975_v49, %v3920_v37 }
  0xf1   : > { %vm604_vm8 = vmor %vm571_vm3, %vm588_vm4  ;;  %vm632_vm13 = vcmp.eq.s32.totalorder %v3920_v37, %v616_v52  ;;  %v614_v56 = vadd.s32 64, %v3993_v53  ;;  %v4011_v57 = vadd.s32 16, %v3918_v36  ;;  %vm567_vm15 = vcmp.eq.s32.totalorder %v3984_v51, %v3920_v37 }
  0xf2   : > { %2987 = vmatpush.msk.msra.mxu0 %vm607_vm14, %v5436_v44  ;;  %3003 = vmatpush.msk.msra.mxu1 %vm607_vm14, %v5436_v44  ;;  %vm603_vm11 = vmor %vm570_vm6, %vm587_vm7  ;;  %vm631_vm1 = vcmp.eq.s32.totalorder %v3920_v37, %v615_v54  ;;  %v613_v58 = vadd.s32 64, %v4002_v55  ;;  %v4023_v59 = vadd.s32 8, %v3918_v36  ;;  %vm566_vm3 = vcmp.eq.s32.totalorder %v3993_v53, %v3920_v37 }
  0xf3   : > { %vm649_vm14 = vmor %vm569_vm9, %vm633_vm10  ;;  %vm630_vm4 = vcmp.eq.s32.totalorder %v3920_v37, %v614_v56  ;;  %v612_v60 = vadd.s32 64, %v4011_v57  ;;  %vm5435_vm6 = vcmp.eq.s32.totalorder %v4002_v55, %v3920_v37  ;;  %vm5434_vm10 = vcmp.eq.s32.totalorder %v4011_v57, %v3920_v37 }
  0xf4   : > { %2988 = vmatpush.msk.msra.mxu0 %vm606_vm2, %v5436_v44  ;;  %3004 = vmatpush.msk.msra.mxu1 %vm606_vm2, %v5436_v44  ;;  %vm648_vm2 = vmor %vm568_vm12, %vm632_vm13  ;;  %vm629_vm7 = vcmp.eq.s32.totalorder %v3920_v37, %v613_v58  ;;  %v611_v61 = vadd.s32 64, %v4023_v59 }
  0xf5   : > { %vm645_vm13 = vmor %vm5435_vm6, %vm629_vm7 }
  0xf6   : > { %2989 = vmatpush.msk.msra.mxu0 %vm605_vm5, %v5436_v44  ;;  %3005 = vmatpush.msk.msra.mxu1 %vm605_vm5, %v5436_v44  ;;  %vm647_vm5 = vmor %vm567_vm15, %vm631_vm1  ;;  %vm627_vm1 = vcmp.eq.s32.totalorder %v3920_v37, %v611_v61 }
  0xf8   : > { %2990 = vmatpush.msk.msra.mxu0 %vm604_vm8, %v5436_v44  ;;  %3006 = vmatpush.msk.msra.mxu1 %vm604_vm8, %v5436_v44  ;;  %vm646_vm8 = vmor %vm566_vm3, %vm630_vm4  ;;  %vm5432_vm4 = vcmp.eq.s32.totalorder %v3918_v36, %v3920_v37 }
  0xfa   : > { %2991 = vmatpush.msk.msra.mxu0 %vm603_vm11, %v5436_v44  ;;  %3007 = vmatpush.msk.msra.mxu1 %vm603_vm11, %v5436_v44  ;;  %vm628_vm11 = vcmp.eq.s32.totalorder %v3920_v37, %v612_v60 }
  0xfc   : > { %2992 = vmatpush.msk.msra.mxu0 %vm649_vm14, %v5436_v44  ;;  %3008 = vmatpush.msk.msra.mxu1 %vm649_vm14, %v5436_v44  ;;  %vm5433_vm14 = vcmp.eq.s32.totalorder %v4023_v59, %v3920_v37 }
  0xfd   : > { %vm643_vm7 = vmor %vm5433_vm14, %vm627_vm1 }
  0xfe   : > { %2993 = vmatpush.msk.msra.mxu0 %vm648_vm2, %v5436_v44  ;;  %3009 = vmatpush.msk.msra.mxu1 %vm648_vm2, %v5436_v44  ;;  %vm644_vm2 = vmor %vm5434_vm10, %vm628_vm11 }
 0x100   : > { %2994 = vmatpush.msk.msra.mxu0 %vm647_vm5, %v5436_v44  ;;  %3010 = vmatpush.msk.msra.mxu1 %vm647_vm5, %v5436_v44  ;;  %vm626_vm5 = vcmp.eq.s32.totalorder %v3920_v37, %v3972_v48 }
 0x102   : > { %2995 = vmatpush.msk.msra.mxu0 %vm646_vm8, %v5436_v44  ;;  %3011 = vmatpush.msk.msra.mxu1 %vm646_vm8, %v5436_v44  ;;  %vm642_vm8 = vmor %vm5432_vm4, %vm626_vm5 }
 0x104   : > { %2996 = vmatpush.msk.msra.mxu0 %vm645_vm13, %v5436_v44  ;;  %3012 = vmatpush.msk.msra.mxu1 %vm645_vm13, %v5436_v44 }
 0x106   : > { %2997 = vmatpush.msk.msra.mxu0 %vm644_vm2, %v5436_v44  ;;  %3013 = vmatpush.msk.msra.mxu1 %vm644_vm2, %v5436_v44 }
 0x108   : > { %2998 = vmatpush.msk.msra.mxu0 %vm643_vm7, %v5436_v44  ;;  %3014 = vmatpush.msk.msra.mxu1 %vm643_vm7, %v5436_v44 }
 0x10a   : > { %2999 = vmatpush.msk.msra.mxu0 %vm642_vm8, %v5436_v44  ;;  %3015 = vmatpush.msk.msra.mxu1 %vm642_vm8, %v5436_v44 }
 0x10b   : > { %706 = vmatmul.f32.vlgmr.msra.gmra.mxu0 %v541_v62  ;;  %726 = vmatmul.f32.vlgmr.msra.gmra.mxu1 %v542_v63 }
 0x188   : > { %v707_v0 = vpop.f32.mrf.mxu0  ;;  %v727_v1 = vpop.f32.mrf.mxu1 }
 0x189   : > { %v4080_v2 = vmul.f32 0.0033333334, %v707_v0  ;;  %v731_v3 = vmul.f32 0.0033333334, %v727_v1 }
 0x18b   : > { %v732_v4 = vmul.f32 %v4080_v2, %v4080_v2 }
 0x18d   : > { %v733_v5 = vsub.f32 %v731_v3, %v732_v4 }
 0x18f   : > { %v734_v6 = vmax.f32 %v733_v5, 0.0 }
 0x191   : > { %v735_v7 = vadd.f32 1e-05, %v734_v6 }
 0x193   : > { %3673 = vrsqrt.f32 %v735_v7  ;;  %vm742_vm13 = vweird.f32 %v735_v7 }
 0x199   : > { %v4084_v8 = vpop.eup %3673 }
 0x19a   : > { %v737_v9 = vmul.f32 %v4084_v8, %v735_v7  ;;  %vm743_vm11 = vweird.f32 %v4084_v8 }
 0x19b   : > { %vm4092_vm1 = vmor %vm742_vm13, %vm743_vm11 }
 0x19c   : > { %v738_v10 = vmul.f32 %v4084_v8, %v737_v9 }
 0x19e   : > { %v739_v11 = vmul.f32 0.5, %v738_v10 }
 0x1a0   : > { %v740_v12 = vsub.f32 1.5, %v739_v11 }
 0x1a2   : > { %v4090_v13 = vmul.f32 %v4084_v8, %v740_v12 }
 0x1a4   : > { %v745_v15 = vsel %vm4092_vm1, %v4084_v8, %v4090_v13 }
 0x1a5 LB: >> { %v3287_v19 = vld [vmem:[%s5425_s2 + $0x38] sm:$0xff]  ;;  %vm890_vm2 = vcmp.lt.s32.totalorder %v3920_v37, 64  ;;  %v3286_v20 = vld [vmem:[%s5425_s2 + $0x30] sm:$0xff]  ;;  %s3016_s27 = sshll.u32 %s3771_s20, 7  ;;  %v3803_v23 = vmov 44   ;;  %v3285_v16 = vld [vmem:[%s5425_s2 + $0x28] sm:$0xff]  ;;  %s3771_s20 = sphi %s4104_s20, %s751_s20   ;;  %v3767_v18 = vphi %v4102_v18, %v5450_v18   ;;  %v3763_v17 = vphi %v4100_v17, %v5449_v17  }
 0x1a6   : >> { %1028 = vmatpush.bf16.msra.mxu0 %v3287_v19  ;;  %3513 = vmatpush.bf16.msra.mxu1 %v3287_v19  ;;  %s4123_s28 = sshra.s32 %s3016_s27, 3  ;;  %v4125_v21 = vstv %s3016_s27  ;;  %v4127_v24 = vsel %vm890_vm2, 256, %v3803_v23  ;;  %v4142_v29 = vperm.slane %v4080_v2, 0  ;;  %v4164_v33 = vperm.slane %v745_v15, 0  ;;  %v3284_v3 = vld [vmem:[%s5425_s2 + $0x20] sm:$0xff]  ;;  %v3283_v12 = vld [vmem:[%s5425_s2 + $0x18] sm:$0xff] }
 0x1a7   : >> { %3514 = vmatpush.bf16.msra.mxu2 %v3287_v19  ;;  %3515 = vmatpush.bf16.msra.mxu3 %v3287_v19  ;;  %s3017_s29 = sshll.u32 %s4123_s28, 2  ;;  %v874_v25 = vadd.s32 %v4125_v21, %v3918_v36  ;;  %v875_v26 = vadd.s32 %v4125_v21, %v4023_v59  ;;  %v878_v27 = vadd.s32 %v4125_v21, %v3993_v53  ;;  %v3804_v52 = vmov 0.0   ;;  %s751_s20 = sadd.s32 1, %s3771_s20  }
 0x1a8   : >> { %v879_v28 = vadd.s32 %v4125_v21, %v3984_v51  ;;  %v882_v30 = vadd.s32 %v4125_v21, %v3972_v48  ;;  %v4148_v31 = vadd.s32 %v4125_v21, %v3961_v46  ;;  %v4152_v22 = vadd.s32 %v4125_v21, %v3933_v42  ;;  %s4156_s9 = scalar_lea.vmem [#allocation2], %s3017_s29  ;;  %s4308_s21 = scalar_lea.vmem [#allocation3], %s3017_s29 }
 0x1a9   : >> { %v3339_v32 = vld [vmem:[%s4156_s9] sm:$0xff]   ;;  %vm892_vm5 = vcmp.lt.s32.totalorder %v874_v25, %v4127_v24  ;;  %vm893_vm7 = vcmp.lt.s32.totalorder %v875_v26, %v4127_v24  ;;  %v3474_v34 = vld [vmem:[%s4156_s9 + $0x10] sm:$0xff]   ;;  %vm896_vm8 = vcmp.lt.s32.totalorder %v878_v27, %v4127_v24  ;;  %v4174_v56 = vadd.s32 %v4125_v21, %v3930_v41  ;;  %p748_p6 = scmp.ge.s32.totalorder %s751_s20, 2  }
 0x1aa   : >> { %1029 = vmatpush.bf16.msra.mxu0 %v3286_v20  ;;  %3516 = vmatpush.bf16.msra.mxu1 %v3286_v20  ;;  %v3476_v35 = vld [vmem:[%s4156_s9 + $0x20] sm:$0xff]   ;;  %v3340_v39 = vunpack.c.l.bf16 %v3339_v32  ;;  %v3341_v50 = vunpack.c.h.bf16 %v3339_v32  ;;  %v3018_v54 = vsel %vm892_vm5, 1.0, %v3804_v52  ;;  %v3019_v58 = vsel %vm893_vm7, 1.0, %v3804_v52  ;;  %s4569_s20 = smov (%p748_p6), 0  }
 0x1ab   : >> { %3517 = vmatpush.bf16.msra.mxu2 %v3286_v20  ;;  %3518 = vmatpush.bf16.msra.mxu3 %v3286_v20  ;;  %v3348_v60 = vunpack.c.l.bf16 %v3474_v34  ;;  %v3349_v61 = vunpack.c.h.bf16 %v3474_v34  ;;  %vm897_vm11 = vcmp.lt.s32.totalorder %v879_v28, %v4127_v24  ;;  %v3022_v0 = vsel %vm896_vm8, 1.0, %v3804_v52 }
 0x1ac   : >> { %v792_v62 = vsub.f32 %v3340_v39, %v4142_v29  ;;  %v793_v63 = vsub.f32 %v3341_v50, %v4142_v29  ;;  %v3356_v1 = vunpack.c.l.bf16 %v3476_v35  ;;  %v3357_v6 = vunpack.c.h.bf16 %v3476_v35  ;;  %v3478_v39 = vld [vmem:[%s4156_s9 + $0x30] sm:$0xff]  }
 0x1ad   : >> { %v796_v4 = vsub.f32 %v3348_v60, %v4142_v29  ;;  %v797_v5 = vsub.f32 %v3349_v61, %v4142_v29  ;;  %vm900_vm13 = vcmp.lt.s32.totalorder %v882_v30, %v4127_v24  ;;  %v3023_v10 = vsel %vm897_vm11, 1.0, %v3804_v52  ;;  %v3282_v30 = vld [vmem:[%s5425_s2 + $0x10] sm:$0xff] }
 0x1ae   : >> { %1030 = vmatpush.bf16.msra.mxu0 %v3285_v16  ;;  %3519 = vmatpush.bf16.msra.mxu1 %v3285_v16  ;;  %v809_v7 = vmul.f32 %v4164_v33, %v792_v62  ;;  %v810_v9 = vmul.f32 %v4164_v33, %v793_v63  ;;  %v800_v11 = vsub.f32 %v3356_v1, %v4142_v29  ;;  %v3026_v35 = vsel %vm900_vm13, 1.0, %v3804_v52 }
 0x1af   : >> { %3520 = vmatpush.bf16.msra.mxu2 %v3285_v16  ;;  %3521 = vmatpush.bf16.msra.mxu3 %v3285_v16  ;;  %v813_v19 = vmul.f32 %v4164_v33, %v796_v4  ;;  %v814_v20 = vmul.f32 %v4164_v33, %v797_v5  ;;  %v801_v23 = vsub.f32 %v3357_v6, %v4142_v29  ;;  %v3365_v4 = vunpack.c.h.bf16 %v3478_v39 }
 0x1b0   : >> { %vm901_vm2 = vcmp.lt.s32.totalorder %v4148_v31, %v4127_v24  ;;  %vm825_vm5 = vcmp.ge.f32.partialorder %v809_v7, 0.0  ;;  %vm826_vm7 = vcmp.ge.f32.partialorder %v810_v9, 0.0  ;;  %v841_v25 = vmul.f32 0.01, %v809_v7 }
 0x1b1   : >> { %v842_v26 = vmul.f32 0.01, %v810_v9  ;;  %vm829_vm8 = vcmp.ge.f32.partialorder %v813_v19, 0.0  ;;  %vm830_vm11 = vcmp.ge.f32.partialorder %v814_v20, 0.0  ;;  %v845_v27 = vmul.f32 0.01, %v813_v19 }
 0x1b2   : >> { %1031 = vmatpush.bf16.msra.mxu0 %v3284_v3  ;;  %3522 = vmatpush.bf16.msra.mxu1 %v3284_v3  ;;  %v846_v28 = vmul.f32 0.01, %v814_v20  ;;  %v857_v16 = vsel %vm825_vm5, %v809_v7, %v841_v25  ;;  %v817_v34 = vmul.f32 %v4164_v33, %v800_v11  ;;  %v3473_v7 = vld [vmem:[%s4156_s9 + $0x8] sm:$0xff]   ;;  %v805_v31 = vsub.f32 %v3365_v4, %v4142_v29 }
 0x1b3   : >> { %3523 = vmatpush.bf16.msra.mxu2 %v3284_v3  ;;  %3524 = vmatpush.bf16.msra.mxu3 %v3284_v3  ;;  %v858_v32 = vsel %vm826_vm7, %v810_v9, %v842_v26  ;;  %v4206_v50 = vmul.f32 %v3018_v54, %v857_v16  ;;  %v861_v61 = vsel %vm829_vm8, %v813_v19, %v845_v27  ;;  %v3344_v27 = vunpack.c.l.bf16 %v3473_v7 }
 0x1b4   : >> { %v4208_v60 = vmul.f32 %v3019_v58, %v858_v32  ;;  %v862_v62 = vsel %vm830_vm11, %v814_v20, %v846_v28  ;;  %v4210_v63 = vmul.f32 %v3022_v0, %v861_v61  ;;  %v818_v3 = vmul.f32 %v4164_v33, %v801_v23  ;;  %v3475_v23 = vld [vmem:[%s4156_s9 + $0x18] sm:$0xff]  }
 0x1b5   : >> { %v4212_v1 = vmul.f32 %v3023_v10, %v862_v62  ;;  %vm833_vm5 = vcmp.ge.f32.partialorder %v817_v34, 0.0  ;;  %v849_v54 = vmul.f32 0.01, %v817_v34  ;;  %v3027_v58 = vsel %vm901_vm2, 1.0, %v3804_v52 }
 0x1b6   : >> { %1032 = vmatpush.bf16.msra.mxu0 %v3283_v12  ;;  %3525 = vmatpush.bf16.msra.mxu1 %v3283_v12  ;;  %v3364_v0 = vunpack.c.l.bf16 %v3478_v39  ;;  %v956_v5 = vpack.c.bf16 %v4208_v60, %v4206_v50  ;;  %vm834_vm13 = vcmp.ge.f32.partialorder %v818_v3, 0.0  ;;  %v850_v6 = vmul.f32 0.01, %v818_v3 }
 0x1b7   : >> { %3526 = vmatpush.bf16.msra.mxu2 %v3283_v12  ;;  %3527 = vmatpush.bf16.msra.mxu3 %v3283_v12  ;;  %vm904_vm7 = vcmp.lt.s32.totalorder %v4152_v22, %v4127_v24  ;;  %v865_v9 = vsel %vm833_vm5, %v817_v34, %v849_v54  ;;  %vm905_vm2 = vcmp.lt.s32.totalorder %v4174_v56, %v4127_v24  ;;  %v3281_v22 = vld [vmem:[%s5425_s2 + $0x8] sm:$0xff]  ;;  %v3345_v16 = vunpack.c.h.bf16 %v3473_v7 }
 0x1b8   : >> { %v804_v10 = vsub.f32 %v3364_v0, %v4142_v29  ;;  %v958_v11 = vpack.c.bf16 %v4212_v1, %v4210_v63  ;;  %v866_v12 = vsel %vm834_vm13, %v818_v3, %v850_v6  ;;  %v4233_v19 = vmul.f32 %v3026_v35, %v865_v9 }
 0x1b9   : >> { %v3030_v20 = vsel %vm904_vm7, 1.0, %v3804_v52  ;;  %v949_v25 = vmul.f32 %v3027_v58, %v866_v12  ;;  %v822_v56 = vmul.f32 %v4164_v33, %v805_v31  ;;  %v3031_v28 = vsel %vm905_vm2, 1.0, %v3804_v52 }
 0x1ba   : >> { %1033 = vmatpush.bf16.msra.mxu0 %v3282_v30  ;;  %3528 = vmatpush.bf16.msra.mxu1 %v3282_v30  ;;  %v821_v26 = vmul.f32 %v4164_v33, %v804_v10  ;;  %v876_v32 = vadd.s32 %v4125_v21, %v4011_v57  ;;  %v877_v34 = vadd.s32 %v4125_v21, %v4002_v55  ;;  %v3352_v39 = vunpack.c.l.bf16 %v3475_v23 }
 0x1bb   : >> { %3529 = vmatpush.bf16.msra.mxu2 %v3282_v30  ;;  %3530 = vmatpush.bf16.msra.mxu3 %v3282_v30  ;;  %vm838_vm11 = vcmp.ge.f32.partialorder %v822_v56, 0.0  ;;  %v854_v61 = vmul.f32 0.01, %v822_v56  ;;  %v794_v62 = vsub.f32 %v3344_v27, %v4142_v29  ;;  %v795_v3 = vsub.f32 %v3345_v16, %v4142_v29  ;;  %v3280_v30 = vld [vmem:[%s5425_s2] sm:$0xff] }
 0x1bc   : >> { %vm837_vm8 = vcmp.ge.f32.partialorder %v821_v26, 0.0  ;;  %v853_v35 = vmul.f32 0.01, %v821_v26  ;;  %vm894_vm5 = vcmp.lt.s32.totalorder %v876_v32, %v4127_v24  ;;  %v960_v54 = vpack.c.bf16 %v949_v25, %v4233_v19  ;;  %v3477_v25 = vld [vmem:[%s4156_s9 + $0x28] sm:$0xff]  }
 0x1bd   : >> { %vm895_vm13 = vcmp.lt.s32.totalorder %v877_v34, %v4127_v24  ;;  %v3353_v0 = vunpack.c.h.bf16 %v3475_v23  ;;  %v870_v4 = vsel %vm838_vm11, %v822_v56, %v854_v61  ;;  %v811_v7 = vmul.f32 %v4164_v33, %v794_v62 }
 0x1be   : >> { %1034 = vmatpush.bf16.msra.mxu0 %v3281_v22  ;;  %3531 = vmatpush.bf16.msra.mxu1 %v3281_v22  ;;  %v869_v58 = vsel %vm837_vm8, %v821_v26, %v853_v35  ;;  %v3020_v9 = vsel %vm894_vm5, 1.0, %v3804_v52  ;;  %v953_v10 = vmul.f32 %v3031_v28, %v870_v4  ;;  %v812_v31 = vmul.f32 %v4164_v33, %v795_v3 }
 0x1bf   : >> { %3532 = vmatpush.bf16.msra.mxu2 %v3281_v22  ;;  %3533 = vmatpush.bf16.msra.mxu3 %v3281_v22  ;;  %v952_v6 = vmul.f32 %v3030_v20, %v869_v58  ;;  %v798_v12 = vsub.f32 %v3352_v39, %v4142_v29  ;;  %v799_v19 = vsub.f32 %v3353_v0, %v4142_v29  ;;  %vm827_vm7 = vcmp.ge.f32.partialorder %v811_v7, 0.0  ;;  %v3479_v58 = vld [vmem:[%s4156_s9 + $0x38] sm:$0xff]  }
 0x1c0   : >> { %v843_v26 = vmul.f32 0.01, %v811_v7  ;;  %v880_v23 = vadd.s32 %v4125_v21, %v3975_v49  ;;  %v881_v20 = vadd.s32 %v4125_v21, %v3964_v47  ;;  %vm828_vm2 = vcmp.ge.f32.partialorder %v812_v31, 0.0 }
 0x1c1   : >> { %v962_v22 = vpack.c.bf16 %v953_v10, %v952_v6  ;;  %v844_v56 = vmul.f32 0.01, %v812_v31  ;;  %v815_v27 = vmul.f32 %v4164_v33, %v798_v12  ;;  %v3021_v16 = vsel %vm895_vm13, 1.0, %v3804_v52 }
 0x1c2   : >> { %1035 = vmatpush.bf16.msra.mxu0 %v3280_v30  ;;  %3534 = vmatpush.bf16.msra.mxu1 %v3280_v30  ;;  %v859_v28 = vsel %vm827_vm7, %v811_v7, %v843_v26  ;;  %v816_v32 = vmul.f32 %v4164_v33, %v799_v19  ;;  %v3360_v35 = vunpack.c.l.bf16 %v3477_v25  ;;  %vm898_vm11 = vcmp.lt.s32.totalorder %v880_v23, %v4127_v24 }
 0x1c3   : >> { %3535 = vmatpush.bf16.msra.mxu2 %v3280_v30  ;;  %3536 = vmatpush.bf16.msra.mxu3 %v3280_v30  ;;  %v860_v39 = vsel %vm828_vm2, %v812_v31, %v844_v56  ;;  %vm831_vm8 = vcmp.ge.f32.partialorder %v815_v27, 0.0  ;;  %v847_v61 = vmul.f32 0.01, %v815_v27  ;;  %vm899_vm13 = vcmp.lt.s32.totalorder %v881_v20, %v4127_v24 }
 0x1c4   : >> { %vm832_vm5 = vcmp.ge.f32.partialorder %v816_v32, 0.0  ;;  %v848_v34 = vmul.f32 0.01, %v816_v32  ;;  %v942_v62 = vmul.f32 %v3020_v9, %v859_v28  ;;  %v943_v3 = vmul.f32 %v3021_v16, %v860_v39 }
 0x1c5   : >> { %1036 = vmatmul.bf16.vlgmr.msra.gmra.mxu0 %v956_v5  ;;  %1046 = vmatmul.bf16.vlgmr.msra.gmra.mxu1 %v958_v11  ;;  %v3361_v30 = vunpack.c.h.bf16 %v3477_v25  ;;  %v863_v0 = vsel %vm831_vm8, %v815_v27, %v847_v61  ;;  %v3024_v4 = vsel %vm898_vm11, 1.0, %v3804_v52  ;;  %v3025_v50 = vsel %vm899_vm13, 1.0, %v3804_v52 }
 0x1c6   : >> { %1056 = vmatmul.bf16.vlgmr.msra.gmra.mxu2 %v960_v54  ;;  %1066 = vmatmul.bf16.vlgmr.msra.gmra.mxu3 %v962_v22  ;;  %v802_v60 = vsub.f32 %v3360_v35, %v4142_v29  ;;  %v864_v5 = vsel %vm832_vm5, %v816_v32, %v848_v34  ;;  %v884_v1 = vadd.s32 %v4125_v21, %v3953_v45  ;;  %v3368_v6 = vunpack.c.l.bf16 %v3479_v58 }
 0x1c7   : >> { %v803_v63 = vsub.f32 %v3361_v30, %v4142_v29  ;;  %v885_v11 = vadd.s32 %v4125_v21, %v3936_v43  ;;  %v3369_v7 = vunpack.c.h.bf16 %v3479_v58  ;;  %v888_v9 = vadd.s32 %v4125_v21, %v3927_v40 }
 0x1c8   : >> { %v819_v54 = vmul.f32 %v4164_v33, %v802_v60  ;;  %v946_v10 = vmul.f32 %v3024_v4, %v863_v0  ;;  %vm902_vm7 = vcmp.lt.s32.totalorder %v884_v1, %v4127_v24  ;;  %v806_v23 = vsub.f32 %v3368_v6, %v4142_v29 }
 0x1c9   : >> { %v820_v31 = vmul.f32 %v4164_v33, %v803_v63  ;;  %vm903_vm2 = vcmp.lt.s32.totalorder %v885_v11, %v4127_v24  ;;  %v3028_v19 = vsel %vm902_vm7, 1.0, %v3804_v52  ;;  %v807_v20 = vsub.f32 %v3369_v7, %v4142_v29 }
 0x1ca   : >> { %vm835_vm8 = vcmp.ge.f32.partialorder %v819_v54, 0.0  ;;  %v851_v12 = vmul.f32 0.01, %v819_v54  ;;  %v3029_v25 = vsel %vm903_vm2, 1.0, %v3804_v52  ;;  %v947_v22 = vmul.f32 %v3025_v50, %v864_v5 }
 0x1cb   : >> { %vm836_vm11 = vcmp.ge.f32.partialorder %v820_v31, 0.0  ;;  %v852_v26 = vmul.f32 0.01, %v820_v31  ;;  %v889_v27 = vadd.s32 %v4125_v21, %v3923_v38  ;;  %vm906_vm5 = vcmp.lt.s32.totalorder %v888_v9, %v4127_v24 }
 0x1cc   : >> { %v867_v56 = vsel %vm835_vm8, %v819_v54, %v851_v12  ;;  %v823_v32 = vmul.f32 %v4164_v33, %v806_v23  ;;  %v824_v35 = vmul.f32 %v4164_v33, %v807_v20  ;;  %v3032_v61 = vsel %vm906_vm5, 1.0, %v3804_v52 }
 0x1cd   : >> { %v868_v28 = vsel %vm836_vm11, %v820_v31, %v852_v26  ;;  %v950_v16 = vmul.f32 %v3028_v19, %v867_v56  ;;  %vm907_vm13 = vcmp.lt.s32.totalorder %v889_v27, %v4127_v24  ;;  %v957_v30 = vpack.c.bf16 %v943_v3, %v942_v62 }
 0x1ce   : >> { %v951_v39 = vmul.f32 %v3029_v25, %v868_v28  ;;  %vm839_vm7 = vcmp.ge.f32.partialorder %v823_v32, 0.0  ;;  %vm840_vm2 = vcmp.ge.f32.partialorder %v824_v35, 0.0  ;;  %v855_v29 = vmul.f32 0.01, %v823_v32 }
 0x1cf   : >> { %v856_v34 = vmul.f32 0.01, %v824_v35  ;;  %v959_v58 = vpack.c.bf16 %v947_v22, %v946_v10  ;;  %v3033_v21 = vsel %vm907_vm13, 1.0, %v3804_v52  ;;  %vm5431_vm8 = vcmask 519168  }
 0x1d0   : >> { %v961_v0 = vpack.c.bf16 %v951_v39, %v950_v16  ;;  %v871_v4 = vsel %vm839_vm7, %v823_v32, %v855_v29  ;;  %v1224_v2 = vadd.s32 (%p748_p6), 32, %v3993_v53  ;;  %v1223_v13 = vadd.s32 (%p748_p6), 32, %v4002_v55 }
 0x1d1   : >> { %v872_v50 = vsel %vm840_vm2, %v824_v35, %v856_v34  ;;  %v954_v60 = vmul.f32 %v3032_v61, %v871_v4  ;;  %v1222_v14 = vadd.s32 (%p748_p6), 32, %v4011_v57 }
 0x1d2   : >> { %v955_v5 = vmul.f32 %v3033_v21, %v872_v50 }
 0x1d4   : >> { %v963_v33 = vpack.c.bf16 %v955_v5, %v954_v60 }
 0x1d5   : >> { %1041 = vmatmul.bf16.gmra.mxu0 %v957_v30  ;;  %1051 = vmatmul.bf16.gmra.mxu1 %v959_v58 }
 0x1d6   : >> { %1061 = vmatmul.bf16.gmra.mxu2 %v961_v0  ;;  %1071 = vmatmul.bf16.gmra.mxu3 %v963_v33 }
 0x242   : >> { %v1037_v24 = vpop.f32.mrf.mxu0  ;;  %v1047_v63 = vpop.f32.mrf.mxu1 }
 0x243   : >> { %v1077_v1 = vpack.c.bf16 %v1037_v24, %v1037_v24  ;;  %v1081_v11 = vpack.c.bf16 %v1047_v63, %v1047_v63  ;;  %v1150_v27 = vmul.f32 %v1037_v24, %v1037_v24  ;;  %v1112_v32 = vsel %vm5442_vm0, %v1037_v24, 0.0 }
 0x244   : >> { %v1154_v58 = vmul.f32 %v1047_v63, %v1047_v63 }
 0x245   : >> { %1096 = vst.msk [vmem:[%s4308_s21] sm:$0xf] %vm5431_vm8, %v1077_v1  ;;  %v1166_v29 = vsel %vm5442_vm0, %v1150_v27, 0.0 }
 0x246   : >> { %1100 = vst.msk [vmem:[%s4308_s21 + $0x10] sm:$0xf] %vm5431_vm8, %v1081_v11 }
 0x249   : >> { %v4314_v52 = vpop.f32.mrf.mxu2  ;;  %v4316_v62 = vpop.f32.mrf.mxu3 }
 0x24a   : >> { %v1039_v3 = vpop.f32.mrf.mxu0  ;;  %v1049_v54 = vpop.f32.mrf.mxu1  ;;  %v1085_v6 = vpack.c.bf16 %v4314_v52, %v4314_v52  ;;  %v1089_v10 = vpack.c.bf16 %v4316_v62, %v4316_v62 }
 0x24b   : >> { %v1078_v7 = vpack.c.bf16 %v1039_v3, %v1039_v3  ;;  %v1082_v9 = vpack.c.bf16 %v1049_v54, %v1049_v54  ;;  %v1151_v23 = vmul.f32 %v1039_v3, %v1039_v3  ;;  %v1113_v28 = vsel %vm5442_vm0, %v1039_v3, 0.0 }
 0x24c   : >> { %1104 = vst.msk [vmem:[%s4308_s21 + $0x20] sm:$0xf] %vm5431_vm8, %v1085_v6  ;;  %v1114_v61 = vadd.f32 %v1113_v28, %v1112_v32 }
 0x24d   : >> { %1097 = vst.msk [vmem:[%s4308_s21 + $0x4] sm:$0xf] %vm5431_vm8, %v1078_v7  ;;  %v1167_v35 = vsel %vm5442_vm0, %v1151_v23, 0.0  ;;  %v1119_v7 = vsel %vm5442_vm0, %v1047_v63, 0.0 }
 0x24e   : >> { %1101 = vst.msk [vmem:[%s4308_s21 + $0x14] sm:$0xf] %vm5431_vm8, %v1082_v9  ;;  %v1168_v21 = vadd.f32 %v1167_v35, %v1166_v29  ;;  %v1155_v9 = vmul.f32 %v1049_v54, %v1049_v54 }
 0x24f   : >> { %1108 = vst.msk [vmem:[%s4308_s21 + $0x30] sm:$0xf] %vm5431_vm8, %v1089_v10 }
 0x250   : >> { %v1175_v28 = vsel %vm5442_vm0, %v1155_v9, 0.0 }
 0x251   : >> { %v4330_v31 = vpop.f32.mrf.mxu2  ;;  %v4332_v12 = vpop.f32.mrf.mxu3 }
 0x252   : >> { %v1042_v19 = vpop.f32.mrf.mxu0  ;;  %v1052_v25 = vpop.f32.mrf.mxu1  ;;  %v1086_v26 = vpack.c.bf16 %v4330_v31, %v4330_v31  ;;  %v1090_v56 = vpack.c.bf16 %v4332_v12, %v4332_v12 }
 0x253   : >> { %v1079_v20 = vpack.c.bf16 %v1042_v19, %v1042_v19  ;;  %v1083_v22 = vpack.c.bf16 %v1052_v25, %v1052_v25  ;;  %v1152_v16 = vmul.f32 %v1042_v19, %v1042_v19  ;;  %v1115_v39 = vsel %vm5442_vm0, %v1042_v19, 0.0 }
 0x254   : >> { %1105 = vst.msk [vmem:[%s4308_s21 + $0x24] sm:$0xf] %vm5431_vm8, %v1086_v26  ;;  %v1116_v0 = vadd.f32 %v1115_v39, %v1114_v61 }
 0x255   : >> { %1098 = vst.msk [vmem:[%s4308_s21 + $0x8] sm:$0xf] %vm5431_vm8, %v1079_v20  ;;  %v1169_v34 = vsel %vm5442_vm0, %v1152_v16, 0.0  ;;  %v1173_v20 = vsel %vm5442_vm0, %v1154_v58, 0.0  ;;  %v1123_v16 = vsel %vm5442_vm0, %v1052_v25, 0.0 }
 0x256   : >> { %1102 = vst.msk [vmem:[%s4308_s21 + $0x18] sm:$0xf] %vm5431_vm8, %v1083_v22  ;;  %v1170_v3 = vadd.f32 %v1169_v34, %v1168_v21  ;;  %v1121_v22 = vsel %vm5442_vm0, %v1049_v54, 0.0  ;;  %v1158_v34 = vmul.f32 %v4314_v52, %v4314_v52 }
 0x257   : >> { %1109 = vst.msk [vmem:[%s4308_s21 + $0x34] sm:$0xf] %vm5431_vm8, %v1090_v56  ;;  %v1156_v56 = vmul.f32 %v1052_v25, %v1052_v25  ;;  %v1127_v25 = vsel %vm5442_vm0, %v4314_v52, 0.0 }
 0x259   : >> { %v1062_v30 = vpop.f32.mrf.mxu2  ;;  %v4353_v11 = vpop.f32.mrf.mxu3  ;;  %v1177_v54 = vsel %vm5442_vm0, %v1156_v56, 0.0 }
 0x25a   : >> { %v1044_v4 = vpop.f32.mrf.mxu0  ;;  %v1054_v50 = vpop.f32.mrf.mxu1  ;;  %v1087_v60 = vpack.c.bf16 %v1062_v30, %v1062_v30  ;;  %v1091_v19 = vpack.c.bf16 %v4353_v11, %v4353_v11  ;;  %v1131_v52 = vsel %vm5442_vm0, %v1062_v30, 0.0 }
 0x25b   : >> { %v1080_v5 = vpack.c.bf16 %v1044_v4, %v1044_v4  ;;  %v1117_v33 = vsel %vm5442_vm0, %v1044_v4, 0.0  ;;  %v1153_v24 = vmul.f32 %v1044_v4, %v1044_v4  ;;  %v1084_v1 = vpack.c.bf16 %v1054_v50, %v1054_v50 }
 0x25c   : >> { %v1118_v6 = vadd.f32 %v1117_v33, %v1116_v0  ;;  %1106 = vst.msk [vmem:[%s4308_s21 + $0x28] sm:$0xf] %vm5431_vm8, %v1087_v60  ;;  %v1157_v32 = vmul.f32 %v1054_v50, %v1054_v50  ;;  %v1125_v58 = vsel %vm5442_vm0, %v1054_v50, 0.0  ;;  %v1181_v50 = vsel %vm5442_vm0, %v1158_v34, 0.0 }
 0x25d   : >> { %1099 = vst.msk [vmem:[%s4308_s21 + $0xc] sm:$0xf] %vm5431_vm8, %v1080_v5  ;;  %v1171_v10 = vsel %vm5442_vm0, %v1153_v24, 0.0  ;;  %v1159_v5 = vmul.f32 %v4330_v31, %v4330_v31 }
 0x25e   : >> { %v1120_v26 = vadd.f32 %v1119_v7, %v1118_v6  ;;  %v1172_v23 = vadd.f32 %v1171_v10, %v1170_v3  ;;  %1103 = vst.msk [vmem:[%s4308_s21 + $0x1c] sm:$0xf] %vm5431_vm8, %v1084_v1  ;;  %v1179_v33 = vsel %vm5442_vm0, %v1157_v32, 0.0  ;;  %v1129_v3 = vsel %vm5442_vm0, %v4330_v31, 0.0 }
 0x25f   : >> { %1110 = vst.msk [vmem:[%s4308_s21 + $0x38] sm:$0xf] %vm5431_vm8, %v1091_v19  ;;  %v1160_v6 = vmul.f32 %v1062_v30, %v1062_v30  ;;  %v1183_v10 = vsel %vm5442_vm0, %v1159_v5, 0.0  ;;  %v1135_v31 = vsel %vm5442_vm0, %v4316_v62, 0.0 }
 0x260   : >> { %v1174_v63 = vadd.f32 %v1173_v20, %v1172_v23  ;;  %v1122_v27 = vadd.f32 %v1121_v22, %v1120_v26  ;;  %v1162_v20 = vmul.f32 %v4316_v62, %v4316_v62  ;;  %v1139_v62 = vsel %vm5442_vm0, %v4353_v11, 0.0 }
 0x261   : >> { %v1064_v35 = vpop.f32.mrf.mxu2  ;;  %v1074_v21 = vpop.f32.mrf.mxu3  ;;  %v1185_v22 = vsel %vm5442_vm0, %v1160_v6, 0.0 }
 0x262   : >> { %v1124_v39 = vadd.f32 %v1123_v16, %v1122_v27  ;;  %v1176_v61 = vadd.f32 %v1175_v28, %v1174_v63  ;;  %v1088_v29 = vpack.c.bf16 %v1064_v35, %v1064_v35  ;;  %v1092_v60 = vpack.c.bf16 %v1074_v21, %v1074_v21 }
 0x263   : >> { %v1161_v19 = vmul.f32 %v1064_v35, %v1064_v35  ;;  %v1133_v56 = vsel %vm5442_vm0, %v1064_v35, 0.0  ;;  %v1163_v28 = vmul.f32 %v4332_v12, %v4332_v12  ;;  %v1164_v35 = vmul.f32 %v4353_v11, %v4353_v11 }
 0x264   : >> { %v1126_v0 = vadd.f32 %v1125_v58, %v1124_v39  ;;  %v1178_v4 = vadd.f32 %v1177_v54, %v1176_v61  ;;  %1107 = vst.msk [vmem:[%s4308_s21 + $0x2c] sm:$0xf] %vm5431_vm8, %v1088_v29  ;;  %v1189_v39 = vsel %vm5442_vm0, %v1162_v20, 0.0  ;;  %v1137_v61 = vsel %vm5442_vm0, %v4332_v12, 0.0 }
 0x265   : >> { %1111 = vst.msk [vmem:[%s4308_s21 + $0x3c] sm:$0xf] %vm5431_vm8, %v1092_v60  ;;  %v1187_v30 = vsel %vm5442_vm0, %v1161_v19, 0.0  ;;  %v1191_v54 = vsel %vm5442_vm0, %v1163_v28, 0.0  ;;  %v1165_v58 = vmul.f32 %v1074_v21, %v1074_v21  ;;  %v1193_v60 = vsel %vm5442_vm0, %v1164_v35, 0.0 }
 0x266   : >> { %v1128_v24 = vadd.f32 %v1127_v25, %v1126_v0  ;;  %v1180_v1 = vadd.f32 %v1179_v33, %v1178_v4  ;;  %v1141_v25 = vsel %vm5442_vm0, %v1074_v21, 0.0 }
 0x267   : >> { %v1195_v12 = vsel %vm5442_vm0, %v1165_v58, 0.0 }
 0x268   : >> { %v1182_v7 = vadd.f32 %v1181_v50, %v1180_v1  ;;  %v1130_v9 = vadd.f32 %v1129_v3, %v1128_v24 }
 0x26a   : >> { %v1132_v26 = vadd.f32 %v1131_v52, %v1130_v9  ;;  %v1184_v23 = vadd.f32 %v1183_v10, %v1182_v7 }
 0x26c   : >> { %v1186_v63 = vadd.f32 %v1185_v22, %v1184_v23  ;;  %v1134_v27 = vadd.f32 %v1133_v56, %v1132_v26  ;;  %v1204_v22 = vadd.s32 (%p748_p6), 32, %v3920_v37  ;;  %v1227_v56 = vadd.s32 (%p748_p6), 32, %v3964_v47 }
 0x26e   : >> { %v1136_v16 = vadd.f32 %v1135_v31, %v1134_v27  ;;  %v1188_v32 = vadd.f32 %v1187_v30, %v1186_v63  ;;  %v1226_v63 = vadd.s32 (%p748_p6), 32, %v3975_v49  ;;  %vm1212_vm11 = vcmp.eq.s32.totalorder (%p748_p6), %v3964_v47, %v1204_v22 }
 0x26f   : > { %vm1235_vm5 = vcmp.eq.s32.totalorder (%p748_p6), %v3920_v37, %v1227_v56  ;;  %vm1211_vm13 = vcmp.eq.s32.totalorder (%p748_p6), %v3975_v49, %v1204_v22  ;;  %vm1220_vm7 = vmor (%p748_p6), %vm569_vm9, %vm1212_vm11  ;;  %vm1210_vm8 = vcmp.eq.s32.totalorder (%p748_p6), %v3984_v51, %v1204_v22 }
 0x270   : >> { %v1190_v29 = vadd.f32 %v1189_v39, %v1188_v32  ;;  %v1138_v34 = vadd.f32 %v1137_v61, %v1136_v16  ;;  %vm1234_vm2 = vcmp.eq.s32.totalorder (%p748_p6), %v3920_v37, %v1226_v63  ;;  %vm4430_vm1 = vmor (%p748_p6), %vm1220_vm7, %vm1235_vm5  ;;  %vm1209_vm7 = vcmp.eq.s32.totalorder (%p748_p6), %v3993_v53, %v1204_v22 }
 0x271   : > { %3075 = vmatpush.msk.msra.mxu0 (%p748_p6), %vm4430_vm1, %v5436_v44  ;;  %vm1219_vm9 = vmor (%p748_p6), %vm568_vm12, %vm1211_vm13  ;;  %3084 = vmatpush.msk.msra.mxu1 (%p748_p6), %vm4430_vm1, %v5436_v44  ;;  %vm1232_vm13 = vcmp.eq.s32.totalorder (%p748_p6), %v3920_v37, %v1224_v2 }
 0x272   : >> { %v1140_v0 = vadd.f32 %v1139_v62, %v1138_v34  ;;  %v1192_v4 = vadd.f32 %v1191_v54, %v1190_v29  ;;  %vm4447_vm5 = vmor (%p748_p6), %vm1219_vm9, %vm1234_vm2  ;;  %vm1231_vm9 = vcmp.eq.s32.totalorder (%p748_p6), %v3920_v37, %v1223_v13 }
 0x273   : > { %3076 = vmatpush.msk.msra.mxu0 (%p748_p6), %vm4447_vm5, %v5436_v44  ;;  %vm1218_vm12 = vmor (%p748_p6), %vm567_vm15, %vm1210_vm8  ;;  %3085 = vmatpush.msk.msra.mxu1 (%p748_p6), %vm4447_vm5, %v5436_v44  ;;  %vm1230_vm8 = vcmp.eq.s32.totalorder (%p748_p6), %v3920_v37, %v1222_v14 }
 0x274   : >> { %v1194_v5 = vadd.f32 %v1193_v60, %v1192_v4  ;;  %v1142_v33 = vadd.f32 %v1141_v25, %v1140_v0  ;;  %vm1217_vm15 = vmor (%p748_p6), %vm566_vm3, %vm1209_vm7 }
 0x275   : > { %vm4499_vm7 = vmor (%p748_p6), %vm5434_vm10, %vm1230_vm8 }
 0x276   : >> { %v1143_v24 = vrot.slane %v1142_v33, 4  ;;  %v1196_v1 = vadd.f32 %v1195_v12, %v1194_v5  ;;  %v5470_v12 = vmov (%p748_p6), 0 }
 0x278   : >> { %v1144_v50 = vadd.f32 %v1143_v24, %v1142_v33  ;;  %v1197_v3 = vrot.slane %v1196_v1, 4 }
 0x27a   : >> { %v1145_v6 = vrot.slane %v1144_v50, 2  ;;  %v1198_v7 = vadd.f32 %v1197_v3, %v1196_v1  ;;  %v4565_v1 = vmov (%p748_p6), 0.0  }
 0x27c   : >> { %v1146_v9 = vadd.f32 %v1145_v6, %v1144_v50  ;;  %v1199_v10 = vrot.slane %v1198_v7, 2  ;;  %v4567_v50 = vmov (%p748_p6), 0.0  }
 0x27e   : >> { %v1147_v11 = vrot.slane %v1146_v9, 1  ;;  %v1200_v52 = vadd.f32 %v1199_v10, %v1198_v7 }
 0x280   : >> { %v1148_v19 = vadd.f32 %v1147_v11, %v1146_v9  ;;  %v1201_v26 = vrot.slane %v1200_v52, 1 }
 0x282   : >> { %v1149_v23 = vadd.f32 %v3767_v18, %v1148_v19   ;;  %v1202_v20 = vadd.f32 %v1201_v26, %v1200_v52  ;;  %750 = sbr.rel (!%p748_p6) target bundleno = 421 (0x1a5), region = 120 }
 0x284   : >> { %v1203_v21 = vadd.f32 %v3763_v17, %v1202_v20   ;;  %v5450_v18 = vmov %v1149_v23 }
 0x285   : > { %v1225_v18 = vadd.s32 (%p748_p6), 32, %v3984_v51 }
 0x286   : >> { %v5449_v17 = vmov %v1203_v21 }
 0x287   : > { %vm1233_vm11 = vcmp.eq.s32.totalorder %v3920_v37, %v1225_v18  ;;  %v1221_v17 = vadd.s32 32, %v4023_v59 }
 0x288   : > { %vm4463_vm2 = vmor %vm1218_vm12, %vm1233_vm11 }
 0x289   : > { %3077 = vmatpush.msk.msra.mxu0 %vm4463_vm2, %v5436_v44  ;;  %3086 = vmatpush.msk.msra.mxu1 %vm4463_vm2, %v5436_v44  ;;  %vm4478_vm11 = vmor %vm1217_vm15, %vm1232_vm13  ;;  %vm1229_vm3 = vcmp.eq.s32.totalorder %v3920_v37, %v1221_v17  ;;  %vm1228_vm13 = vcmp.eq.s32.totalorder %v3920_v37, %v3993_v53 }
 0x28a   : > { %vm4488_vm12 = vmor %vm5435_vm6, %vm1231_vm9 }
 0x28b   : > { %3078 = vmatpush.msk.msra.mxu0 %vm4478_vm11, %v5436_v44  ;;  %3087 = vmatpush.msk.msra.mxu1 %vm4478_vm11, %v5436_v44  ;;  %vm4514_vm9 = vmor %vm5433_vm14, %vm1229_vm3 }
 0x28c   : > { %vm4527_vm15 = vmor %vm5432_vm4, %vm1228_vm13 }
 0x28d   : > { %3079 = vmatpush.msk.msra.mxu0 %vm4488_vm12, %v5436_v44  ;;  %3088 = vmatpush.msk.msra.mxu1 %vm4488_vm12, %v5436_v44 }
 0x28f   : > { %3080 = vmatpush.msk.msra.mxu0 %vm4499_vm7, %v5436_v44  ;;  %3089 = vmatpush.msk.msra.mxu1 %vm4499_vm7, %v5436_v44 }
 0x291   : > { %3081 = vmatpush.msk.msra.mxu0 %vm4514_vm9, %v5436_v44  ;;  %3090 = vmatpush.msk.msra.mxu1 %vm4514_vm9, %v5436_v44 }
 0x293   : > { %3082 = vmatpush.msk.msra.mxu0 %vm4527_vm15, %v5436_v44  ;;  %3091 = vmatpush.msk.msra.mxu1 %vm4527_vm15, %v5436_v44 }
 0x294   : > { %3083 = vmatmul.msk.f32.vlgmr.msra.gmra.mxu0 %vm5442_vm0, %v1149_v23  ;;  %3092 = vmatmul.msk.f32.vlgmr.msra.gmra.mxu1 %vm5442_vm0, %v1203_v21 }
 0x311   : > { %v1280_v39 = vpop.f32.mrf.mxu0  ;;  %v1303_v61 = vpop.f32.mrf.mxu1 }
 0x312   : > { %v4545_v35 = vmul.f32 0.0033333334, %v1280_v39  ;;  %v1307_v29 = vmul.f32 0.0033333334, %v1303_v61 }
 0x314   : > { %5467 = vst [vmem:[#allocation9_spill] sm:$0xff] %v4545_v35  ;;  %v1308_v34 = vmul.f32 %v4545_v35, %v4545_v35 }
 0x316   : > { %v1309_v54 = vsub.f32 %v1307_v29, %v1308_v34 }
 0x318   : > { %v1310_v62 = vmax.f32 %v1309_v54, 0.0 }
 0x31a   : > { %v1311_v58 = vadd.f32 1e-05, %v1310_v62 }
 0x31c   : > { %3675 = vrsqrt.f32 %v1311_v58  ;;  %vm1318_vm3 = vweird.f32 %v1311_v58 }
 0x322   : > { %v4549_v0 = vpop.eup %3675 }
 0x323   : > { %5468 = vst [vmem:[#allocation10_spill] sm:$0xff] %v4549_v0  ;;  %v1313_v4 = vmul.f32 %v4549_v0, %v1311_v58  ;;  %vm1319_vm8 = vweird.f32 %v4549_v0 }
 0x324   : > { %vm4557_vm13 = vmor %vm1318_vm3, %vm1319_vm8 }
 0x325   : > { %v1314_v60 = vmul.f32 %v4549_v0, %v1313_v4  ;;  %v5471_v12 = vsel %vm4557_vm13, 4294967295, %v5470_v12 }
 0x326   : > { %5472 = vst [vmem:[#allocation12_spill] sm:$0xff] %v5471_v12 }
 0x327   : > { %v1315_v25 = vmul.f32 0.5, %v1314_v60 }
 0x329   : > { %v1316_v5 = vsub.f32 1.5, %v1315_v25 }
 0x32b   : > { %v4555_v33 = vmul.f32 %v4549_v0, %v1316_v5 }
 0x32d   : > { %5469 = vst [vmem:[#allocation11_spill] sm:$0xff] %v4555_v33 }
 0x32e LB: >> { %v3291_v3 = vld [vmem:[%s5426_s3 + $0x18] sm:$0xff]  ;;  %vm1466_vm8 = vcmp.lt.s32.totalorder %v3920_v37, 32  ;;  %v3290_v6 = vld [vmem:[%s5426_s3 + $0x10] sm:$0xff]  ;;  %s3093_s28 = sshll.u32 %s3783_s20, 7  ;;  %v5473_v35 = vld [vmem:[#allocation9_spill] sm:$0xff]  ;;  %v3805_v10 = vmov 44   ;;  %s3783_s20 = sphi %s4569_s20, %s1327_s20   ;;  %v3779_v50 = vphi %v4567_v50, %v5533_v50   ;;  %v3775_v1 = vphi %v4565_v1, %v5532_v1  }
 0x32f   : >> { %1600 = vmatpush.bf16.msra.mxu0 %v3291_v3  ;;  %3537 = vmatpush.bf16.msra.mxu1 %v3291_v3  ;;  %s4588_s29 = sshra.s32 %s3093_s28, 3  ;;  %v4591_v7 = vperm.slane %v5473_v35, 0  ;;  %v4593_v9 = vstv %s3093_s28  ;;  %v4595_v11 = vsel %vm1466_vm8, 256, %v3805_v10  ;;  %v3289_v20 = vld [vmem:[%s5426_s3 + $0x8] sm:$0xff]  ;;  %v5474_v12 = vld [vmem:[#allocation12_spill] sm:$0xff]  ;;  %v5439_v61 = vmov 0.0  }
 0x330   : >> { %3538 = vmatpush.bf16.msra.mxu2 %v3291_v3  ;;  %3539 = vmatpush.bf16.msra.mxu3 %v3291_v3  ;;  %s3094_s30 = sshll.u32 %s4588_s29, 2  ;;  %v1450_v52 = vadd.s32 %v4593_v9, %v3918_v36  ;;  %v1451_v19 = vadd.s32 %v4593_v9, %v4023_v59  ;;  %v1454_v26 = vadd.s32 %v4593_v9, %v3993_v53  ;;  %v5476_v0 = vld [vmem:[#allocation10_spill] sm:$0xff]  ;;  %v3288_v3 = vld [vmem:[%s5426_s3] sm:$0xff]  ;;  %s1327_s20 = sadd.s32 1, %s3783_s20  }
 0x331   : >> { %v1455_v23 = vadd.s32 %v4593_v9, %v3984_v51  ;;  %v1458_v21 = vadd.s32 %v4593_v9, %v3972_v48  ;;  %v4613_v22 = vadd.s32 %v4593_v9, %v3961_v46  ;;  %v4617_v56 = vadd.s32 %v4593_v9, %v3933_v42  ;;  %s4625_s10 = scalar_lea.vmem [#allocation3], %s3094_s30  ;;  %s4741_s13 = scalar_lea.vmem [#allocation2], %s3094_s30 }
 0x332   : >> { %v4621_v63 = vadd.s32 %v4593_v9, %v3930_v41  ;;  %v3371_v18 = vld [vmem:[%s4625_s10] sm:$0xff]   ;;  %vm5475_vm13 = vnez %v5474_v12  ;;  %vm1468_vm3 = vcmp.lt.s32.totalorder %v1450_v52, %v4595_v11  ;;  %vm1469_vm8 = vcmp.lt.s32.totalorder %v1451_v19, %v4595_v11  ;;  %v3481_v13 = vld [vmem:[%s4625_s10 + $0x10] sm:$0xff]   ;;  %p1324_p7 = scmp.ge.s32.totalorder %s1327_s20, 2  }
 0x333   : >> { %1601 = vmatpush.bf16.msra.mxu0 %v3290_v6  ;;  %3540 = vmatpush.bf16.msra.mxu1 %v3290_v6  ;;  %vm1472_vm4 = vcmp.lt.s32.totalorder %v1454_v26, %v4595_v11  ;;  %v3483_v14 = vld [vmem:[%s4625_s10 + $0x20] sm:$0xff]   ;;  %v3372_v17 = vunpack.c.l.bf16 %v3371_v18  ;;  %v3373_v39 = vunpack.c.h.bf16 %v3371_v18  ;;  %v3095_v29 = vsel %vm1468_vm3, 1.0, %v5439_v61  ;;  %v3485_v44 = vld [vmem:[%s4625_s10 + $0x30] sm:$0xff]   ;;  %s4911_s14 = smov (%p1324_p7), 0  }
 0x334   : >> { %v5477_v33 = vld [vmem:[#allocation11_spill] sm:$0xff]  ;;  %3541 = vmatpush.bf16.msra.mxu2 %v3290_v6  ;;  %3542 = vmatpush.bf16.msra.mxu3 %v3290_v6  ;;  %v3096_v34 = vsel %vm1469_vm8, 1.0, %v5439_v61  ;;  %v3380_v54 = vunpack.c.l.bf16 %v3481_v13  ;;  %v3381_v62 = vunpack.c.h.bf16 %v3481_v13  ;;  %vm1473_vm14 = vcmp.lt.s32.totalorder %v1455_v23, %v4595_v11 }
 0x335   : >> { %v5478_v24 = vsel %vm5475_vm13, %v5476_v0, %v5477_v33  ;;  %v3099_v58 = vsel %vm1472_vm4, 1.0, %v5439_v61  ;;  %v1368_v4 = vsub.f32 %v3372_v17, %v4591_v7  ;;  %v1369_v60 = vsub.f32 %v3373_v39, %v4591_v7 }
 0x336   : >> { %v4633_v2 = vperm.slane %v5478_v24, 0  ;;  %v3100_v25 = vsel %vm1473_vm14, 1.0, %v5439_v61  ;;  %v3388_v5 = vunpack.c.l.bf16 %v3483_v14  ;;  %v1372_v6 = vsub.f32 %v3380_v54, %v4591_v7 }
 0x337   : >> { %1602 = vmatpush.bf16.msra.mxu0 %v3289_v20  ;;  %3543 = vmatpush.bf16.msra.mxu1 %v3289_v20  ;;  %v1373_v10 = vsub.f32 %v3381_v62, %v4591_v7  ;;  %v3389_v52 = vunpack.c.h.bf16 %v3483_v14  ;;  %vm1476_vm4 = vcmp.lt.s32.totalorder %v1458_v21, %v4595_v11  ;;  %vm1477_vm14 = vcmp.lt.s32.totalorder %v4613_v22, %v4595_v11 }
 0x338   : >> { %3544 = vmatpush.bf16.msra.mxu2 %v3289_v20  ;;  %v1385_v19 = vmul.f32 %v4633_v2, %v1368_v4  ;;  %v1386_v26 = vmul.f32 %v4633_v2, %v1369_v60  ;;  %v1376_v23 = vsub.f32 %v3388_v5, %v4591_v7  ;;  %v1389_v18 = vmul.f32 %v4633_v2, %v1372_v6 }
 0x339   : >> { %v1390_v13 = vmul.f32 %v4633_v2, %v1373_v10  ;;  %v1377_v17 = vsub.f32 %v3389_v52, %v4591_v7  ;;  %v3103_v14 = vsel %vm1476_vm4, 1.0, %v5439_v61  ;;  %3545 = vmatpush.bf16.msra.mxu3 %v3289_v20 }
 0x33a   : >> { %vm1401_vm3 = vcmp.ge.f32.partialorder %v1385_v19, 0.0  ;;  %vm1402_vm8 = vcmp.ge.f32.partialorder %v1386_v26, 0.0  ;;  %v1417_v21 = vmul.f32 0.01, %v1385_v19  ;;  %v1418_v39 = vmul.f32 0.01, %v1386_v26 }
 0x33b   : >> { %1603 = vmatpush.bf16.msra.mxu0 %v3288_v3  ;;  %3546 = vmatpush.bf16.msra.mxu1 %v3288_v3  ;;  %vm1405_vm10 = vcmp.ge.f32.partialorder %v1389_v18, 0.0  ;;  %vm1406_vm6 = vcmp.ge.f32.partialorder %v1390_v13, 0.0  ;;  %v1421_v54 = vmul.f32 0.01, %v1389_v18  ;;  %v1422_v62 = vmul.f32 0.01, %v1390_v13 }
 0x33c   : >> { %3547 = vmatpush.bf16.msra.mxu2 %v3288_v3  ;;  %v1433_v4 = vsel %vm1401_vm3, %v1385_v19, %v1417_v21  ;;  %v1434_v60 = vsel %vm1402_vm8, %v1386_v26, %v1418_v39  ;;  %v1393_v5 = vmul.f32 %v4633_v2, %v1376_v23  ;;  %v1394_v6 = vmul.f32 %v4633_v2, %v1377_v17 }
 0x33d   : >> { %v1516_v10 = vmul.f32 %v3095_v29, %v1433_v4  ;;  %v1517_v20 = vmul.f32 %v3096_v34, %v1434_v60  ;;  %v1437_v52 = vsel %vm1405_vm10, %v1389_v18, %v1421_v54  ;;  %v1438_v24 = vsel %vm1406_vm6, %v1390_v13, %v1422_v62  ;;  %3548 = vmatpush.bf16.msra.mxu3 %v3288_v3  ;;  %v3480_v3 = vld [vmem:[%s4625_s10 + $0x8] sm:$0xff]  }
 0x33e   : >> { %v1520_v61 = vmul.f32 %v3099_v58, %v1437_v52  ;;  %v1521_v0 = vmul.f32 %v3100_v25, %v1438_v24  ;;  %vm1409_vm4 = vcmp.ge.f32.partialorder %v1393_v5, 0.0  ;;  %vm1410_vm0 = vcmp.ge.f32.partialorder %v1394_v6, 0.0 }
 0x33f   : >> { %v1532_v12 = vpack.c.bf16 %v1517_v20, %v1516_v10  ;;  %v1425_v33 = vmul.f32 0.01, %v1393_v5  ;;  %v1426_v35 = vmul.f32 0.01, %v1394_v6  ;;  %v5479_v19 = vmov 0.0  }
 0x340   : >> { %v3104_v26 = vsel %vm1477_vm14, 1.0, %v5479_v19  ;;  %v1534_v29 = vpack.c.bf16 %v1521_v0, %v1520_v61  ;;  %v3396_v34 = vunpack.c.l.bf16 %v3485_v44  ;;  %v3397_v23 = vunpack.c.h.bf16 %v3485_v44  ;;  %v3482_v61 = vld [vmem:[%s4625_s10 + $0x18] sm:$0xff]  }
 0x341   : >> { %vm1480_vm6 = vcmp.lt.s32.totalorder %v4617_v56, %v4595_v11  ;;  %vm5480_vm10 = vcmask 523264   ;;  %v1441_v24 = vsel %vm1409_vm4, %v1393_v5, %v1425_v33  ;;  %v1442_v58 = vsel %vm1410_vm0, %v1394_v6, %v1426_v35 }
 0x342   : >> { %3127 = vmatmul.msk.bf16.vlgmr.msra.gmra.mxu0 %vm5480_vm10, %v1532_v12  ;;  %vm1481_vm3 = vcmp.lt.s32.totalorder %v4621_v63, %v4595_v11  ;;  %v3107_v25 = vsel %vm1480_vm6, 1.0, %v5479_v19  ;;  %vm5481_vm8 = vmmov %vm5480_vm10  ;;  %v1524_v22 = vmul.f32 %v3103_v14, %v1441_v24  ;;  %v1525_v18 = vmul.f32 %v3104_v26, %v1442_v58 }
 0x343   : >> { %3129 = vmatmul.msk.bf16.vlgmr.msra.gmra.mxu1 %vm5481_vm8, %v1534_v29  ;;  %v1380_v0 = vsub.f32 %v3396_v34, %v4591_v7  ;;  %v1381_v44 = vsub.f32 %v3397_v23, %v4591_v7  ;;  %v3108_v56 = vsel %vm1481_vm3, 1.0, %v5479_v19  ;;  %v3376_v13 = vunpack.c.l.bf16 %v3480_v3  ;;  %vm5482_vm14 = vmmov %vm5481_vm8  ;;  %v3484_v29 = vld [vmem:[%s4625_s10 + $0x28] sm:$0xff]  }
 0x344   : >> { %v3377_v12 = vunpack.c.h.bf16 %v3480_v3  ;;  %v1452_v35 = vadd.s32 %v4593_v9, %v4011_v57  ;;  %v1536_v33 = vpack.c.bf16 %v1525_v18, %v1524_v22  ;;  %v1453_v14 = vadd.s32 %v4593_v9, %v4002_v55 }
 0x345   : >> { %v1397_v63 = vmul.f32 %v4633_v2, %v1380_v0  ;;  %v1398_v17 = vmul.f32 %v4633_v2, %v1381_v44  ;;  %v1370_v21 = vsub.f32 %v3376_v13, %v4591_v7  ;;  %v3384_v54 = vunpack.c.l.bf16 %v3482_v61 }
 0x346   : >> { %v1371_v39 = vsub.f32 %v3377_v12, %v4591_v7  ;;  %vm1470_vm0 = vcmp.lt.s32.totalorder %v1452_v35, %v4595_v11  ;;  %3131 = vmatmul.msk.bf16.vlgmr.msra.gmra.mxu2 %vm5482_vm14, %v1536_v33  ;;  %vm1471_vm10 = vcmp.lt.s32.totalorder %v1453_v14, %v4595_v11  ;;  %v3385_v26 = vunpack.c.h.bf16 %v3482_v61 }
 0x347   : >> { %vm1413_vm4 = vcmp.ge.f32.partialorder %v1397_v63, 0.0  ;;  %vm1414_vm6 = vcmp.ge.f32.partialorder %v1398_v17, 0.0  ;;  %v1429_v62 = vmul.f32 0.01, %v1397_v63  ;;  %v1430_v4 = vmul.f32 0.01, %v1398_v17 }
 0x348   : >> { %v1387_v60 = vmul.f32 %v4633_v2, %v1370_v21  ;;  %v1388_v5 = vmul.f32 %v4633_v2, %v1371_v39  ;;  %v3097_v6 = vsel %vm1470_vm0, 1.0, %v5479_v19  ;;  %v3098_v52 = vsel %vm1471_vm10, 1.0, %v5479_v19  ;;  %vm5483_vm0 = vmmov %vm5482_vm14 }
 0x349   : >> { %v1445_v10 = vsel %vm1413_vm4, %v1397_v63, %v1429_v62  ;;  %v1446_v20 = vsel %vm1414_vm6, %v1398_v17, %v1430_v4  ;;  %v1374_v58 = vsub.f32 %v3384_v54, %v4591_v7  ;;  %v1375_v22 = vsub.f32 %v3385_v26, %v4591_v7  ;;  %v3486_v62 = vld [vmem:[%s4625_s10 + $0x38] sm:$0xff]  }
 0x34a   : >> { %v1528_v34 = vmul.f32 %v3107_v25, %v1445_v10  ;;  %v1529_v23 = vmul.f32 %v3108_v56, %v1446_v20  ;;  %vm1403_vm3 = vcmp.ge.f32.partialorder %v1387_v60, 0.0  ;;  %vm1404_vm8 = vcmp.ge.f32.partialorder %v1388_v5, 0.0 }
 0x34b   : >> { %v1419_v3 = vmul.f32 0.01, %v1387_v60  ;;  %v1420_v24 = vmul.f32 0.01, %v1388_v5  ;;  %v1456_v0 = vadd.s32 %v4593_v9, %v3975_v49  ;;  %v1457_v44 = vadd.s32 %v4593_v9, %v3964_v47 }
 0x34c   : >> { %v1538_v18 = vpack.c.bf16 %v1529_v23, %v1528_v34  ;;  %v3392_v13 = vunpack.c.l.bf16 %v3484_v29  ;;  %v1391_v25 = vmul.f32 %v4633_v2, %v1374_v58  ;;  %v1392_v56 = vmul.f32 %v4633_v2, %v1375_v22 }
 0x34d   : >> { %v1435_v61 = vsel %vm1403_vm3, %v1387_v60, %v1419_v3  ;;  %v1436_v12 = vsel %vm1404_vm8, %v1388_v5, %v1420_v24  ;;  %vm1474_vm14 = vcmp.lt.s32.totalorder %v1456_v0, %v4595_v11  ;;  %vm1475_vm4 = vcmp.lt.s32.totalorder %v1457_v44, %v4595_v11  ;;  %vm5484_vm3 = vmmov %vm5483_vm0 }
 0x34e   : >> { %3133 = vmatmul.msk.bf16.vlgmr.msra.gmra.mxu3 %vm5483_vm0, %v1538_v18  ;;  %v1518_v35 = vmul.f32 %v3097_v6, %v1435_v61  ;;  %v1519_v33 = vmul.f32 %v3098_v52, %v1436_v12  ;;  %vm1407_vm6 = vcmp.ge.f32.partialorder %v1391_v25, 0.0  ;;  %vm1408_vm10 = vcmp.ge.f32.partialorder %v1392_v56, 0.0 }
 0x34f   : >> { %v1423_v63 = vmul.f32 0.01, %v1391_v25  ;;  %v1424_v17 = vmul.f32 0.01, %v1392_v56  ;;  %v3101_v21 = vsel %vm1474_vm14, 1.0, %v5479_v19  ;;  %v3102_v39 = vsel %vm1475_vm4, 1.0, %v5479_v19  ;;  %vm5485_vm4 = vmmov %vm5484_vm3 }
 0x350   : >> { %v1533_v14 = vpack.c.bf16 %v1519_v33, %v1518_v35  ;;  %v3393_v54 = vunpack.c.h.bf16 %v3484_v29  ;;  %v1378_v5 = vsub.f32 %v3392_v13, %v4591_v7  ;;  %v1460_v6 = vadd.s32 %v4593_v9, %v3953_v45 }
 0x351   : >> { %v1439_v4 = vsel %vm1407_vm6, %v1391_v25, %v1423_v63  ;;  %v1440_v60 = vsel %vm1408_vm10, %v1392_v56, %v1424_v17  ;;  %v1461_v26 = vadd.s32 %v4593_v9, %v3936_v43  ;;  %v3400_v29 = vunpack.c.l.bf16 %v3486_v62 }
 0x352   : >> { %3128 = vmatmul.msk.bf16.gmra.mxu0 %vm5484_vm3, %v1533_v14  ;;  %v1522_v10 = vmul.f32 %v3101_v21, %v1439_v4  ;;  %v1523_v20 = vmul.f32 %v3102_v39, %v1440_v60  ;;  %v1379_v52 = vsub.f32 %v3393_v54, %v4591_v7  ;;  %v1395_v34 = vmul.f32 %v4633_v2, %v1378_v5 }
 0x353   : >> { %vm1478_vm8 = vcmp.lt.s32.totalorder %v1460_v6, %v4595_v11  ;;  %v3401_v23 = vunpack.c.h.bf16 %v3486_v62  ;;  %vm1479_vm0 = vcmp.lt.s32.totalorder %v1461_v26, %v4595_v11  ;;  %v1382_v0 = vsub.f32 %v3400_v29, %v4591_v7 }
 0x354   : >> { %v1535_v3 = vpack.c.bf16 %v1523_v20, %v1522_v10  ;;  %v1396_v24 = vmul.f32 %v4633_v2, %v1379_v52  ;;  %v3105_v58 = vsel %vm1478_vm8, 1.0, %v5479_v19  ;;  %vm1411_vm14 = vcmp.ge.f32.partialorder %v1395_v34, 0.0 }
 0x355   : >> { %v1427_v22 = vmul.f32 0.01, %v1395_v34  ;;  %v3106_v18 = vsel %vm1479_vm0, 1.0, %v5479_v19  ;;  %v1383_v13 = vsub.f32 %v3401_v23, %v4591_v7  ;;  %v1464_v61 = vadd.s32 %v4593_v9, %v3927_v40 }
 0x356   : >> { %3130 = vmatmul.msk.bf16.gmra.mxu1 %vm5485_vm4, %v1535_v3  ;;  %vm1412_vm6 = vcmp.ge.f32.partialorder %v1396_v24, 0.0  ;;  %v1428_v44 = vmul.f32 0.01, %v1396_v24  ;;  %v1399_v25 = vmul.f32 %v4633_v2, %v1382_v0  ;;  %v1465_v56 = vadd.s32 %v4593_v9, %v3923_v38 }
 0x357   : >> { %v1443_v12 = vsel %vm1411_vm14, %v1395_v34, %v1427_v22  ;;  %v1400_v63 = vmul.f32 %v4633_v2, %v1383_v13  ;;  %vm1482_vm10 = vcmp.lt.s32.totalorder %v1464_v61, %v4595_v11  ;;  %vm5486_vm14 = vmmov %vm5485_vm4 }
 0x358   : >> { %v1444_v35 = vsel %vm1412_vm6, %v1396_v24, %v1428_v44  ;;  %v1526_v33 = vmul.f32 %v3105_v58, %v1443_v12  ;;  %vm1415_vm3 = vcmp.ge.f32.partialorder %v1399_v25, 0.0  ;;  %v1431_v14 = vmul.f32 0.01, %v1399_v25 }
 0x359   : >> { %v1527_v17 = vmul.f32 %v3106_v18, %v1444_v35  ;;  %vm1483_vm8 = vcmp.lt.s32.totalorder %v1465_v56, %v4595_v11  ;;  %vm1416_vm0 = vcmp.ge.f32.partialorder %v1400_v63, 0.0  ;;  %v1432_v7 = vmul.f32 0.01, %v1400_v63 }
 0x35a   : >> { %v3109_v21 = vsel %vm1482_vm10, 1.0, %v5479_v19  ;;  %v3110_v39 = vsel %vm1483_vm8, 1.0, %v5479_v19  ;;  %v1447_v9 = vsel %vm1415_vm3, %v1399_v25, %v1431_v14  ;;  %vm5487_vm6 = vcmask 519168  }
 0x35b   : >> { %v1537_v54 = vpack.c.bf16 %v1527_v17, %v1526_v33  ;;  %v1448_v62 = vsel %vm1416_vm0, %v1400_v63, %v1432_v7  ;;  %v1530_v4 = vmul.f32 %v3109_v21, %v1447_v9  ;;  %vm5488_vm10 = vmmov %vm5487_vm6 }
 0x35c   : >> { %v1531_v2 = vmul.f32 %v3110_v39, %v1448_v62  ;;  %vm5489_vm3 = vmmov %vm5487_vm6 }
 0x35d   : >> { %3132 = vmatmul.msk.bf16.gmra.mxu2 %vm5486_vm14, %v1537_v54  ;;  %vm5490_vm8 = vmmov %vm5489_vm3 }
 0x35e   : >> { %v1539_v60 = vpack.c.bf16 %v1531_v2, %v1530_v4  ;;  %vm5491_vm0 = vmmov %vm5489_vm3 }
 0x35f   : >> { %vm5492_vm14 = vmmov %vm5485_vm4 }
 0x360   : >> { %3134 = vmatmul.msk.bf16.gmra.mxu3 %vm5485_vm4, %v1539_v60  ;;  %vm5493_vm4 = vmmov %vm5491_vm0 }
 0x361   : >> { %vm5500_vm13 = vmmov %vm5491_vm0 }
 0x3bf   : >> { %v1605_v5 = vpop.f32.mrf.mxu0 }
 0x3c0   : >> { %v1645_v6 = vpack.c.bf16 %v1605_v5, %v1605_v5  ;;  %v1615_v10 = vpop.f32.mrf.mxu1  ;;  %v1718_v18 = vmul.f32 %v1605_v5, %v1605_v5 }
 0x3c1   : >> { %v1649_v20 = vpack.c.bf16 %v1615_v10, %v1615_v10  ;;  %v1722_v9 = vmul.f32 %v1615_v10, %v1615_v10 }
 0x3c2   : >> { %1664 = vst.msk [vmem:[%s4741_s13] sm:$0xf] %vm5487_vm6, %v1645_v6  ;;  %vm5494_vm6 = vmmov %vm5492_vm14 }
 0x3c3   : >> { %1668 = vst.msk [vmem:[%s4741_s13 + $0x10] sm:$0xf] %vm5488_vm10, %v1649_v20  ;;  %v1680_v56 = vsel %vm5494_vm6, %v1605_v5, 0.0  ;;  %vm5495_vm10 = vmmov %vm5494_vm6 }
 0x3c7   : >> { %v1607_v19 = vpop.f32.mrf.mxu0 }
 0x3c8   : >> { %v1646_v52 = vpack.c.bf16 %v1607_v19, %v1607_v19  ;;  %v1617_v26 = vpop.f32.mrf.mxu1  ;;  %v1719_v24 = vmul.f32 %v1607_v19, %v1607_v19  ;;  %v1681_v0 = vsel %vm5492_vm14, %v1607_v19, 0.0 }
 0x3c9   : >> { %v1650_v34 = vpack.c.bf16 %v1617_v26, %v1617_v26  ;;  %v4749_v29 = vpop.f32.mrf.mxu2  ;;  %v1682_v17 = vadd.f32 %v1681_v0, %v1680_v56  ;;  %v1723_v19 = vmul.f32 %v1617_v26, %v1617_v26 }
 0x3ca   : >> { %1665 = vst.msk [vmem:[%s4741_s13 + $0x4] sm:$0xf] %vm5489_vm3, %v1646_v52  ;;  %v1653_v23 = vpack.c.bf16 %v4749_v29, %v4749_v29  ;;  %v1735_v35 = vsel %vm5495_vm10, %v1719_v24, 0.0  ;;  %vm5496_vm3 = vmmov %vm5494_vm6 }
 0x3cb   : >> { %1669 = vst.msk [vmem:[%s4741_s13 + $0x14] sm:$0xf] %vm5490_vm8, %v1650_v34  ;;  %vm5497_vm8 = vmmov %vm5491_vm0 }
 0x3cc   : >> { %1672 = vst.msk [vmem:[%s4741_s13 + $0x20] sm:$0xf] %vm5491_vm0, %v1653_v23  ;;  %vm5498_vm14 = vmmov %vm5496_vm3 }
 0x3cd   : >> { %v1734_v14 = vsel %vm5498_vm14, %v1718_v18, 0.0  ;;  %vm5501_vm6 = vmmov %vm5496_vm3 }
 0x3ce   : >> { %v1736_v21 = vadd.f32 %v1735_v35, %v1734_v14  ;;  %vm5502_vm10 = vmmov %vm5496_vm3 }
 0x3cf   : >> { %v1610_v3 = vpop.f32.mrf.mxu0  ;;  %v1687_v20 = vsel %vm5502_vm10, %v1615_v10, 0.0 }
 0x3d0   : >> { %v1647_v58 = vpack.c.bf16 %v1610_v3, %v1610_v3  ;;  %v1720_v44 = vmul.f32 %v1610_v3, %v1610_v3  ;;  %v1683_v33 = vsel %vm5496_vm3, %v1610_v3, 0.0 }
 0x3d1   : >> { %v4757_v22 = vpop.f32.mrf.mxu3  ;;  %v1627_v13 = vpop.f32.mrf.mxu2  ;;  %v1684_v39 = vadd.f32 %v1683_v33, %v1682_v17  ;;  %v1726_v17 = vmul.f32 %v4749_v29, %v4749_v29 }
 0x3d2   : >> { %1666 = vst.msk [vmem:[%s4741_s13 + $0x8] sm:$0xf] %vm5493_vm4, %v1647_v58  ;;  %v1657_v61 = vpack.c.bf16 %v4757_v22, %v4757_v22  ;;  %v1654_v25 = vpack.c.bf16 %v1627_v13, %v1627_v13  ;;  %vm5499_vm4 = vmmov %vm5496_vm3 }
 0x3d3   : >> { %v1620_v12 = vpop.f32.mrf.mxu1  ;;  %v1737_v7 = vsel %vm5499_vm4, %v1720_v44, 0.0  ;;  %vm5503_vm3 = vmmov %vm5491_vm0 }
 0x3d4   : >> { %v1651_v63 = vpack.c.bf16 %v1620_v12, %v1620_v12  ;;  %1676 = vst.msk [vmem:[%s4741_s13 + $0x30] sm:$0xf] %vm5497_vm8, %v1657_v61  ;;  %v1738_v60 = vadd.f32 %v1737_v7, %v1736_v21  ;;  %vm5505_vm8 = vmmov %vm5499_vm4  ;;  %v1724_v0 = vmul.f32 %v1620_v12, %v1620_v12 }
 0x3d5   : >> { %1673 = vst.msk [vmem:[%s4741_s13 + $0x24] sm:$0xf] %vm5491_vm0, %v1654_v25  ;;  %v1741_v58 = vsel %vm5505_vm8, %v1722_v9, 0.0  ;;  %vm5506_vm0 = vmmov %vm5499_vm4  ;;  %v1727_v9 = vmul.f32 %v1627_v13, %v1627_v13 }
 0x3d6   : >> { %1670 = vst.msk [vmem:[%s4741_s13 + $0x18] sm:$0xf] %vm5500_vm13, %v1651_v63  ;;  %vm5504_vm13 = vmmov %vm5499_vm4  ;;  %v1689_v18 = vsel %vm5506_vm0, %v1617_v26, 0.0 }
 0x3d7   : >> { %v1612_v54 = vpop.f32.mrf.mxu0  ;;  %vm5507_vm14 = vmmov %vm5503_vm3 }
 0x3d8   : >> { %v1648_v62 = vpack.c.bf16 %v1612_v54, %v1612_v54  ;;  %v1685_v4 = vsel %vm5501_vm6, %v1612_v54, 0.0  ;;  %v1721_v2 = vmul.f32 %v1612_v54, %v1612_v54  ;;  %vm5508_vm4 = vmmov %vm5506_vm0 }
 0x3d9   : >> { %v1686_v5 = vadd.f32 %v1685_v4, %v1684_v39  ;;  %v4776_v6 = vpop.f32.mrf.mxu3  ;;  %v1743_v25 = vsel %vm5508_vm4, %v1723_v19, 0.0  ;;  %vm5509_vm6 = vmmov %vm5506_vm0 }
 0x3da   : >> { %1667 = vst.msk [vmem:[%s4741_s13 + $0xc] sm:$0xf] %vm5503_vm3, %v1648_v62  ;;  %v1739_v52 = vsel %vm5504_vm13, %v1721_v2, 0.0  ;;  %v1658_v34 = vpack.c.bf16 %v4776_v6, %v4776_v6  ;;  %v1691_v56 = vsel %vm5509_vm6, %v1620_v12, 0.0  ;;  %vm5510_vm10 = vmmov %vm5503_vm3 }
 0x3db   : >> { %v1688_v23 = vadd.f32 %v1687_v20, %v1686_v5  ;;  %v1740_v3 = vadd.f32 %v1739_v52, %v1738_v60  ;;  %v1622_v24 = vpop.f32.mrf.mxu1  ;;  %vm5511_vm3 = vmmov %vm5506_vm0 }
 0x3dc   : >> { %v1652_v44 = vpack.c.bf16 %v1622_v24, %v1622_v24  ;;  %1677 = vst.msk [vmem:[%s4741_s13 + $0x34] sm:$0xf] %vm5507_vm14, %v1658_v34  ;;  %v1725_v35 = vmul.f32 %v1622_v24, %v1622_v24  ;;  %v1745_v26 = vsel %vm5511_vm3, %v1724_v0, 0.0  ;;  %vm5512_vm13 = vmmov %vm5506_vm0 }
 0x3dd   : >> { %v1742_v10 = vadd.f32 %v1741_v58, %v1740_v3  ;;  %v1690_v61 = vadd.f32 %v1689_v18, %v1688_v23  ;;  %v1693_v14 = vsel %vm5512_vm13, %v1622_v24, 0.0  ;;  %vm5513_vm8 = vmmov %vm5506_vm0  ;;  %v1730_v18 = vmul.f32 %v4757_v22, %v4757_v22 }
 0x3de   : >> { %1671 = vst.msk [vmem:[%s4741_s13 + $0x1c] sm:$0xf] %vm5510_vm10, %v1652_v44  ;;  %v1695_v12 = vsel %vm5513_vm8, %v4749_v29, 0.0  ;;  %v1747_v62 = vsel %vm5506_vm0, %v1725_v35, 0.0  ;;  %vm5514_vm14 = vmmov %vm5510_vm10 }
 0x3df   : >> { %v1692_v33 = vadd.f32 %v1691_v56, %v1690_v61  ;;  %v1744_v63 = vadd.f32 %v1743_v25, %v1742_v10  ;;  %vm5515_vm4 = vmmov %vm5506_vm0 }
 0x3e0   : >> { %v1630_v7 = vpop.f32.mrf.mxu2  ;;  %v1749_v60 = vsel %vm5515_vm4, %v1726_v17, 0.0  ;;  %vm5516_vm6 = vmmov %vm5506_vm0 }
 0x3e1   : >> { %v1694_v21 = vadd.f32 %v1693_v14, %v1692_v33  ;;  %v1746_v39 = vadd.f32 %v1745_v26, %v1744_v63  ;;  %v1655_v54 = vpack.c.bf16 %v1630_v7, %v1630_v7  ;;  %v1697_v5 = vsel %vm5516_vm6, %v1627_v13, 0.0  ;;  %vm5517_vm10 = vmmov %vm5506_vm0 }
 0x3e2   : >> { %v1728_v20 = vmul.f32 %v1630_v7, %v1630_v7  ;;  %v1751_v29 = vsel %vm5517_vm10, %v1727_v9, 0.0  ;;  %vm5518_vm3 = vmmov %vm5506_vm0  ;;  %v1731_v33 = vmul.f32 %v4776_v6, %v4776_v6 }
 0x3e3   : >> { %v1696_v4 = vadd.f32 %v1695_v12, %v1694_v21  ;;  %v1748_v2 = vadd.f32 %v1747_v62, %v1746_v39  ;;  %1674 = vst.msk [vmem:[%s4741_s13 + $0x28] sm:$0xf] %vm5514_vm14, %v1655_v54  ;;  %v1640_v19 = vpop.f32.mrf.mxu3  ;;  %v1699_v3 = vsel %vm5518_vm3, %v1630_v7, 0.0  ;;  %vm5519_vm13 = vmmov %vm5514_vm14 }
 0x3e4   : >> { %v1659_v23 = vpack.c.bf16 %v1640_v19, %v1640_v19  ;;  %vm5520_vm8 = vmmov %vm5506_vm0  ;;  %v1732_v39 = vmul.f32 %v1640_v19, %v1640_v19 }
 0x3e5   : >> { %v1750_v52 = vadd.f32 %v1749_v60, %v1748_v2  ;;  %v1698_v34 = vadd.f32 %v1697_v5, %v1696_v4  ;;  %v1753_v0 = vsel %vm5520_vm8, %v1728_v20, 0.0  ;;  %vm5521_vm14 = vmmov %vm5506_vm0 }
 0x3e6   : >> { %1678 = vst.msk [vmem:[%s4741_s13 + $0x38] sm:$0xf] %vm5519_vm13, %v1659_v23  ;;  %v1703_v35 = vsel %vm5521_vm14, %v4757_v22, 0.0  ;;  %vm5522_vm4 = vmmov %vm5519_vm13 }
 0x3e7   : >> { %v1700_v24 = vadd.f32 %v1699_v3, %v1698_v34  ;;  %v1752_v58 = vadd.f32 %v1751_v29, %v1750_v52  ;;  %vm5523_vm6 = vmmov %vm5506_vm0 }
 0x3e8   : >> { %v1632_v13 = vpop.f32.mrf.mxu2  ;;  %vm5524_vm10 = vmmov %vm5506_vm0 }
 0x3e9   : >> { %v1754_v44 = vadd.f32 %v1753_v0, %v1752_v58  ;;  %v1656_v10 = vpack.c.bf16 %v1632_v13, %v1632_v13  ;;  %v1701_v61 = vsel %vm5506_vm0, %v1632_v13, 0.0  ;;  %v1729_v25 = vmul.f32 %v1632_v13, %v1632_v13  ;;  %vm5525_vm3 = vmmov %vm5506_vm0 }
 0x3ea   : >> { %v1702_v56 = vadd.f32 %v1701_v61, %v1700_v24  ;;  %v1757_v7 = vsel %vm5524_vm10, %v1730_v18, 0.0  ;;  %v1705_v21 = vsel %vm5525_vm3, %v4776_v6, 0.0  ;;  %vm5526_vm13 = vmmov %vm5506_vm0 }
 0x3eb   : >> { %1675 = vst.msk [vmem:[%s4741_s13 + $0x2c] sm:$0xf] %vm5522_vm4, %v1656_v10  ;;  %v1755_v63 = vsel %vm5523_vm6, %v1729_v25, 0.0  ;;  %v1642_v14 = vpop.f32.mrf.mxu3  ;;  %v1759_v22 = vsel %vm5526_vm13, %v1731_v33, 0.0  ;;  %vm5527_vm8 = vmmov %vm5506_vm0  ;;  %v5534_v33 = vmov (%p1324_p7), 1.0  }
 0x3ec   : >> { %v1704_v17 = vadd.f32 %v1703_v35, %v1702_v56  ;;  %v1756_v26 = vadd.f32 %v1755_v63, %v1754_v44  ;;  %v1660_v54 = vpack.c.bf16 %v1642_v14, %v1642_v14  ;;  %v1707_v62 = vsel %vm5527_vm8, %v1640_v19, 0.0  ;;  %vm5528_vm0 = vmmov %vm5522_vm4  ;;  %3136 = vmatpush.msk.msra.mxu0 (%p1324_p7), %vm4430_vm1, %v5534_v33  ;;  %3145 = vmatpush.msk.msra.mxu1 (%p1324_p7), %vm4430_vm1, %v5534_v33 }
 0x3ed   : >> { %v1733_v4 = vmul.f32 %v1642_v14, %v1642_v14  ;;  %vm5529_vm14 = vmmov %vm5525_vm3  ;;  %vm5535_vm1 = vcmask (%p1324_p7), 523264  }
 0x3ee   : >> { %v1758_v12 = vadd.f32 %v1757_v7, %v1756_v26  ;;  %v1706_v9 = vadd.f32 %v1705_v21, %v1704_v17  ;;  %1679 = vst.msk [vmem:[%s4741_s13 + $0x3c] sm:$0xf] %vm5528_vm0, %v1660_v54  ;;  %v1761_v5 = vsel %vm5529_vm14, %v1732_v39, 0.0  ;;  %vm5530_vm4 = vmmov %vm5525_vm3  ;;  %3137 = vmatpush.msk.msra.mxu0 (%p1324_p7), %vm4447_vm5, %v5534_v33  ;;  %3146 = vmatpush.msk.msra.mxu1 (%p1324_p7), %vm4447_vm5, %v5534_v33  ;;  %v4907_v39 = vmov (%p1324_p7), 0.0  }
 0x3ef   : >> { %v1709_v20 = vsel %vm5530_vm4, %v1642_v14, 0.0  ;;  %vm5531_vm6 = vmmov %vm5525_vm3  ;;  %v4909_v54 = vmov (%p1324_p7), 0.0  }
 0x3f0   : >> { %v1708_v2 = vadd.f32 %v1707_v62, %v1706_v9  ;;  %v1760_v60 = vadd.f32 %v1759_v22, %v1758_v12  ;;  %v1763_v6 = vsel %vm5531_vm6, %v1733_v4, 0.0  ;;  %3138 = vmatpush.msk.msra.mxu0 (%p1324_p7), %vm4463_vm2, %v5534_v33  ;;  %3147 = vmatpush.msk.msra.mxu1 (%p1324_p7), %vm4463_vm2, %v5534_v33  ;;  %vm5536_vm5 = vmmov (%p1324_p7), %vm5535_vm1 }
 0x3f2   : >> { %v1762_v52 = vadd.f32 %v1761_v5, %v1760_v60  ;;  %v1710_v34 = vadd.f32 %v1709_v20, %v1708_v2  ;;  %3139 = vmatpush.msk.msra.mxu0 (%p1324_p7), %vm4478_vm11, %v5534_v33  ;;  %3148 = vmatpush.msk.msra.mxu1 (%p1324_p7), %vm4478_vm11, %v5534_v33 }
 0x3f4   : >> { %v1711_v23 = vrot.slane %v1710_v34, 4  ;;  %v1764_v29 = vadd.f32 %v1763_v6, %v1762_v52  ;;  %3140 = vmatpush.msk.msra.mxu0 (%p1324_p7), %vm4488_vm12, %v5534_v33  ;;  %3149 = vmatpush.msk.msra.mxu1 (%p1324_p7), %vm4488_vm12, %v5534_v33 }
 0x3f6   : >> { %v1712_v3 = vadd.f32 %v1711_v23, %v1710_v34  ;;  %v1765_v24 = vrot.slane %v1764_v29, 4  ;;  %3141 = vmatpush.msk.msra.mxu0 (%p1324_p7), %vm4499_vm7, %v5534_v33  ;;  %3150 = vmatpush.msk.msra.mxu1 (%p1324_p7), %vm4499_vm7, %v5534_v33 }
 0x3f8   : >> { %v1713_v58 = vrot.slane %v1712_v3, 2  ;;  %v1766_v18 = vadd.f32 %v1765_v24, %v1764_v29  ;;  %3142 = vmatpush.msk.msra.mxu0 (%p1324_p7), %vm4514_vm9, %v5534_v33  ;;  %3151 = vmatpush.msk.msra.mxu1 (%p1324_p7), %vm4514_vm9, %v5534_v33 }
 0x3fa   : >> { %v1714_v19 = vadd.f32 %v1713_v58, %v1712_v3  ;;  %v1767_v0 = vrot.slane %v1766_v18, 2  ;;  %3143 = vmatpush.msk.msra.mxu0 (%p1324_p7), %vm4527_vm15, %v5534_v33  ;;  %3152 = vmatpush.msk.msra.mxu1 (%p1324_p7), %vm4527_vm15, %v5534_v33 }
 0x3fc   : >> { %v1715_v13 = vrot.slane %v1714_v19, 1  ;;  %v1768_v44 = vadd.f32 %v1767_v0, %v1766_v18 }
 0x3fe   : >> { %v1716_v10 = vadd.f32 %v1715_v13, %v1714_v19  ;;  %v1769_v61 = vrot.slane %v1768_v44, 1 }
 0x400   : >> { %v1717_v25 = vadd.f32 %v3779_v50, %v1716_v10   ;;  %v1770_v56 = vadd.f32 %v1769_v61, %v1768_v44  ;;  %1326 = sbr.rel (!%p1324_p7) target bundleno = 814 (0x32e), region = 131 }
 0x402   : >> { %v1771_v35 = vadd.f32 %v3775_v1, %v1770_v56   ;;  %v5533_v50 = vmov %v1717_v25  ;;  %3144 = vmatmul.msk.f32.vlgmr.msra.gmra.mxu0 (%p1324_p7), %vm5535_vm1, %v1717_v25 }
 0x404   : >> { %v5532_v1 = vmov %v1771_v35  ;;  %3153 = vmatmul.msk.f32.vlgmr.msra.gmra.mxu1 (%p1324_p7), %vm5536_vm5, %v1771_v35 }
 0x47f   : > { %v1792_v8 = vpop.f32.mrf.mxu0 }
 0x480   : > { %v4887_v27 = vmul.f32 0.0033333334, %v1792_v8 }
 0x481   : > { %v1815_v15 = vpop.f32.mrf.mxu1 }
 0x482   : > { %v1819_v31 = vmul.f32 0.0033333334, %v1815_v15  ;;  %v1820_v28 = vmul.f32 %v4887_v27, %v4887_v27 }
 0x484   : > { %v1821_v30 = vsub.f32 %v1819_v31, %v1820_v28 }
 0x486   : > { %v1822_v16 = vmax.f32 %v1821_v30, 0.0 }
 0x488   : > { %v1823_v1 = vadd.f32 1e-05, %v1822_v16 }
 0x48a   : > { %3677 = vrsqrt.f32 %v1823_v1  ;;  %vm1830_vm11 = vweird.f32 %v1823_v1 }
 0x490   : > { %v4891_v50 = vpop.eup %3677 }
 0x491   : > { %v1825_v32 = vmul.f32 %v4891_v50, %v1823_v1  ;;  %vm1831_vm2 = vweird.f32 %v4891_v50 }
 0x492   : > { %vm4899_vm12 = vmor %vm1830_vm11, %vm1831_vm2 }
 0x493   : > { %v1826_v63 = vmul.f32 %v4891_v50, %v1825_v32 }
 0x495   : > { %v1827_v17 = vmul.f32 0.5, %v1826_v63 }
 0x497   : > { %v1828_v26 = vsub.f32 1.5, %v1827_v17 }
 0x499   : > { %v4897_v14 = vmul.f32 %v4891_v50, %v1828_v26 }
 0x49b   : > { %v1833_v21 = vsel %vm4899_vm12, %v4891_v50, %v4897_v14 }
 0x49c LB: >> { %v3295_v12 = vld [vmem:[%s5427_s4 + $0x18] sm:$0xff]  ;;  %v3294_v9 = vld [vmem:[%s5427_s4 + $0x10] sm:$0xff]  ;;  %s3154_s19 = sshll.u32 %s3795_s14, 7  ;;  %v4932_v22 = vperm.slane %v4887_v27, 0  ;;  %v3293_v20 = vld [vmem:[%s5427_s4 + $0x8] sm:$0xff]  ;;  %v4972_v3 = vperm.slane %v1833_v21, 0  ;;  %s3795_s14 = sphi %s4911_s14, %s1839_s14   ;;  %v3791_v54 = vphi %v4909_v54, %v5547_v54   ;;  %v3787_v39 = vphi %v4907_v39, %v5546_v39  }
 0x49d   : >> { %2112 = vmatpush.bf16.msra.mxu0 %v3295_v12  ;;  %3549 = vmatpush.bf16.msra.mxu1 %v3295_v12  ;;  %s4929_s21 = sshra.s32 %s3154_s19, 3  ;;  %v4934_v62 = vstv %s3154_s19  ;;  %v3807_v0 = vmov 0.0   ;;  %v3292_v15 = vld [vmem:[%s5427_s4] sm:$0xff]  ;;  %vm5539_vm2 = vcmask 523264   ;;  %s1839_s14 = sadd.s32 1, %s3795_s14  }
 0x49e   : >> { %3550 = vmatpush.bf16.msra.mxu2 %v3295_v12  ;;  %3551 = vmatpush.bf16.msra.mxu3 %v3295_v12  ;;  %s3155_s20 = sshll.u32 %s4929_s21, 2  ;;  %v1962_v4 = vadd.s32 %v4934_v62, %v3918_v36  ;;  %v1963_v2 = vadd.s32 %v4934_v62, %v4023_v59  ;;  %v1966_v60 = vadd.s32 %v4934_v62, %v3993_v53  ;;  %p1836_p8 = scmp.ge.s32.totalorder %s1839_s14, 2  }
 0x49f   : >> { %v1967_v5 = vadd.s32 %v4934_v62, %v3984_v51  ;;  %v1970_v52 = vadd.s32 %v4934_v62, %v3972_v48  ;;  %v4952_v34 = vadd.s32 %v4934_v62, %v3961_v46  ;;  %v4956_v6 = vadd.s32 %v4934_v62, %v3933_v42  ;;  %s4964_s26 = scalar_lea.vmem [#allocation2], %s3155_s20  ;;  %s5080_s29 = scalar_lea.vmem [#allocation3], %s3155_s20  ;;  %v5216_v21 = vld [vmem:[%s5429_s6] sm:$0x1] (%p1836_p8) }
 0x4a0   : >> { %v4960_v23 = vadd.s32 %v4934_v62, %v3930_v41  ;;  %v3403_v29 = vld [vmem:[%s4964_s26] sm:$0xff]   ;;  %vm1980_vm7 = vcmp.lt.s32.totalorder %v1962_v4, %v4595_v11  ;;  %vm1981_vm9 = vcmp.lt.s32.totalorder %v1963_v2, %v4595_v11  ;;  %v3488_v24 = vld [vmem:[%s4964_s26 + $0x10] sm:$0xff]   ;;  %vm1984_vm15 = vcmp.lt.s32.totalorder %v1966_v60, %v4595_v11  ;;  %s5238_s9 = smov (%p1836_p8), 0  }
 0x4a1   : >> { %2113 = vmatpush.bf16.msra.mxu0 %v3294_v9  ;;  %3552 = vmatpush.bf16.msra.mxu1 %v3294_v9  ;;  %v3490_v58 = vld [vmem:[%s4964_s26 + $0x20] sm:$0xff]   ;;  %v3404_v18 = vunpack.c.l.bf16 %v3403_v29  ;;  %v3405_v19 = vunpack.c.h.bf16 %v3403_v29  ;;  %v3156_v13 = vsel %vm1980_vm7, 1.0, %v3807_v0  ;;  %v3157_v44 = vsel %vm1981_vm9, 1.0, %v3807_v0  ;;  %vm5540_vm7 = vmmov %vm5539_vm2 }
 0x4a2   : >> { %3553 = vmatpush.bf16.msra.mxu2 %v3294_v9  ;;  %3554 = vmatpush.bf16.msra.mxu3 %v3294_v9  ;;  %v3412_v10 = vunpack.c.l.bf16 %v3488_v24  ;;  %v3413_v61 = vunpack.c.h.bf16 %v3488_v24  ;;  %vm1985_vm10 = vcmp.lt.s32.totalorder %v1967_v5, %v4595_v11  ;;  %v3160_v25 = vsel %vm1984_vm15, 1.0, %v3807_v0  ;;  %vm5541_vm15 = vmmov %vm5539_vm2 }
 0x4a3   : >> { %v1880_v56 = vsub.f32 %v3404_v18, %v4932_v22  ;;  %v1881_v35 = vsub.f32 %v3405_v19, %v4932_v22  ;;  %v3161_v33 = vsel %vm1985_vm10, 1.0, %v3807_v0  ;;  %v3420_v8 = vunpack.c.l.bf16 %v3490_v58 }
 0x4a4   : >> { %v1884_v31 = vsub.f32 %v3412_v10, %v4932_v22  ;;  %v1885_v28 = vsub.f32 %v3413_v61, %v4932_v22  ;;  %v3421_v30 = vunpack.c.h.bf16 %v3490_v58  ;;  %vm1988_vm3 = vcmp.lt.s32.totalorder %v1970_v52, %v4595_v11  ;;  %v3492_v10 = vld [vmem:[%s4964_s26 + $0x30] sm:$0xff]  }
 0x4a5   : >> { %2114 = vmatpush.bf16.msra.mxu0 %v3293_v20  ;;  %3555 = vmatpush.bf16.msra.mxu1 %v3293_v20  ;;  %v1897_v16 = vmul.f32 %v4972_v3, %v1880_v56  ;;  %v1898_v1 = vmul.f32 %v4972_v3, %v1881_v35  ;;  %v1888_v32 = vsub.f32 %v3420_v8, %v4932_v22  ;;  %v3164_v12 = vsel %vm1988_vm3, 1.0, %v3807_v0 }
 0x4a6   : >> { %3556 = vmatpush.bf16.msra.mxu2 %v3293_v20  ;;  %vm1989_vm13 = vcmp.lt.s32.totalorder %v4952_v34, %v4595_v11  ;;  %v1901_v63 = vmul.f32 %v4972_v3, %v1884_v31  ;;  %v1902_v17 = vmul.f32 %v4972_v3, %v1885_v28  ;;  %v1889_v26 = vsub.f32 %v3421_v30, %v4932_v22 }
 0x4a7   : >> { %3557 = vmatpush.bf16.msra.mxu3 %v3293_v20  ;;  %vm1913_vm8 = vcmp.ge.f32.partialorder %v1897_v16, 0.0  ;;  %vm1914_vm0 = vcmp.ge.f32.partialorder %v1898_v1, 0.0  ;;  %v1929_v9 = vmul.f32 0.01, %v1897_v16  ;;  %v1930_v4 = vmul.f32 0.01, %v1898_v1 }
 0x4a8   : >> { %vm1917_vm14 = vcmp.ge.f32.partialorder %v1901_v63, 0.0  ;;  %vm1918_vm4 = vcmp.ge.f32.partialorder %v1902_v17, 0.0  ;;  %v1933_v2 = vmul.f32 0.01, %v1901_v63  ;;  %v1934_v60 = vmul.f32 0.01, %v1902_v17 }
 0x4a9   : >> { %2115 = vmatpush.bf16.msra.mxu0 %v3292_v15  ;;  %3558 = vmatpush.bf16.msra.mxu1 %v3292_v15  ;;  %v1945_v5 = vsel %vm1913_vm8, %v1897_v16, %v1929_v9  ;;  %v1946_v52 = vsel %vm1914_vm0, %v1898_v1, %v1930_v4  ;;  %v1905_v29 = vmul.f32 %v4972_v3, %v1888_v32  ;;  %v3165_v28 = vsel %vm1989_vm13, 1.0, %v3807_v0 }
 0x4aa   : >> { %3559 = vmatpush.bf16.msra.mxu2 %v3292_v15  ;;  %v1906_v24 = vmul.f32 %v4972_v3, %v1889_v26  ;;  %v2028_v58 = vmul.f32 %v3156_v13, %v1945_v5  ;;  %v2029_v20 = vmul.f32 %v3157_v44, %v1946_v52  ;;  %v1949_v18 = vsel %vm1917_vm14, %v1901_v63, %v1933_v2  ;;  %vm5542_vm14 = vmmov %vm5539_vm2 }
 0x4ab   : >> { %v1950_v19 = vsel %vm1918_vm4, %v1902_v17, %v1934_v60  ;;  %3560 = vmatpush.bf16.msra.mxu3 %v3292_v15  ;;  %v2032_v61 = vmul.f32 %v3160_v25, %v1949_v18  ;;  %vm1921_vm6 = vcmp.ge.f32.partialorder %v1905_v29, 0.0  ;;  %v1937_v8 = vmul.f32 0.01, %v1905_v29  ;;  %v3487_v15 = vld [vmem:[%s4964_s26 + $0x8] sm:$0xff]   ;;  %v3489_v17 = vld [vmem:[%s4964_s26 + $0x18] sm:$0xff]  }
 0x4ac   : >> { %v2033_v56 = vmul.f32 %v3161_v33, %v1950_v19  ;;  %vm1922_vm1 = vcmp.ge.f32.partialorder %v1906_v24, 0.0  ;;  %v2044_v35 = vpack.c.bf16 %v2029_v20, %v2028_v58  ;;  %v1938_v31 = vmul.f32 0.01, %v1906_v24 }
 0x4ad   : >> { %v3428_v44 = vunpack.c.l.bf16 %v3492_v10  ;;  %v3429_v30 = vunpack.c.h.bf16 %v3492_v10  ;;  %vm1992_vm5 = vcmp.lt.s32.totalorder %v4956_v6, %v4595_v11  ;;  %v1953_v25 = vsel %vm1921_vm6, %v1905_v29, %v1937_v8  ;;  %v3491_v8 = vld [vmem:[%s4964_s26 + $0x28] sm:$0xff]  }
 0x4ae   : >> { %v2046_v13 = vpack.c.bf16 %v2033_v56, %v2032_v61  ;;  %3188 = vmatmul.msk.bf16.vlgmr.msra.gmra.mxu0 %vm5539_vm2, %v2044_v35  ;;  %v1954_v33 = vsel %vm1922_vm1, %v1906_v24, %v1938_v31  ;;  %vm1993_vm11 = vcmp.lt.s32.totalorder %v4960_v23, %v4595_v11  ;;  %v3168_v16 = vsel %vm1992_vm5, 1.0, %v3807_v0 }
 0x4af   : >> { %v2036_v34 = vmul.f32 %v3164_v12, %v1953_v25  ;;  %v2037_v1 = vmul.f32 %v3165_v28, %v1954_v33  ;;  %v1892_v32 = vsub.f32 %v3428_v44, %v4932_v22  ;;  %v1893_v63 = vsub.f32 %v3429_v30, %v4932_v22 }
 0x4b0   : >> { %3190 = vmatmul.msk.bf16.vlgmr.msra.gmra.mxu1 %vm5540_vm7, %v2046_v13  ;;  %v3169_v6 = vsel %vm1993_vm11, 1.0, %v3807_v0  ;;  %v3408_v26 = vunpack.c.l.bf16 %v3487_v15  ;;  %v3409_v9 = vunpack.c.h.bf16 %v3487_v15  ;;  %v1964_v4 = vadd.s32 %v4934_v62, %v4011_v57 }
 0x4b1   : >> { %v2048_v2 = vpack.c.bf16 %v2037_v1, %v2036_v34  ;;  %v1909_v23 = vmul.f32 %v4972_v3, %v1892_v32  ;;  %v1910_v60 = vmul.f32 %v4972_v3, %v1893_v63  ;;  %v1965_v12 = vadd.s32 %v4934_v62, %v4002_v55 }
 0x4b2   : >> { %v1882_v5 = vsub.f32 %v3408_v26, %v4932_v22  ;;  %v1883_v52 = vsub.f32 %v3409_v9, %v4932_v22  ;;  %vm1982_vm9 = vcmp.lt.s32.totalorder %v1964_v4, %v4595_v11  ;;  %v3416_v29 = vunpack.c.l.bf16 %v3489_v17 }
 0x4b3   : >> { %3192 = vmatmul.msk.bf16.vlgmr.msra.gmra.mxu2 %vm5541_vm15, %v2048_v2  ;;  %vm1925_vm10 = vcmp.ge.f32.partialorder %v1909_v23, 0.0  ;;  %vm1926_vm3 = vcmp.ge.f32.partialorder %v1910_v60, 0.0  ;;  %v1941_v24 = vmul.f32 0.01, %v1909_v23  ;;  %v1942_v58 = vmul.f32 0.01, %v1910_v60  ;;  %vm5543_vm15 = vmmov %vm5539_vm2 }
 0x4b4   : >> { %v1899_v20 = vmul.f32 %v4972_v3, %v1882_v5  ;;  %v1900_v18 = vmul.f32 %v4972_v3, %v1883_v52  ;;  %vm1983_vm13 = vcmp.lt.s32.totalorder %v1965_v12, %v4595_v11  ;;  %v3158_v19 = vsel %vm1982_vm9, 1.0, %v3807_v0  ;;  %v3493_v5 = vld [vmem:[%s4964_s26 + $0x38] sm:$0xff]  }
 0x4b5   : >> { %v1957_v10 = vsel %vm1925_vm10, %v1909_v23, %v1941_v24  ;;  %v1958_v61 = vsel %vm1926_vm3, %v1910_v60, %v1942_v58  ;;  %v3159_v56 = vsel %vm1983_vm13, 1.0, %v3807_v0  ;;  %v3417_v35 = vunpack.c.h.bf16 %v3489_v17 }
 0x4b6   : >> { %v2040_v31 = vmul.f32 %v3168_v16, %v1957_v10  ;;  %v2041_v28 = vmul.f32 %v3169_v6, %v1958_v61  ;;  %vm1915_vm8 = vcmp.ge.f32.partialorder %v1899_v20, 0.0  ;;  %vm1916_vm0 = vcmp.ge.f32.partialorder %v1900_v18, 0.0 }
 0x4b7   : >> { %v1931_v13 = vmul.f32 0.01, %v1899_v20  ;;  %v1932_v44 = vmul.f32 0.01, %v1900_v18  ;;  %v1886_v30 = vsub.f32 %v3416_v29, %v4932_v22  ;;  %v1887_v15 = vsub.f32 %v3417_v35, %v4932_v22 }
 0x4b8   : >> { %v2050_v25 = vpack.c.bf16 %v2041_v28, %v2040_v31  ;;  %v1968_v33 = vadd.s32 %v4934_v62, %v3975_v49  ;;  %v1969_v34 = vadd.s32 %v4934_v62, %v3964_v47  ;;  %v3424_v1 = vunpack.c.l.bf16 %v3491_v8 }
 0x4b9   : >> { %v1947_v32 = vsel %vm1915_vm8, %v1899_v20, %v1931_v13  ;;  %v1948_v63 = vsel %vm1916_vm0, %v1900_v18, %v1932_v44  ;;  %v1903_v16 = vmul.f32 %v4972_v3, %v1886_v30  ;;  %v1904_v17 = vmul.f32 %v4972_v3, %v1887_v15 }
 0x4ba   : >> { %3194 = vmatmul.msk.bf16.vlgmr.msra.gmra.mxu3 %vm5542_vm14, %v2050_v25  ;;  %v2030_v6 = vmul.f32 %v3158_v19, %v1947_v32  ;;  %v2031_v26 = vmul.f32 %v3159_v56, %v1948_v63  ;;  %vm1986_vm4 = vcmp.lt.s32.totalorder %v1968_v33, %v4595_v11  ;;  %vm1987_vm6 = vcmp.lt.s32.totalorder %v1969_v34, %v4595_v11  ;;  %vm5544_vm14 = vmmov %vm5539_vm2 }
 0x4bb   : >> { %vm1919_vm1 = vcmp.ge.f32.partialorder %v1903_v16, 0.0  ;;  %vm1920_vm5 = vcmp.ge.f32.partialorder %v1904_v17, 0.0  ;;  %v1935_v9 = vmul.f32 0.01, %v1903_v16  ;;  %v1936_v4 = vmul.f32 0.01, %v1904_v17 }
 0x4bc   : >> { %v2045_v2 = vpack.c.bf16 %v2031_v26, %v2030_v6  ;;  %v3162_v23 = vsel %vm1986_vm4, 1.0, %v3807_v0  ;;  %v3163_v60 = vsel %vm1987_vm6, 1.0, %v3807_v0  ;;  %v3425_v12 = vunpack.c.h.bf16 %v3491_v8  ;;  %vm5545_vm4 = vmmov %vm5539_vm2 }
 0x4bd   : >> { %v1951_v52 = vsel %vm1919_vm1, %v1903_v16, %v1935_v9  ;;  %v1952_v29 = vsel %vm1920_vm5, %v1904_v17, %v1936_v4  ;;  %v1890_v24 = vsub.f32 %v3424_v1, %v4932_v22  ;;  %v1972_v58 = vadd.s32 %v4934_v62, %v3953_v45 }
 0x4be   : >> { %3189 = vmatmul.msk.bf16.gmra.mxu0 %vm5539_vm2, %v2045_v2  ;;  %v2034_v20 = vmul.f32 %v3162_v23, %v1951_v52  ;;  %v2035_v18 = vmul.f32 %v3163_v60, %v1952_v29  ;;  %v1891_v19 = vsub.f32 %v3425_v12, %v4932_v22  ;;  %v1973_v10 = vadd.s32 %v4934_v62, %v3936_v43 }
 0x4bf   : >> { %v1907_v61 = vmul.f32 %v4972_v3, %v1890_v24  ;;  %vm1990_vm11 = vcmp.lt.s32.totalorder %v1972_v58, %v4595_v11  ;;  %v3432_v56 = vunpack.c.l.bf16 %v3493_v5  ;;  %v3433_v35 = vunpack.c.h.bf16 %v3493_v5 }
 0x4c0   : >> { %v2047_v8 = vpack.c.bf16 %v2035_v18, %v2034_v20  ;;  %v1908_v31 = vmul.f32 %v4972_v3, %v1891_v19  ;;  %vm1991_vm7 = vcmp.lt.s32.totalorder %v1973_v10, %v4595_v11  ;;  %v3166_v28 = vsel %vm1990_vm11, 1.0, %v3807_v0 }
 0x4c1   : >> { %vm1923_vm9 = vcmp.ge.f32.partialorder %v1907_v61, 0.0  ;;  %v1939_v13 = vmul.f32 0.01, %v1907_v61  ;;  %v3167_v44 = vsel %vm1991_vm7, 1.0, %v3807_v0  ;;  %v1894_v30 = vsub.f32 %v3432_v56, %v4932_v22 }
 0x4c2   : >> { %3191 = vmatmul.msk.bf16.gmra.mxu1 %vm5543_vm15, %v2047_v8  ;;  %vm1924_vm10 = vcmp.ge.f32.partialorder %v1908_v31, 0.0  ;;  %v1940_v15 = vmul.f32 0.01, %v1908_v31  ;;  %v1895_v25 = vsub.f32 %v3433_v35, %v4932_v22  ;;  %v1976_v33 = vadd.s32 %v4934_v62, %v3927_v40 }
 0x4c3   : >> { %v1955_v34 = vsel %vm1923_vm9, %v1907_v61, %v1939_v13  ;;  %v1911_v1 = vmul.f32 %v4972_v3, %v1894_v30  ;;  %v1977_v32 = vadd.s32 %v4934_v62, %v3923_v38  ;;  %vm2175_vm6 = vcmask 257024  }
 0x4c4   : >> { %v1956_v63 = vsel %vm1924_vm10, %v1908_v31, %v1940_v15  ;;  %v2038_v16 = vmul.f32 %v3166_v28, %v1955_v34  ;;  %v1912_v17 = vmul.f32 %v4972_v3, %v1895_v25  ;;  %vm1994_vm3 = vcmp.lt.s32.totalorder %v1976_v33, %v4595_v11 }
 0x4c5   : >> { %v2039_v6 = vmul.f32 %v3167_v44, %v1956_v63  ;;  %vm1927_vm13 = vcmp.ge.f32.partialorder %v1911_v1, 0.0  ;;  %v1943_v26 = vmul.f32 0.01, %v1911_v1  ;;  %vm1995_vm8 = vcmp.lt.s32.totalorder %v1977_v32, %v4595_v11 }
 0x4c6   : >> { %vm1928_vm0 = vcmp.ge.f32.partialorder %v1912_v17, 0.0  ;;  %v1944_v22 = vmul.f32 0.01, %v1912_v17  ;;  %v3170_v9 = vsel %vm1994_vm3, 1.0, %v3807_v0  ;;  %v3171_v4 = vsel %vm1995_vm8, 1.0, %v3807_v0 }
 0x4c7   : >> { %v2049_v2 = vpack.c.bf16 %v2039_v6, %v2038_v16  ;;  %v1959_v62 = vsel %vm1927_vm13, %v1911_v1, %v1943_v26  ;;  %vm2192_vm1 = vcmask 261120   ;;  %vm5548_vm7 = vcmp.eq.s32.totalorder (%p1836_p8), %v4002_v55, %v3920_v37 }
 0x4c8   : >> { %v1960_v23 = vsel %vm1928_vm0, %v1912_v17, %v1944_v22  ;;  %v2042_v60 = vmul.f32 %v3170_v9, %v1959_v62  ;;  %v5549_v11 = vmov (%p1836_p8), 1.0   ;;  %vm5550_vm3 = vcmp.eq.s32.totalorder (%p1836_p8), %v4011_v57, %v3920_v37 }
 0x4c9   : >> { %3193 = vmatmul.msk.bf16.gmra.mxu2 %vm5544_vm14, %v2049_v2  ;;  %v2043_v3 = vmul.f32 %v3171_v4, %v1960_v23  ;;  %vm2297_vm8 = vcmp.eq.s32.totalorder (%p1836_p8), %v3920_v37, %v4011_v57  ;;  %vm5551_vm14 = vcmp.eq.s32.totalorder (%p1836_p8), %v4023_v59, %v3920_v37  ;;  %v3808_v27 = vmov (%p1836_p8), 0  }
 0x4ca   : > { %v3809_v14 = vmov (%p1836_p8), 0.0  }
 0x4cb   : >> { %v2051_v12 = vpack.c.bf16 %v2043_v3, %v2042_v60 }
 0x4cd   : >> { %3195 = vmatmul.msk.bf16.gmra.mxu3 %vm5545_vm4, %v2051_v12 }
 0x52b   : >> { %v2117_v5 = vpop.f32.mrf.mxu0 }
 0x52c   : >> { %v2157_v52 = vpack.c.bf16 %v2117_v5, %v2117_v5  ;;  %v2231_v31 = vmul.f32 %v2117_v5, %v2117_v5  ;;  %v2193_v33 = vsel %vm2192_vm1, %v2117_v5, 0.0 }
 0x52d   : >> { %v2127_v29 = vpop.f32.mrf.mxu1 }
 0x52e   : >> { %v2161_v24 = vpack.c.bf16 %v2127_v29, %v2127_v29  ;;  %2176 = vst.msk [vmem:[%s5080_s29] sm:$0xf] %vm2175_vm6, %v2157_v52  ;;  %v2247_v16 = vsel %vm2192_vm1, %v2231_v31, 0.0  ;;  %v2235_v9 = vmul.f32 %v2127_v29, %v2127_v29  ;;  %v2200_v12 = vsel %vm2192_vm1, %v2127_v29, 0.0 }
 0x530   : >> { %2180 = vst.msk [vmem:[%s5080_s29 + $0x10] sm:$0xf] %vm2175_vm6, %v2161_v24 }
 0x533   : >> { %v2119_v0 = vpop.f32.mrf.mxu0 }
 0x534   : >> { %v2158_v58 = vpack.c.bf16 %v2119_v0, %v2119_v0  ;;  %v2232_v56 = vmul.f32 %v2119_v0, %v2119_v0  ;;  %v2194_v28 = vsel %vm2192_vm1, %v2119_v0, 0.0 }
 0x535   : >> { %v2129_v20 = vpop.f32.mrf.mxu1  ;;  %v2195_v63 = vadd.f32 %v2194_v28, %v2193_v33 }
 0x536   : >> { %v2162_v18 = vpack.c.bf16 %v2129_v20, %v2129_v20  ;;  %2177 = vst.msk [vmem:[%s5080_s29 + $0x4] sm:$0xf] %vm2175_vm6, %v2158_v58  ;;  %v5088_v19 = vpop.f32.mrf.mxu2  ;;  %v2248_v34 = vsel %vm2192_vm1, %v2232_v56, 0.0  ;;  %v2236_v5 = vmul.f32 %v2129_v20, %v2129_v20 }
 0x537   : >> { %v2165_v10 = vpack.c.bf16 %v5088_v19, %v5088_v19  ;;  %v2249_v6 = vadd.f32 %v2248_v34, %v2247_v16  ;;  %v2239_v34 = vmul.f32 %v5088_v19, %v5088_v19 }
 0x538   : >> { %2181 = vst.msk [vmem:[%s5080_s29 + $0x14] sm:$0xf] %vm2175_vm6, %v2162_v18  ;;  %v2256_v28 = vsel %vm2192_vm1, %v2236_v5, 0.0 }
 0x539   : >> { %2184 = vst.msk [vmem:[%s5080_s29 + $0x20] sm:$0xf] %vm2175_vm6, %v2165_v10  ;;  %v2254_v10 = vsel %vm2192_vm1, %v2235_v9, 0.0 }
 0x53b   : >> { %v2122_v61 = vpop.f32.mrf.mxu0 }
 0x53c   : >> { %v2159_v35 = vpack.c.bf16 %v2122_v61, %v2122_v61  ;;  %v2233_v13 = vmul.f32 %v2122_v61, %v2122_v61  ;;  %v2196_v1 = vsel %vm2192_vm1, %v2122_v61, 0.0  ;;  %v2202_v61 = vsel %vm2192_vm1, %v2129_v20, 0.0 }
 0x53d   : >> { %v5096_v8 = vpop.f32.mrf.mxu3  ;;  %v2197_v26 = vadd.f32 %v2196_v1, %v2195_v63 }
 0x53e   : >> { %2178 = vst.msk [vmem:[%s5080_s29 + $0x8] sm:$0xf] %vm2175_vm6, %v2159_v35  ;;  %v2139_v44 = vpop.f32.mrf.mxu2  ;;  %v2169_v30 = vpack.c.bf16 %v5096_v8, %v5096_v8  ;;  %v2250_v17 = vsel %vm2192_vm1, %v2233_v13, 0.0 }
 0x53f   : >> { %v2132_v15 = vpop.f32.mrf.mxu1  ;;  %v2166_v25 = vpack.c.bf16 %v2139_v44, %v2139_v44  ;;  %v2251_v23 = vadd.f32 %v2250_v17, %v2249_v6  ;;  %v2240_v6 = vmul.f32 %v2139_v44, %v2139_v44 }
 0x540   : >> { %v2163_v32 = vpack.c.bf16 %v2132_v15, %v2132_v15  ;;  %2188 = vst.msk [vmem:[%s5080_s29 + $0x30] sm:$0xf] %vm2175_vm6, %v2169_v30  ;;  %v2237_v56 = vmul.f32 %v2132_v15, %v2132_v15  ;;  %v2204_v13 = vsel %vm2192_vm1, %v2132_v15, 0.0  ;;  %v2208_v15 = vsel %vm2192_vm1, %v5088_v19, 0.0 }
 0x541   : >> { %2185 = vst.msk [vmem:[%s5080_s29 + $0x24] sm:$0xf] %vm2175_vm6, %v2166_v25  ;;  %v2264_v19 = vsel %vm2192_vm1, %v2240_v6, 0.0 }
 0x542   : >> { %2182 = vst.msk [vmem:[%s5080_s29 + $0x18] sm:$0xf] %vm2175_vm6, %v2163_v32  ;;  %v2258_v20 = vsel %vm2192_vm1, %v2237_v56, 0.0 }
 0x543   : >> { %v2124_v22 = vpop.f32.mrf.mxu0 }
 0x544   : >> { %v2160_v4 = vpack.c.bf16 %v2124_v22, %v2124_v22  ;;  %v2198_v2 = vsel %vm2192_vm1, %v2124_v22, 0.0  ;;  %v2234_v62 = vmul.f32 %v2124_v22, %v2124_v22 }
 0x545   : >> { %v2199_v60 = vadd.f32 %v2198_v2, %v2197_v26  ;;  %v5115_v3 = vpop.f32.mrf.mxu3  ;;  %v2210_v2 = vsel %vm2192_vm1, %v2139_v44, 0.0 }
 0x546   : >> { %2179 = vst.msk [vmem:[%s5080_s29 + $0xc] sm:$0xf] %vm2175_vm6, %v2160_v4  ;;  %v2252_v52 = vsel %vm2192_vm1, %v2234_v62, 0.0  ;;  %v2170_v24 = vpack.c.bf16 %v5115_v3, %v5115_v3  ;;  %v2262_v4 = vsel %vm2192_vm1, %v2239_v34, 0.0 }
 0x547   : >> { %v2201_v0 = vadd.f32 %v2200_v12, %v2199_v60  ;;  %v2253_v58 = vadd.f32 %v2252_v52, %v2251_v23  ;;  %v2134_v18 = vpop.f32.mrf.mxu1 }
 0x548   : >> { %v2164_v35 = vpack.c.bf16 %v2134_v18, %v2134_v18  ;;  %2189 = vst.msk [vmem:[%s5080_s29 + $0x34] sm:$0xf] %vm2175_vm6, %v2170_v24  ;;  %v2238_v30 = vmul.f32 %v2134_v18, %v2134_v18  ;;  %v2206_v1 = vsel %vm2192_vm1, %v2134_v18, 0.0 }
 0x549   : >> { %v2255_v29 = vadd.f32 %v2254_v10, %v2253_v58  ;;  %v2203_v31 = vadd.f32 %v2202_v61, %v2201_v0  ;;  %v2243_v58 = vmul.f32 %v5096_v8, %v5096_v8 }
 0x54a   : >> { %2183 = vst.msk [vmem:[%s5080_s29 + $0x1c] sm:$0xf] %vm2175_vm6, %v2164_v35  ;;  %v2260_v26 = vsel %vm2192_vm1, %v2238_v30, 0.0 }
 0x54b   : >> { %v2205_v25 = vadd.f32 %v2204_v13, %v2203_v31  ;;  %v2257_v33 = vadd.f32 %v2256_v28, %v2255_v29  ;;  %v2216_v31 = vsel %vm2192_vm1, %v5096_v8, 0.0  ;;  %v2244_v28 = vmul.f32 %v5115_v3, %v5115_v3 }
 0x54c   : >> { %v2142_v32 = vpop.f32.mrf.mxu2  ;;  %v2270_v34 = vsel %vm2192_vm1, %v2243_v58, 0.0 }
 0x54d   : >> { %v2207_v63 = vadd.f32 %v2206_v1, %v2205_v25  ;;  %v2259_v16 = vadd.f32 %v2258_v20, %v2257_v33  ;;  %v2167_v17 = vpack.c.bf16 %v2142_v32, %v2142_v32  ;;  %v2241_v62 = vmul.f32 %v2142_v32, %v2142_v32 }
 0x54e   : >> { %v2212_v52 = vsel %vm2192_vm1, %v2142_v32, 0.0  ;;  %v2218_v20 = vsel %vm2192_vm1, %v5115_v3, 0.0  ;;  %v2272_v8 = vsel %vm2192_vm1, %v2244_v28, 0.0 }
 0x54f   : >> { %v2209_v22 = vadd.f32 %v2208_v15, %v2207_v63  ;;  %v2261_v9 = vadd.f32 %v2260_v26, %v2259_v16  ;;  %2186 = vst.msk [vmem:[%s5080_s29 + $0x28] sm:$0xf] %vm2175_vm6, %v2167_v17  ;;  %v2266_v18 = vsel %vm2192_vm1, %v2241_v62, 0.0 }
 0x550   : >> { %v2152_v23 = vpop.f32.mrf.mxu3 }
 0x551   : >> { %v2263_v60 = vadd.f32 %v2262_v4, %v2261_v9  ;;  %v2211_v12 = vadd.f32 %v2210_v2, %v2209_v22  ;;  %v2171_v5 = vpack.c.bf16 %v2152_v23, %v2152_v23  ;;  %v2245_v1 = vmul.f32 %v2152_v23, %v2152_v23 }
 0x552   : >> { %v2220_v17 = vsel %vm2192_vm1, %v2152_v23, 0.0 }
 0x553   : >> { %v2213_v24 = vadd.f32 %v2212_v52, %v2211_v12  ;;  %v2265_v0 = vadd.f32 %v2264_v19, %v2263_v60  ;;  %2190 = vst.msk [vmem:[%s5080_s29 + $0x38] sm:$0xf] %vm2175_vm6, %v2171_v5  ;;  %v2274_v22 = vsel %vm2192_vm1, %v2245_v1, 0.0 }
 0x554   : >> { %v2144_v44 = vpop.f32.mrf.mxu2 }
 0x555   : >> { %v2267_v10 = vadd.f32 %v2266_v18, %v2265_v0  ;;  %v2168_v61 = vpack.c.bf16 %v2144_v44, %v2144_v44  ;;  %v2214_v56 = vsel %vm2192_vm1, %v2144_v44, 0.0  ;;  %v2242_v35 = vmul.f32 %v2144_v44, %v2144_v44 }
 0x556   : >> { %v2215_v29 = vadd.f32 %v2214_v56, %v2213_v24 }
 0x557   : >> { %2187 = vst.msk [vmem:[%s5080_s29 + $0x2c] sm:$0xf] %vm2175_vm6, %v2168_v61  ;;  %v2268_v13 = vsel %vm2192_vm1, %v2242_v35, 0.0  ;;  %v2285_v35 = vadd.s32 (%p1836_p8), 16, %v3920_v37 }
 0x558   : >> { %v2217_v30 = vadd.f32 %v2216_v31, %v2215_v29  ;;  %v2269_v25 = vadd.f32 %v2268_v13, %v2267_v10  ;;  %v2154_v33 = vpop.f32.mrf.mxu3  ;;  %v2296_v29 = vadd.s32 (%p1836_p8), 16, %v4002_v55  ;;  %v2295_v31 = vadd.s32 (%p1836_p8), 16, %v4011_v57 }
 0x559   : >> { %v2172_v32 = vpack.c.bf16 %v2154_v33, %v2154_v33  ;;  %v2246_v15 = vmul.f32 %v2154_v33, %v2154_v33  ;;  %v2222_v9 = vsel %vm2192_vm1, %v2154_v33, 0.0  ;;  %vm2289_vm5 = vcmp.eq.s32.totalorder (%p1836_p8), %v4002_v55, %v2285_v35 }
 0x55a   : >> { %v2271_v63 = vadd.f32 %v2270_v34, %v2269_v25  ;;  %v2219_v16 = vadd.f32 %v2218_v20, %v2217_v30  ;;  %vm2300_vm2 = vcmp.eq.s32.totalorder (%p1836_p8), %v3920_v37, %v2296_v29  ;;  %vm2288_vm11 = vcmp.eq.s32.totalorder (%p1836_p8), %v4011_v57, %v2285_v35  ;;  %vm2293_vm9 = vmor (%p1836_p8), %vm5548_vm7, %vm2289_vm5 }
 0x55b   : >> { %2191 = vst.msk [vmem:[%s5080_s29 + $0x3c] sm:$0xf] %vm2175_vm6, %v2172_v32  ;;  %v2276_v3 = vsel %vm2192_vm1, %v2246_v15, 0.0  ;;  %vm2299_vm15 = vcmp.eq.s32.totalorder (%p1836_p8), %v3920_v37, %v2295_v31  ;;  %vm2304_vm12 = vmor (%p1836_p8), %vm2293_vm9, %vm2300_vm2  ;;  %vm5552_vm6 = vcmp.eq.s32.totalorder (%p1836_p8), %v3918_v36, %v3920_v37  ;;  %vm2376_vm2 = vcmp.ge.s32.totalorder (%p1836_p8), %v3920_v37, 16 }
 0x55c   : >> { %v2221_v6 = vadd.f32 %v2220_v17, %v2219_v16  ;;  %v2273_v26 = vadd.f32 %v2272_v8, %v2271_v63  ;;  %3201 = vmatpush.msk.msra.mxu0 (%p1836_p8), %vm2304_vm12, %v5549_v11  ;;  %vm2292_vm13 = vmor (%p1836_p8), %vm5550_vm3, %vm2288_vm11  ;;  %3206 = vmatpush.msk.msra.mxu1 (%p1836_p8), %vm2304_vm12, %v5549_v11  ;;  %v2377_v50 = vsel (%p1836_p8), %vm2376_vm2, 1, %v3808_v27 }
 0x55d   : > { %vm2303_vm0 = vmor (%p1836_p8), %vm2292_vm13, %vm2299_vm15  ;;  %vm2378_vm11 = vcmp.eq.s32.totalorder (%p1836_p8), %v2377_v50, %v3918_v36 }
 0x55e   : >> { %v2275_v4 = vadd.f32 %v2274_v22, %v2273_v26  ;;  %v2223_v2 = vadd.f32 %v2222_v9, %v2221_v6  ;;  %3202 = vmatpush.msk.msra.mxu0 (%p1836_p8), %vm2303_vm0, %v5549_v11  ;;  %3207 = vmatpush.msk.msra.mxu1 (%p1836_p8), %vm2303_vm0, %v5549_v11  ;;  %vm2301_vm5 = vmor (%p1836_p8), %vm5552_vm6, %vm2297_vm8  ;;  %v5211_v7 = vsel (%p1836_p8), %vm2378_vm11, 1.0, %v3809_v14 }
 0x560   : >> { %v2224_v62 = vrot.slane %v2223_v2, 4  ;;  %v2277_v60 = vadd.f32 %v2276_v3, %v2275_v4 }
 0x562   : >> { %v2225_v12 = vadd.f32 %v2224_v62, %v2223_v2  ;;  %v2278_v5 = vrot.slane %v2277_v60, 4 }
 0x564   : >> { %v2226_v19 = vrot.slane %v2225_v12, 2  ;;  %v2279_v52 = vadd.f32 %v2278_v5, %v2277_v60 }
 0x566   : >> { %v2227_v23 = vadd.f32 %v2226_v19, %v2225_v12  ;;  %v2280_v24 = vrot.slane %v2279_v52, 2 }
 0x568   : >> { %v2228_v0 = vrot.slane %v2227_v23, 1  ;;  %v2281_v58 = vadd.f32 %v2280_v24, %v2279_v52 }
 0x56a   : >> { %v2229_v18 = vadd.f32 %v2228_v0, %v2227_v23  ;;  %v2282_v44 = vrot.slane %v2281_v58, 1 }
 0x56c   : >> { %v2230_v10 = vadd.f32 %v3791_v54, %v2229_v18   ;;  %v2283_v61 = vadd.f32 %v2282_v44, %v2281_v58  ;;  %1838 = sbr.rel (!%p1836_p8) target bundleno = 1180 (0x49c), region = 142 }
 0x56e   : >> { %v2284_v56 = vadd.f32 %v3787_v39, %v2283_v61   ;;  %v5547_v54 = vmov %v2230_v10 }
 0x56f   : > { %v2294_v54 = vadd.s32 (%p1836_p8), 16, %v4023_v59 }
 0x570   : >> { %v5546_v39 = vmov %v2284_v56 }
 0x571   : > { %vm2298_vm10 = vcmp.eq.s32.totalorder %v3920_v37, %v2294_v54 }
 0x572   : > { %vm2302_vm4 = vmor %vm5551_vm14, %vm2298_vm10 }
 0x573   : > { %3203 = vmatpush.msk.msra.mxu0 %vm2302_vm4, %v5549_v11  ;;  %3208 = vmatpush.msk.msra.mxu1 %vm2302_vm4, %v5549_v11 }
 0x575   : > { %3204 = vmatpush.msk.msra.mxu0 %vm2301_vm5, %v5549_v11  ;;  %3209 = vmatpush.msk.msra.mxu1 %vm2301_vm5, %v5549_v11 }
 0x576   : > { %3205 = vmatmul.msk.f32.vlgmr.msra.gmra.mxu0 %vm2192_vm1, %v2230_v10  ;;  %3210 = vmatmul.msk.f32.vlgmr.msra.gmra.mxu1 %vm2192_vm1, %v2284_v56 }
 0x5f3   : > { %v2334_v39 = vpop.f32.mrf.mxu0  ;;  %v2357_v28 = vpop.f32.mrf.mxu1 }
 0x5f4   : > { %v5218_v13 = vmul.f32 0.0033333334, %v2334_v39  ;;  %v2361_v30 = vmul.f32 0.0033333334, %v2357_v28 }
 0x5f6   : > { %v2362_v25 = vmul.f32 %v5218_v13, %v5218_v13 }
 0x5f8   : > { %v2363_v33 = vsub.f32 %v2361_v30, %v2362_v25 }
 0x5fa   : > { %v2364_v34 = vmax.f32 %v2363_v33, 0.0 }
 0x5fc   : > { %v2365_v20 = vadd.f32 1e-05, %v2364_v34 }
 0x5fe   : > { %3679 = vrsqrt.f32 %v2365_v20  ;;  %vm2372_vm9 = vweird.f32 %v2365_v20 }
 0x604   : > { %v5222_v1 = vpop.eup %3679 }
 0x605   : > { %v2367_v32 = vmul.f32 %v5222_v1, %v2365_v20  ;;  %vm2373_vm7 = vweird.f32 %v5222_v1 }
 0x606   : > { %vm5230_vm15 = vmor %vm2372_vm9, %vm2373_vm7 }
 0x607   : > { %v2368_v63 = vmul.f32 %v5222_v1, %v2367_v32 }
 0x609   : > { %v2369_v16 = vmul.f32 0.5, %v2368_v63 }
 0x60b   : > { %v2370_v8 = vsub.f32 1.5, %v2369_v16 }
 0x60d   : > { %v5228_v17 = vmul.f32 %v5222_v1, %v2370_v8 }
 0x60f   : > { %v2375_v6 = vsel %vm5230_vm15, %v5222_v1, %v5228_v17 }
 0x610 LB: >> { %v3297_v26 = vld [vmem:[%s5428_s5 + $0x8] sm:$0xff]  ;;  %vm2524_vm12 = vcmp.lt.s32.totalorder %v3920_v37, 16  ;;  %v3296_v22 = vld [vmem:[%s5428_s5] sm:$0xff]  ;;  %s3212_s14 = sshll.u32 %s3799_s9, 7  ;;  %v5252_v9 = vperm.slane %v5218_v13, 0  ;;  %v3810_v2 = vmov 44   ;;  %s3799_s9 = sphi %s5238_s9, %s2387_s9  }
 0x611   : >> { %3561 = vmatpush.bf16.msra.mxu2 %v3297_v26  ;;  %3562 = vmatpush.bf16.msra.mxu3 %v3297_v26  ;;  %s2389_s15 = sshra.s32 %s3212_s14, 3  ;;  %v5254_v4 = vstv %s3212_s14  ;;  %v5256_v3 = vsel %vm2524_vm12, 256, %v3810_v2  ;;  %v5288_v58 = vperm.slane %v2375_v6, 0  ;;  %v3811_v56 = vmov 0.0   ;;  %s3263_s18 = sshll.u32 %s3799_s9, 1 }
 0x612   : >> { %2644 = vmatpush.bf16.msra.mxu0 %v3297_v26  ;;  %s3213_s16 = sshll.u32 %s2389_s15, 2  ;;  %v2514_v62 = vadd.s32 %v5254_v4, %v3975_v49  ;;  %v2515_v60 = vadd.s32 %v5254_v4, %v3964_v47  ;;  %v2520_v12 = vadd.s32 %v5254_v4, %v3933_v42  ;;  %v2521_v5 = vadd.s32 %v5254_v4, %v3930_v41  ;;  %s2794_s19 = scalar_lea.vmem [#allocation6], %s3263_s18 }
 0x613   : >> { %v2516_v19 = vadd.s32 %v5254_v4, %v3972_v48  ;;  %v5270_v52 = vadd.s32 %v5254_v4, %v3961_v46  ;;  %v5274_v23 = vadd.s32 %v5254_v4, %v3927_v40  ;;  %v5278_v24 = vadd.s32 %v5254_v4, %v3923_v38  ;;  %s5280_s17 = scalar_lea.vmem [#allocation3], %s3213_s16  ;;  %s2387_s9 = sadd.s32 1, %s3799_s9  }
 0x614   : >> { %v3496_v0 = vld [vmem:[%s5280_s17 + $0x18] sm:$0xff]   ;;  %vm2532_vm10 = vcmp.lt.s32.totalorder %v2514_v62, %v5256_v3  ;;  %vm2533_vm3 = vcmp.lt.s32.totalorder %v2515_v60, %v5256_v3  ;;  %v3499_v18 = vld [vmem:[%s5280_s17 + $0x30] sm:$0xff]   ;;  %vm2538_vm13 = vcmp.lt.s32.totalorder %v2520_v12, %v5256_v3  ;;  %v3497_v44 = vld [vmem:[%s5280_s17 + $0x20] sm:$0xff]   ;;  %vm2539_vm8 = vcmp.lt.s32.totalorder %v2521_v5, %v5256_v3  ;;  %p2384_p9 = scmp.ge.s32.totalorder %s2387_s9, 2  }
 0x615   : >> { %3563 = vmatpush.bf16.msra.mxu2 %v3296_v22  ;;  %3564 = vmatpush.bf16.msra.mxu3 %v3296_v22  ;;  %v3448_v10 = vunpack.c.l.bf16 %v3496_v0  ;;  %v3449_v61 = vunpack.c.h.bf16 %v3496_v0  ;;  %v3220_v35 = vsel %vm2532_vm10, 1.0, %v3811_v56  ;;  %v3221_v29 = vsel %vm2533_vm3, 1.0, %v3811_v56 }
 0x616   : >> { %2645 = vmatpush.bf16.msra.mxu0 %v3296_v22  ;;  %v3460_v31 = vunpack.c.l.bf16 %v3499_v18  ;;  %v3461_v54 = vunpack.c.h.bf16 %v3499_v18  ;;  %v3226_v11 = vsel %vm2538_vm13, 1.0, %v3811_v56  ;;  %v3227_v14 = vsel %vm2539_vm8, 1.0, %v3811_v56 }
 0x617   : >> { %v2432_v27 = vsub.f32 %v3448_v10, %v5252_v9  ;;  %v2433_v50 = vsub.f32 %v3449_v61, %v5252_v9  ;;  %v3452_v39 = vunpack.c.l.bf16 %v3497_v44  ;;  %v3453_v25 = vunpack.c.h.bf16 %v3497_v44  ;;  %v3500_v61 = vld [vmem:[%s5280_s17 + $0x38] sm:$0xff]  }
 0x618   : >> { %v2438_v28 = vsub.f32 %v3460_v31, %v5252_v9  ;;  %v2439_v30 = vsub.f32 %v3461_v54, %v5252_v9  ;;  %vm2534_vm0 = vcmp.lt.s32.totalorder %v2516_v19, %v5256_v3  ;;  %vm2535_vm14 = vcmp.lt.s32.totalorder %v5270_v52, %v5256_v3 }
 0x619   : >> { %v2449_v33 = vmul.f32 %v5288_v58, %v2432_v27  ;;  %v2450_v34 = vmul.f32 %v5288_v58, %v2433_v50  ;;  %v2434_v20 = vsub.f32 %v3452_v39, %v5252_v9  ;;  %v2435_v16 = vsub.f32 %v3453_v25, %v5252_v9  ;;  %v3435_v25 = vld [vmem:[%s5280_s17] sm:$0xff]  }
 0x61a   : >> { %v2455_v32 = vmul.f32 %v5288_v58, %v2438_v28  ;;  %v2456_v63 = vmul.f32 %v5288_v58, %v2439_v30  ;;  %v3222_v8 = vsel %vm2534_vm0, 1.0, %v3811_v56  ;;  %v3223_v28 = vsel %vm2535_vm14, 1.0, %v3811_v56 }
 0x61b   : >> { %vm2465_vm4 = vcmp.ge.f32.partialorder %v2449_v33, 0.0  ;;  %vm2466_vm6 = vcmp.ge.f32.partialorder %v2450_v34, 0.0  ;;  %v2481_v26 = vmul.f32 0.01, %v2449_v33  ;;  %v2482_v22 = vmul.f32 0.01, %v2450_v34 }
 0x61c   : >> { %vm2471_vm5 = vcmp.ge.f32.partialorder %v2455_v32, 0.0  ;;  %vm2472_vm2 = vcmp.ge.f32.partialorder %v2456_v63, 0.0  ;;  %v2487_v2 = vmul.f32 0.01, %v2455_v32  ;;  %v2488_v62 = vmul.f32 0.01, %v2456_v63 }
 0x61d   : >> { %v2497_v60 = vsel %vm2465_vm4, %v2449_v33, %v2481_v26  ;;  %v2498_v12 = vsel %vm2466_vm6, %v2450_v34, %v2482_v22  ;;  %v2451_v5 = vmul.f32 %v5288_v58, %v2434_v20  ;;  %v2452_v19 = vmul.f32 %v5288_v58, %v2435_v16 }
 0x61e   : >> { %v2580_v0 = vmul.f32 %v3220_v35, %v2497_v60  ;;  %v2581_v18 = vmul.f32 %v3221_v29, %v2498_v12  ;;  %v2503_v44 = vsel %vm2471_vm5, %v2455_v32, %v2487_v2  ;;  %v2504_v10 = vsel %vm2472_vm2, %v2456_v63, %v2488_v62  ;;  %v3498_v32 = vld [vmem:[%s5280_s17 + $0x28] sm:$0xff]  }
 0x61f   : >> { %v2586_v31 = vmul.f32 %v3226_v11, %v2503_v44  ;;  %v2587_v54 = vmul.f32 %v3227_v14, %v2504_v10  ;;  %vm2467_vm11 = vcmp.ge.f32.partialorder %v2451_v5, 0.0  ;;  %vm2468_vm7 = vcmp.ge.f32.partialorder %v2452_v19, 0.0 }
 0x620   : >> { %v2593_v27 = vpack.c.bf16 %v2581_v18, %v2580_v0  ;;  %v2483_v50 = vmul.f32 0.01, %v2451_v5  ;;  %v2484_v39 = vmul.f32 0.01, %v2452_v19  ;;  %v3464_v35 = vunpack.c.l.bf16 %v3500_v61 }
 0x621   : >> { %v2596_v30 = vpack.c.bf16 %v2587_v54, %v2586_v31  ;;  %v3465_v29 = vunpack.c.h.bf16 %v3500_v61  ;;  %vm2540_vm9 = vcmp.lt.s32.totalorder %v5274_v23, %v5256_v3  ;;  %vm2541_vm12 = vcmp.lt.s32.totalorder %v5278_v24, %v5256_v3 }
 0x622   : >> { %3241 = vmatmul.msk.bf16.vlgmr.msra.gmra.mxu2 %vm2192_vm1, %v2593_v27  ;;  %v2499_v11 = vsel %vm2467_vm11, %v2451_v5, %v2483_v50  ;;  %v2500_v14 = vsel %vm2468_vm7, %v2452_v19, %v2484_v39  ;;  %v2440_v52 = vsub.f32 %v3464_v35, %v5252_v9  ;;  %v3228_v20 = vsel %vm2540_vm9, 1.0, %v3811_v56  ;;  %v3494_v39 = vld [vmem:[%s5280_s17 + $0x8] sm:$0xff]  }
 0x623   : >> { %3244 = vmatmul.msk.bf16.vlgmr.msra.gmra.mxu3 %vm2192_vm1, %v2596_v30  ;;  %v2582_v33 = vmul.f32 %v3222_v8, %v2499_v11  ;;  %v2441_v34 = vsub.f32 %v3465_v29, %v5252_v9  ;;  %v2583_v63 = vmul.f32 %v3223_v28, %v2500_v14  ;;  %v3436_v23 = vunpack.c.l.bf16 %v3435_v25 }
 0x624   : >> { %v3437_v16 = vunpack.c.h.bf16 %v3435_v25  ;;  %v2508_v26 = vadd.s32 %v5254_v4, %v3918_v36  ;;  %v2457_v22 = vmul.f32 %v5288_v58, %v2440_v52  ;;  %v3229_v2 = vsel %vm2541_vm12, 1.0, %v3811_v56 }
 0x625   : >> { %v2458_v24 = vmul.f32 %v5288_v58, %v2441_v34  ;;  %v2509_v8 = vadd.s32 %v5254_v4, %v4023_v59  ;;  %v2426_v62 = vsub.f32 %v3436_v23, %v5252_v9  ;;  %v3456_v12 = vunpack.c.l.bf16 %v3498_v32 }
 0x626   : >> { %v2427_v60 = vsub.f32 %v3437_v16, %v5252_v9  ;;  %vm2526_vm10 = vcmp.lt.s32.totalorder %v2508_v26, %v5256_v3  ;;  %vm2473_vm3 = vcmp.ge.f32.partialorder %v2457_v22, 0.0  ;;  %v2489_v5 = vmul.f32 0.01, %v2457_v22 }
 0x627   : >> { %vm2474_vm13 = vcmp.ge.f32.partialorder %v2458_v24, 0.0  ;;  %v2490_v19 = vmul.f32 0.01, %v2458_v24  ;;  %v2443_v0 = vmul.f32 %v5288_v58, %v2426_v62  ;;  %vm2527_vm8 = vcmp.lt.s32.totalorder %v2509_v8, %v5256_v3 }
 0x628   : >> { %v2444_v18 = vmul.f32 %v5288_v58, %v2427_v60  ;;  %v3214_v44 = vsel %vm2526_vm10, 1.0, %v3811_v56  ;;  %v2505_v10 = vsel %vm2473_vm3, %v2457_v22, %v2489_v5  ;;  %v3215_v31 = vsel %vm2527_vm8, 1.0, %v3811_v56 }
 0x629   : >> { %v2506_v61 = vsel %vm2474_vm13, %v2458_v24, %v2490_v19  ;;  %v3457_v54 = vunpack.c.h.bf16 %v3498_v32  ;;  %v2588_v27 = vmul.f32 %v3228_v20, %v2505_v10  ;;  %vm2459_vm0 = vcmp.ge.f32.partialorder %v2443_v0, 0.0  ;;  %v3495_v19 = vld [vmem:[%s5280_s17 + $0x10] sm:$0xff]  }
 0x62a   : >> { %v2589_v50 = vmul.f32 %v3229_v2, %v2506_v61  ;;  %vm2460_vm14 = vcmp.ge.f32.partialorder %v2444_v18, 0.0  ;;  %v2475_v28 = vmul.f32 0.01, %v2443_v0  ;;  %v2476_v30 = vmul.f32 0.01, %v2444_v18 }
 0x62b   : >> { %v2436_v35 = vsub.f32 %v3456_v12, %v5252_v9  ;;  %v2437_v29 = vsub.f32 %v3457_v54, %v5252_v9  ;;  %v2518_v25 = vadd.s32 %v5254_v4, %v3953_v45  ;;  %v2519_v11 = vadd.s32 %v5254_v4, %v3936_v43 }
 0x62c   : >> { %v2491_v14 = vsel %vm2459_vm0, %v2443_v0, %v2475_v28  ;;  %v2492_v52 = vsel %vm2460_vm14, %v2444_v18, %v2476_v30  ;;  %v3440_v20 = vunpack.c.l.bf16 %v3494_v39  ;;  %v2594_v32 = vpack.c.bf16 %v2583_v63, %v2582_v33 }
 0x62d   : >> { %v2453_v34 = vmul.f32 %v5288_v58, %v2436_v35  ;;  %v2574_v23 = vmul.f32 %v3214_v44, %v2491_v14  ;;  %v2575_v16 = vmul.f32 %v3215_v31, %v2492_v52  ;;  %v2454_v26 = vmul.f32 %v5288_v58, %v2437_v29 }
 0x62e   : >> { %v2597_v22 = vpack.c.bf16 %v2589_v50, %v2588_v27  ;;  %vm2536_vm4 = vcmp.lt.s32.totalorder %v2518_v25, %v5256_v3  ;;  %v3441_v2 = vunpack.c.h.bf16 %v3494_v39  ;;  %vm2537_vm6 = vcmp.lt.s32.totalorder %v2519_v11, %v5256_v3 }
 0x62f   : >> { %v2590_v24 = vpack.c.bf16 %v2575_v16, %v2574_v23  ;;  %v2485_v8 = vmul.f32 0.01, %v2453_v34  ;;  %v2428_v62 = vsub.f32 %v3440_v20, %v5252_v9  ;;  %v2510_v60 = vadd.s32 %v5254_v4, %v4011_v57 }
 0x630   : >> { %vm2469_vm5 = vcmp.ge.f32.partialorder %v2453_v34, 0.0  ;;  %v2486_v33 = vmul.f32 0.01, %v2454_v26  ;;  %v2429_v63 = vsub.f32 %v3441_v2, %v5252_v9  ;;  %vm2470_vm2 = vcmp.ge.f32.partialorder %v2454_v26, 0.0 }
 0x631   : >> { %3238 = vmatmul.msk.bf16.vlgmr.msra.gmra.mxu0 %vm2192_vm1, %v2590_v24  ;;  %v2445_v12 = vmul.f32 %v5288_v58, %v2428_v62  ;;  %v2511_v5 = vadd.s32 %v5254_v4, %v4002_v55  ;;  %v3224_v0 = vsel %vm2536_vm4, 1.0, %v3811_v56  ;;  %v3225_v18 = vsel %vm2537_vm6, 1.0, %v3811_v56 }
 0x632   : >> { %3242 = vmatmul.msk.bf16.gmra.mxu2 %vm2192_vm1, %v2594_v32  ;;  %v2446_v44 = vmul.f32 %v5288_v58, %v2429_v63  ;;  %vm2528_vm11 = vcmp.lt.s32.totalorder %v2510_v60, %v5256_v3  ;;  %v2501_v10 = vsel %vm2469_vm5, %v2453_v34, %v2485_v8  ;;  %v2502_v31 = vsel %vm2470_vm2, %v2454_v26, %v2486_v33 }
 0x633   : >> { %3245 = vmatmul.msk.bf16.gmra.mxu3 %vm2192_vm1, %v2597_v22  ;;  %vm2461_vm7 = vcmp.ge.f32.partialorder %v2445_v12, 0.0  ;;  %v2477_v61 = vmul.f32 0.01, %v2445_v12  ;;  %vm2529_vm9 = vcmp.lt.s32.totalorder %v2511_v5, %v5256_v3  ;;  %v3444_v27 = vunpack.c.l.bf16 %v3495_v19 }
 0x634   : >> { %vm2462_vm12 = vcmp.ge.f32.partialorder %v2446_v44, 0.0  ;;  %v2478_v54 = vmul.f32 0.01, %v2446_v44  ;;  %v3216_v39 = vsel %vm2528_vm11, 1.0, %v3811_v56  ;;  %v3217_v28 = vsel %vm2529_vm9, 1.0, %v3811_v56 }
 0x635   : >> { %v2493_v50 = vsel %vm2461_vm7, %v2445_v12, %v2477_v61  ;;  %v3445_v30 = vunpack.c.h.bf16 %v3495_v19  ;;  %v2584_v29 = vmul.f32 %v3224_v0, %v2501_v10  ;;  %v2585_v25 = vmul.f32 %v3225_v18, %v2502_v31 }
 0x636   : >> { %v2494_v35 = vsel %vm2462_vm12, %v2446_v44, %v2478_v54  ;;  %v2576_v11 = vmul.f32 %v3216_v39, %v2493_v50  ;;  %v2430_v52 = vsub.f32 %v3444_v27, %v5252_v9  ;;  %v2512_v26 = vadd.s32 %v5254_v4, %v3993_v53 }
 0x637   : >> { %v2577_v14 = vmul.f32 %v3217_v28, %v2494_v35  ;;  %v2431_v34 = vsub.f32 %v3445_v30, %v5252_v9  ;;  %v2595_v20 = vpack.c.bf16 %v2585_v25, %v2584_v29  ;;  %v2513_v22 = vadd.s32 %v5254_v4, %v3984_v51 }
 0x638   : >> { %v2447_v23 = vmul.f32 %v5288_v58, %v2430_v52  ;;  %vm2530_vm13 = vcmp.lt.s32.totalorder %v2512_v26, %v5256_v3 }
 0x639   : >> { %v2591_v32 = vpack.c.bf16 %v2577_v14, %v2576_v11  ;;  %v2448_v16 = vmul.f32 %v5288_v58, %v2431_v34  ;;  %vm2531_vm8 = vcmp.lt.s32.totalorder %v2513_v22, %v5256_v3  ;;  %v3218_v8 = vsel %vm2530_vm13, 1.0, %v3811_v56 }
 0x63a   : >> { %v2479_v24 = vmul.f32 0.01, %v2447_v23  ;;  %vm2463_vm10 = vcmp.ge.f32.partialorder %v2447_v23, 0.0  ;;  %v3219_v62 = vsel %vm2531_vm8, 1.0, %v3811_v56  ;;  %v2688_v3 = vperm.slane %v5216_v21, 0 }
 0x63b   : >> { %v2480_v2 = vmul.f32 0.01, %v2448_v16  ;;  %vm2464_vm3 = vcmp.ge.f32.partialorder %v2448_v16, 0.0 }
 0x63c   : >> { %v2495_v9 = vsel %vm2463_vm10, %v2447_v23, %v2479_v24 }
 0x63d   : >> { %v2496_v58 = vsel %vm2464_vm3, %v2448_v16, %v2480_v2  ;;  %v2578_v60 = vmul.f32 %v3218_v8, %v2495_v9 }
 0x63e   : >> { %v2579_v4 = vmul.f32 %v3219_v62, %v2496_v58 }
 0x640   : >> { %v2592_v33 = vpack.c.bf16 %v2579_v4, %v2578_v60 }
 0x641   : >> { %3239 = vmatmul.msk.bf16.gmra.mxu0 %vm2192_vm1, %v2591_v32 }
 0x642   : >> { %3243 = vmatmul.msk.bf16.gmra.mxu2 %vm2192_vm1, %v2595_v20 }
 0x651   : >> { %3240 = vmatmul.msk.bf16.gmra.mxu0 %vm2192_vm1, %v2592_v33 }
 0x6a5   : >> { %v2662_v63 = vpop.f32.mrf.mxu2 }
 0x6a6   : >> { %v2677_v12 = vpop.f32.mrf.mxu3  ;;  %v2696_v9 = vsub.f32 %v2662_v63, %v2688_v3 }
 0x6a7   : >> { %v2702_v35 = vsub.f32 %v2677_v12, %v2688_v3 }
 0x6a8   : >> { %v2712_v62 = vmul.f32 %v2696_v9, %v2696_v9 }
 0x6a9   : >> { %v2718_v25 = vmul.f32 %v2702_v35, %v2702_v35 }
 0x6ad   : >> { %v2664_v5 = vpop.f32.mrf.mxu2 }
 0x6ae   : >> { %v2679_v19 = vpop.f32.mrf.mxu3  ;;  %v2647_v0 = vpop.f32.mrf.mxu0  ;;  %v2697_v24 = vsub.f32 %v2664_v5, %v2688_v3 }
 0x6af   : >> { %v2703_v39 = vsub.f32 %v2679_v19, %v2688_v3 }
 0x6b0   : >> { %v2713_v58 = vmul.f32 %v2697_v24, %v2697_v24 }
 0x6b1   : >> { %v2719_v29 = vmul.f32 %v2703_v39, %v2703_v39 }
 0x6b5   : >> { %v2667_v18 = vpop.f32.mrf.mxu2 }
 0x6b6   : >> { %v2682_v44 = vpop.f32.mrf.mxu3  ;;  %v2649_v10 = vpop.f32.mrf.mxu0  ;;  %v2698_v26 = vsub.f32 %v2667_v18, %v2688_v3 }
 0x6b7   : >> { %v2704_v27 = vsub.f32 %v2682_v44, %v2688_v3  ;;  %v2691_v63 = vsub.f32 %v2649_v10, %v2688_v3 }
 0x6b8   : >> { %v2714_v2 = vmul.f32 %v2698_v26, %v2698_v26 }
 0x6b9   : >> { %v2720_v28 = vmul.f32 %v2704_v27, %v2704_v27 }
 0x6bd   : >> { %v2669_v61 = vpop.f32.mrf.mxu2 }
 0x6be   : >> { %v2684_v31 = vpop.f32.mrf.mxu3  ;;  %v2652_v50 = vpop.f32.mrf.mxu0  ;;  %v2699_v32 = vsub.f32 %v2669_v61, %v2688_v3  ;;  %v2690_v61 = vsub.f32 %v2647_v0, %v2688_v3 }
 0x6bf   : >> { %v2705_v54 = vsub.f32 %v2684_v31, %v2688_v3  ;;  %v2692_v5 = vsub.f32 %v2652_v50, %v2688_v3  ;;  %v2707_v31 = vmul.f32 %v2691_v63, %v2691_v63 }
 0x6c0   : >> { %v2715_v22 = vmul.f32 %v2699_v32, %v2699_v32 }
 0x6c1   : >> { %v2721_v56 = vmul.f32 %v2705_v54, %v2705_v54  ;;  %v2708_v44 = vmul.f32 %v2692_v5, %v2692_v5  ;;  %v2706_v54 = vmul.f32 %v2690_v61, %v2690_v61 }
 0x6c3   : >> { %3246 = vmatpush.xpose.msk.msra.mxu1 %vm2192_vm1, %v2721_v56 }
 0x6c5   : >> { %v2672_v30 = vpop.f32.mrf.mxu2 }
 0x6c6   : >> { %v2654_v14 = vpop.f32.mrf.mxu0  ;;  %v2700_v20 = vsub.f32 %v2672_v30, %v2688_v3 }
 0x6c7   : >> { %3247 = vmatpush.xpose.msk.msra.mxu1 %vm2192_vm1, %v2720_v28  ;;  %v2693_v12 = vsub.f32 %v2654_v14, %v2688_v3 }
 0x6c8   : >> { %v2716_v23 = vmul.f32 %v2700_v20, %v2700_v20 }
 0x6c9   : >> { %v2709_v18 = vmul.f32 %v2693_v12, %v2693_v12 }
 0x6cb   : >> { %3248 = vmatpush.xpose.msk.msra.mxu1 %vm2192_vm1, %v2719_v29 }
 0x6cd   : >> { %v2674_v11 = vpop.f32.mrf.mxu2 }
 0x6ce   : >> { %v2701_v52 = vsub.f32 %v2674_v11, %v2688_v3  ;;  %v2657_v16 = vpop.f32.mrf.mxu0 }
 0x6cf   : >> { %3249 = vmatpush.xpose.msk.msra.mxu1 %vm2192_vm1, %v2718_v25  ;;  %v2694_v4 = vsub.f32 %v2657_v16, %v2688_v3 }
 0x6d0   : >> { %v2717_v34 = vmul.f32 %v2701_v52, %v2701_v52 }
 0x6d1   : >> { %v2710_v19 = vmul.f32 %v2694_v4, %v2694_v4 }
 0x6d3   : >> { %3250 = vmatpush.xpose.msk.msra.mxu1 %vm2192_vm1, %v2717_v34 }
 0x6d6   : >> { %v2659_v8 = vpop.f32.mrf.mxu0 }
 0x6d7   : >> { %3251 = vmatpush.xpose.msk.msra.mxu1 %vm2192_vm1, %v2716_v23  ;;  %v2695_v60 = vsub.f32 %v2659_v8, %v2688_v3 }
 0x6d9   : >> { %v2711_v33 = vmul.f32 %v2695_v60, %v2695_v60 }
 0x6db   : >> { %3252 = vmatpush.xpose.msk.msra.mxu1 %vm2192_vm1, %v2715_v22 }
 0x6df   : >> { %3253 = vmatpush.xpose.msk.msra.mxu1 %vm2192_vm1, %v2714_v2 }
 0x6e3   : >> { %3254 = vmatpush.xpose.msk.msra.mxu1 %vm2192_vm1, %v2713_v58 }
 0x6e7   : >> { %3255 = vmatpush.xpose.msk.msra.mxu1 %vm2192_vm1, %v2712_v62 }
 0x6eb   : >> { %3256 = vmatpush.xpose.msk.msra.mxu1 %vm2192_vm1, %v2711_v33 }
 0x6ef   : >> { %3257 = vmatpush.xpose.msk.msra.mxu1 %vm2192_vm1, %v2710_v19 }
 0x6f3   : >> { %3258 = vmatpush.xpose.msk.msra.mxu1 %vm2192_vm1, %v2709_v18 }
 0x6f7   : >> { %3259 = vmatpush.xpose.msk.msra.mxu1 %vm2192_vm1, %v2708_v44 }
 0x6fb   : >> { %3260 = vmatpush.xpose.msk.msra.mxu1 %vm2192_vm1, %v2707_v31 }
 0x6ff   : >> { %3261 = vmatpush.xpose.msk.msra.mxu1 %vm2192_vm1, %v2706_v54 }
 0x702   : >> { %3262 = vmatmul.msk.f32.vlgmr.msra.gmra.mxu1 %vm2192_vm1, %v5211_v7 }
 0x77c   : > { %2386 = sbr.rel (!%p2384_p9) target bundleno = 1552 (0x610), region = 153 }
 0x77f   : >> { %v2790_v27 = vpop.f32.mrf.mxu1 }
 0x780   : >> { %2795 = vst [vmem:[%s2794_s19] sm:$0x3] %v2790_v27 }
 0x781 PF: > { %p3569_p10 = scmp.eq.s32.totalorder %s3861_s25, 1  ;;  %s3812_s21 = smov [#allocation6]  }
 0x782   : > { %s2801_s20 = sshll.u32 %s3812_s21, 4  ;;  %s2803_s26 = sshll.u32 %s5430_s7, 4  ;;  %s2802_s20 = int_to_ptr.vmem [resolvable:$true] %s2801_s20  ;;  %s2804_s26 = int_to_ptr.hbm [resolvable:$true] %s2803_s26 }
 0x783   : > { %s3813_s27 = smov 32   ;;  %s3814_s28 = smov 2  }
 0x784   : > { %3566 = dma.vmem_to_hbm [thread:$0]  (%p3569_p10), %s2802_s20, 64, %s2804_s26, [#allocation7], %s3813_s27, %s3813_s27, %s3814_s28  }
 0x785   : > { %3754 = dma.done.wait (%p3569_p10), [#allocation7], 64  }
 0x786   : > { %3756 = vsyncadd (%p3569_p10), [#allocation7], 4294967232 }
 0x787 PF: > { %s18_s24 = sadd.s32 1, %s3759_s24  }
 0x788   : > { %p15_p11 = scmp.ge.s32.totalorder %s18_s24, 4  }
 0x78a   :  { %17 = sbr.rel (!%p15_p11) target bundleno = 1 (0x1), region = 164 }
 0x78f   :  { %2820 = vsyncpa [#allocation7], 1 }
 0x790   :  { %2822 = vsyncpa [#allocation7 + $0x1], 1 }

</bundles_post_ra>
